<compile_context>
chip_gen: v6e
topology: v6e:2x2x1
jax: 0.10.0
libtpu: 0.0.40
codegen_flags: <defaults>
</compile_context>

<pallas_src>
import functools

import jax
import jax.numpy as jnp
from jax.experimental import pallas as pl
from jax.experimental.pallas import tpu as pltpu


# ----------------------------- fused ViT kernel ------------------------------

def _vit_fused_kernel(*refs, num_heads, d_model, num_blocks, num_cls_layers,
                      t_pad, t_real, group, use_cls):
    """Full ViT forward for one grid step (= `group` folded batch elements).

    refs layout:
      [0]  patches   (1, G*Tpad, C*p*p)  bf16; zero rows at cls slot + sublane pad
      [1]  tok_bias  (G*Tpad, D)         f32; proj_b + pos_emb (+ cls token row 0)
      [2]  proj_w    (C*p*p, D)          bf16
      [3]  key_bias  (H*G*Tpad, G*Tpad)  f32; block-diag batch mask + pad-key -inf,
                                         tiled over heads along the sublane axis
      [4:20]       16 encoder params, each stacked over blocks on a leading axis
      [20:20+2L]   classifier (w, b) pairs (w bf16, b f32)
      [-1]  output  (1, G, num_classes)
    """
    patch_ref, tokb_ref, projw_ref, kbias_ref = refs[:4]
    (ln1g, ln1b, wq, bq, wk, bk, wv, bv,
     wo, bo, ln2g, ln2b, w1, b1, w2, b2) = refs[4:20]
    cls_refs = refs[20:20 + 2 * num_cls_layers]
    o_ref = refs[20 + 2 * num_cls_layers]

    gt = group * t_pad
    dh = d_model // num_heads
    eps = 1e-5
    inv_dm = 1.0 / float(d_model)        # reference scales scores by 1/d_model
    bf = jnp.bfloat16

    def mm(a, b):                        # (m,k)@(k,n): bf16 operands, f32 accumulate
        return jnp.dot(a.astype(bf), b.astype(bf),
                       preferred_element_type=jnp.float32)

    def mm_nt(a, b):                     # (m,k)x(n,k)->(m,n): contract last dims,
        return jax.lax.dot_general(      # no materialized transpose of b
            a.astype(bf), b.astype(bf), (((1,), (1,)), ((), ())),
            preferred_element_type=jnp.float32)

    def layernorm(z, g, b):              # f32 vector math throughout
        mu = jnp.mean(z, axis=-1, keepdims=True)
        var = jnp.mean(jnp.square(z - mu), axis=-1, keepdims=True)
        return (z - mu) * jax.lax.rsqrt(var + eps) * g + b

    # Hoisted constants (out of the block loop).
    key_bias = kbias_ref[...]                                        # (H*gt, gt)
    lane_ids = jax.lax.broadcasted_iota(jnp.int32, (1, d_model), 1)
    hms = [jnp.logical_and(lane_ids >= h * dh,
                           lane_ids < (h + 1) * dh).astype(jnp.float32)
           for h in range(num_heads)]                                # each (1, D)

    # Patch embedding; cls token / positional embedding / proj bias were
    # pre-combined into tok_bias; padded token rows stay exactly zero.
    x = mm(patch_ref[0], projw_ref[...]) + tokb_ref[...]             # (gt, D) f32

    for bi in range(num_blocks):
        # --- LayerNorm 1 ---
        xn = layernorm(x, ln1g[bi], ln1b[bi])

        # --- multi-head attention (attn dropout = identity, eval mode) ---
        # all-head Q/K/V: three lane-dense (gt,D)@(D,D) matmuls
        q = (mm(xn, wq[bi]) + bq[bi]) * inv_dm        # scale folded into q
        k = mm(xn, wk[bi]) + bk[bi]
        v = mm(xn, wv[bi]) + bv[bi]

        # Stack the per-head lane-masked queries along the sublane axis so ALL
        # heads share one score matmul, ONE softmax and one PV matmul.
        q_stack = jnp.concatenate([q * m for m in hms], axis=0)      # (H*gt, D)
        s = mm_nt(q_stack, k) + key_bias                             # (H*gt, gt)
        s = s - jnp.max(s, axis=-1, keepdims=True)
        e = jnp.exp(s)
        p = e * pl.reciprocal(jnp.sum(e, axis=-1, keepdims=True), approx=True)
        pv = mm(p, v)                                                # (H*gt, D)

        # Recover the concatenated-heads tensor: each head's sublane block is
        # lane-masked to its own d_head columns (disjoint) and summed.
        attn = pv[0:gt, :] * hms[0]
        for h in range(1, num_heads):
            attn = attn + pv[h * gt:(h + 1) * gt, :] * hms[h]

        # concatenated-heads output projection (intrahead_mlp) + residual 1
        y = x + mm(attn, wo[bi]) + bo[bi]

        # --- LayerNorm 2 + MLP: Linear -> ReLU -> (Dropout=id) -> Linear ---
        yn = layernorm(y, ln2g[bi], ln2b[bi])
        h1 = jnp.maximum(mm(yn, w1[bi]) + b1[bi], 0.0)
        x = y + mm(h1, w2[bi]) + b2[bi]

    # --- pooling (per folded batch element) ---
    if use_cls:
        feats = jnp.concatenate(
            [x[g * t_pad:g * t_pad + 1, :] for g in range(group)], axis=0)
    else:
        feats = jnp.concatenate(
            [jnp.mean(x[g * t_pad:g * t_pad + t_real, :], axis=0, keepdims=True)
             for g in range(group)], axis=0)

    # --- classifier: Linear -> ReLU -> (Dropout=id) for EVERY layer, including
    #     the last one (faithful to the reference nn.Sequential construction) ---
    out = feats
    for l in range(num_cls_layers):
        out = jnp.maximum(
            mm(out, cls_refs[2 * l][...]) + cls_refs[2 * l + 1][...], 0.0)

    o_ref[0] = out.astype(o_ref.dtype)


# ------------------------------ ViT forward ----------------------------------

def _default_batch_per_step(n):
    """Fold the whole batch into one grid step on single-TensorCore parts
    (v5e/v6e); keep >= 2 parallel grid steps on dual-TensorCore parts (v7x,
    and megacore v4/v5p) so both cores get work."""
    try:
        kind = jax.devices()[0].device_kind.lower()
    except Exception:
        kind = ""
    dual_core = any(tag in kind for tag in ("v7", "v4", "v5p"))
    if dual_core and n > 1:
        return (n + 1) // 2
    return n


def vit_forward(x, params, cfg, batch_per_step=None):
    N, C, H, W = x.shape
    p = cfg["patch_size"]
    D = cfg["d_model"]
    nh = cfg["num_heads"]
    Hp, Wp = H // p, W // p
    Tp = Hp * Wp
    use_cls = bool(cfg["cls_token"])
    off = int(use_cls)
    t_real = Tp + off
    t_pad = ((t_real + 7) // 8) * 8          # pad tokens to a multiple of 8 sublanes
    cpp = C * p * p
    bf = jnp.bfloat16

    if batch_per_step is None:
        batch_per_step = _default_batch_per_step(N)
    G = max(1, min(int(batch_per_step), N))
    steps = -(-N // G)
    Npad = steps * G
    gt = G * t_pad

    # --- glue: patch extraction (strided Conv2d == reshape + matmul; layout only)
    # Per-patch flatten order is (c, kh, kw), matching Conv2d weight layout.
    patches = (x.reshape(N, C, Hp, p, Wp, p)
                 .transpose(0, 2, 4, 1, 3, 5)
                 .reshape(N, Tp, cpp)).astype(jnp.float32)
    patch_pad = jnp.zeros((Npad, t_pad, cpp), jnp.float32)
    patch_pad = patch_pad.at[:N, off:off + Tp, :].set(patches)
    patch_pad = patch_pad.reshape(steps, gt, cpp).astype(bf)

    # --- glue: parameter pre-combination (input independent) ---
    # per-element token bias: row 0 = cls_token + pos_emb[0] (if cls),
    # real rows = proj_b + pos_emb[token], padded rows = 0; tiled over the group.
    tok_bias1 = jnp.zeros((t_pad, D), jnp.float32)
    tok_bias1 = tok_bias1.at[off:t_real, :].set(
        params["pos_emb"][off:t_real] + params["proj_b"])
    if use_cls:
        tok_bias1 = tok_bias1.at[0:1, :].set(
            params["pos_emb"][0:1] + params["cls_token"])
    tok_bias = jnp.tile(tok_bias1, (G, 1))                        # (gt, D)

    # Block-diagonal key bias: query rows of batch g may only attend to the
    # real (non-pad) key columns of batch g; tiled over heads along sublanes.
    col = jnp.arange(gt)
    row = jnp.arange(gt)
    valid = ((col[None, :] // t_pad) == (row[:, None] // t_pad)) & \
            ((col[None, :] % t_pad) < t_real)
    key_bias = jnp.tile(jnp.where(valid, 0.0, -1e30).astype(jnp.float32),
                        (nh, 1))                                   # (nh*gt, gt)

    blocks = params["blocks"]
    names = ["ln1_g", "ln1_b", "wq", "bq", "wk", "bk", "wv", "bv",
             "wo", "bo", "ln2_g", "ln2_b", "w1", "b1", "w2", "b2"]
    weight_names = {"wq", "wk", "wv", "wo", "w1", "w2"}
    stacked = []
    for n in names:
        arr = jnp.stack([blk[n] for blk in blocks], axis=0)
        if n in weight_names:                      # matmul operands -> bf16
            arr = arr.astype(bf)
        stacked.append(arr)

    cls_params = []
    for (w, b) in params["classifier"]:
        cls_params += [w.astype(bf), b]
    num_classes = params["classifier"][-1][0].shape[1]

    inputs = [patch_pad, tok_bias, params["proj_w"].astype(bf), key_bias,
              *stacked, *cls_params]

    def full_spec(arr):
        nd = arr.ndim
        return pl.BlockSpec(arr.shape, lambda s, _nd=nd: (0,) * _nd)

    in_specs = ([pl.BlockSpec((1, gt, cpp), lambda s: (s, 0, 0))]
                + [full_spec(a) for a in inputs[1:]])

    kernel = functools.partial(
        _vit_fused_kernel,
        num_heads=nh, d_model=D, num_blocks=len(blocks),
        num_cls_layers=len(params["classifier"]),
        t_pad=t_pad, t_real=t_real, group=G, use_cls=use_cls)

    out = pl.pallas_call(
        kernel,
        grid=(steps,),
        in_specs=in_specs,
        out_specs=pl.BlockSpec((1, G, num_classes), lambda s: (s, 0, 0)),
        out_shape=jax.ShapeDtypeStruct((steps, G, num_classes), jnp.float32),
        compiler_params=pltpu.CompilerParams(dimension_semantics=("parallel",)),
    )(*inputs)
    return out.reshape(Npad, num_classes)[:N]


# ------------------------- pure-JAX reference (f32) ---------------------------

def vit_reference(x, params, cfg):
    """Direct transcription of the PyTorch module (eval mode), f32 end to end."""
    N, C, H, W = x.shape
    p = cfg["patch_size"]
    D = cfg["d_model"]
    nh = cfg["num_heads"]
    dh = D // nh
    Hp, Wp = H // p, W // p
    Tp = Hp * Wp

    patches = (x.reshape(N, C, Hp, p, Wp, p)
                 .transpose(0, 2, 4, 1, 3, 5).reshape(N, Tp, C * p * p))
    tok = jnp.einsum('ntc,cd->ntd', patches, params["proj_w"]) + params["proj_b"]
    if cfg["cls_token"]:
        cls = jnp.broadcast_to(params["cls_token"][None], (N, 1, D))
        tok = jnp.concatenate([cls, tok], axis=1)
    tok = tok + params["pos_emb"][None]

    def ln(z, g, b):
        mu = z.mean(-1, keepdims=True)
        var = ((z - mu) ** 2).mean(-1, keepdims=True)
        return (z - mu) / jnp.sqrt(var + 1e-5) * g + b

    xx = tok
    for blk in params["blocks"]:
        xn = ln(xx, blk["ln1_g"], blk["ln1_b"])
        heads = []
        for h in range(nh):
            sl = slice(h * dh, (h + 1) * dh)
            q = xn @ blk["wq"][:, sl] + blk["bq"][:, sl]
            k = xn @ blk["wk"][:, sl] + blk["bk"][:, sl]
            v = xn @ blk["wv"][:, sl] + blk["bv"][:, sl]
            s = jnp.einsum('nqd,nkd->nqk', q, k) / D
            heads.append(jnp.einsum('nqk,nkd->nqd', jax.nn.softmax(s, -1), v))
        y = xx + jnp.concatenate(heads, axis=-1) @ blk["wo"] + blk["bo"]
        yn = ln(y, blk["ln2_g"], blk["ln2_b"])
        h1 = jax.nn.relu(yn @ blk["w1"] + blk["b1"])
        xx = y + h1 @ blk["w2"] + blk["b2"]

    feats = xx[:, 0, :] if cfg["cls_token"] else xx.mean(axis=1)
    out = feats
    for (w, b) in params["classifier"]:
        out = jax.nn.relu(out @ w + b)          # ReLU after every layer, incl. last
    return out


# ------------------------------- Param init -----------------------------------

def init_params(key, cfg):
    D = cfg["d_model"]
    C = cfg["num_channels"]
    p = cfg["patch_size"]
    E = cfg["expansion_ratio"]
    Tp = (cfg["input_shape"] // p) ** 2

    keys = iter(jax.random.split(key, 256))

    def nrm(shape, scale=0.02):
        return scale * jax.random.normal(next(keys), shape, jnp.float32)

    params = {
        "proj_w": nrm((C * p * p, D)),
        "proj_b": nrm((1, D)),
        "pos_emb": nrm((Tp + int(cfg["cls_token"]), D)),
    }
    if cfg["cls_token"]:
        params["cls_token"] = jax.random.normal(next(keys), (1, D), jnp.float32)

    blocks = []
    for _ in range(cfg["num_encoders"]):
        blocks.append(dict(
            ln1_g=jnp.ones((1, D), jnp.float32), ln1_b=jnp.zeros((1, D), jnp.float32),
            # all heads' Wq/Wk/Wv concatenated column-wise (head-major): head h owns
            # columns [h*dh : (h+1)*dh]
            wq=nrm((D, D)), bq=nrm((1, D)),
            wk=nrm((D, D)), bk=nrm((1, D)),
            wv=nrm((D, D)), bv=nrm((1, D)),
            wo=nrm((D, D)), bo=nrm((1, D)),        # intrahead_mlp
            ln2_g=jnp.ones((1, D), jnp.float32), ln2_b=jnp.zeros((1, D), jnp.float32),
            w1=nrm((D, E * D)), b1=nrm((1, E * D)),
            w2=nrm((E * D, D)), b2=nrm((1, D)),
        ))
    params["blocks"] = blocks

    dims = [D] + cfg["classifier_mlp"] + [cfg["num_classes"]]
    params["classifier"] = [(nrm((i, o)), nrm((1, o)))
                            for i, o in zip(dims[:-1], dims[1:])]
    return params


# ---------------------------------- main ---------------------------------------

if __name__ == "__main__":
    cfg = dict(
        input_shape=16,
        num_channels=4,
        patch_size=4,
        num_encoders=2,
        cls_token=True,
        num_heads=4,
        d_model=32,
        expansion_ratio=2,
        classifier_mlp=[16],
        num_classes=10,
    )

    key = jax.random.PRNGKey(0)
    params = init_params(key, cfg)

    x = jax.random.normal(
        jax.random.PRNGKey(0),
        (2, cfg["num_channels"], cfg["input_shape"], cfg["input_shape"]),
        jnp.float32)

    fwd = jax.jit(lambda xi, pr: vit_forward(xi, pr, cfg))
    out = jax.block_until_ready(fwd(x, params))
    assert out.shape == (2, cfg["num_classes"]), out.shape
    assert bool(jnp.all(jnp.isfinite(out)))

    # Check against a pure-JAX f32 transcription of the PyTorch module
    # (tolerance covers the intentional bf16 matmul operands + approx reciprocal).
    ref = jax.block_until_ready(vit_reference(x, params, cfg))
    assert jnp.allclose(out, ref, atol=5e-3, rtol=5e-2), \
        float(jnp.max(jnp.abs(out - ref)))

    print("KERNEL_OK")
</pallas_src>

<mosaic_0001>
module attributes {stable_mosaic.version = 11 : i64} {
  func.func @_vit_fused_kernel(%arg0: i32, %arg1: memref<1x48x64xbf16, #tpu.memory_space<vmem>>, %arg2: memref<48x32xf32, #tpu.memory_space<vmem>>, %arg3: memref<64x32xbf16, #tpu.memory_space<vmem>>, %arg4: memref<192x48xf32, #tpu.memory_space<vmem>>, %arg5: memref<2x1x32xf32, #tpu.memory_space<vmem>>, %arg6: memref<2x1x32xf32, #tpu.memory_space<vmem>>, %arg7: memref<2x32x32xbf16, #tpu.memory_space<vmem>>, %arg8: memref<2x1x32xf32, #tpu.memory_space<vmem>>, %arg9: memref<2x32x32xbf16, #tpu.memory_space<vmem>>, %arg10: memref<2x1x32xf32, #tpu.memory_space<vmem>>, %arg11: memref<2x32x32xbf16, #tpu.memory_space<vmem>>, %arg12: memref<2x1x32xf32, #tpu.memory_space<vmem>>, %arg13: memref<2x32x32xbf16, #tpu.memory_space<vmem>>, %arg14: memref<2x1x32xf32, #tpu.memory_space<vmem>>, %arg15: memref<2x1x32xf32, #tpu.memory_space<vmem>>, %arg16: memref<2x1x32xf32, #tpu.memory_space<vmem>>, %arg17: memref<2x32x64xbf16, #tpu.memory_space<vmem>>, %arg18: memref<2x1x64xf32, #tpu.memory_space<vmem>>, %arg19: memref<2x64x32xbf16, #tpu.memory_space<vmem>>, %arg20: memref<2x1x32xf32, #tpu.memory_space<vmem>>, %arg21: memref<32x16xbf16, #tpu.memory_space<vmem>>, %arg22: memref<1x16xf32, #tpu.memory_space<vmem>>, %arg23: memref<16x10xbf16, #tpu.memory_space<vmem>>, %arg24: memref<1x10xf32, #tpu.memory_space<vmem>>, %arg25: memref<1x2x10xf32, #tpu.memory_space<vmem>>) attributes {dimension_semantics = [#tpu.dimension_semantics<parallel>], iteration_bounds = array<i64: 1>, scalar_prefetch = 0 : i64, scratch_operands = 0 : i64, tpu.core_type = #tpu.core_type<tc>, window_params = [{transform_indices = @transform_0, window_bounds = array<i64: 1, 48, 64>}, {pipeline_mode = #tpu.pipeline_mode<synchronous>, transform_indices = @transform_1, window_bounds = array<i64: 48, 32>}, {pipeline_mode = #tpu.pipeline_mode<synchronous>, transform_indices = @transform_2, window_bounds = array<i64: 64, 32>}, {pipeline_mode = #tpu.pipeline_mode<synchronous>, transform_indices = @transform_3, window_bounds = array<i64: 192, 48>}, {pipeline_mode = #tpu.pipeline_mode<synchronous>, transform_indices = @transform_4, window_bounds = array<i64: 2, 1, 32>}, {pipeline_mode = #tpu.pipeline_mode<synchronous>, transform_indices = @transform_5, window_bounds = array<i64: 2, 1, 32>}, {pipeline_mode = #tpu.pipeline_mode<synchronous>, transform_indices = @transform_6, window_bounds = array<i64: 2, 32, 32>}, {pipeline_mode = #tpu.pipeline_mode<synchronous>, transform_indices = @transform_7, window_bounds = array<i64: 2, 1, 32>}, {pipeline_mode = #tpu.pipeline_mode<synchronous>, transform_indices = @transform_8, window_bounds = array<i64: 2, 32, 32>}, {pipeline_mode = #tpu.pipeline_mode<synchronous>, transform_indices = @transform_9, window_bounds = array<i64: 2, 1, 32>}, {pipeline_mode = #tpu.pipeline_mode<synchronous>, transform_indices = @transform_10, window_bounds = array<i64: 2, 32, 32>}, {pipeline_mode = #tpu.pipeline_mode<synchronous>, transform_indices = @transform_11, window_bounds = array<i64: 2, 1, 32>}, {pipeline_mode = #tpu.pipeline_mode<synchronous>, transform_indices = @transform_12, window_bounds = array<i64: 2, 32, 32>}, {pipeline_mode = #tpu.pipeline_mode<synchronous>, transform_indices = @transform_13, window_bounds = array<i64: 2, 1, 32>}, {pipeline_mode = #tpu.pipeline_mode<synchronous>, transform_indices = @transform_14, window_bounds = array<i64: 2, 1, 32>}, {pipeline_mode = #tpu.pipeline_mode<synchronous>, transform_indices = @transform_15, window_bounds = array<i64: 2, 1, 32>}, {pipeline_mode = #tpu.pipeline_mode<synchronous>, transform_indices = @transform_16, window_bounds = array<i64: 2, 32, 64>}, {pipeline_mode = #tpu.pipeline_mode<synchronous>, transform_indices = @transform_17, window_bounds = array<i64: 2, 1, 64>}, {pipeline_mode = #tpu.pipeline_mode<synchronous>, transform_indices = @transform_18, window_bounds = array<i64: 2, 64, 32>}, {pipeline_mode = #tpu.pipeline_mode<synchronous>, transform_indices = @transform_19, window_bounds = array<i64: 2, 1, 32>}, {pipeline_mode = #tpu.pipeline_mode<synchronous>, transform_indices = @transform_20, window_bounds = array<i64: 32, 16>}, {pipeline_mode = #tpu.pipeline_mode<synchronous>, transform_indices = @transform_21, window_bounds = array<i64: 1, 16>}, {pipeline_mode = #tpu.pipeline_mode<synchronous>, transform_indices = @transform_22, window_bounds = array<i64: 16, 10>}, {pipeline_mode = #tpu.pipeline_mode<synchronous>, transform_indices = @transform_23, window_bounds = array<i64: 1, 10>}, {transform_indices = @transform_24, window_bounds = array<i64: 1, 2, 10>}]} {
    %c0 = arith.constant 0 : index
    %c0_0 = arith.constant 0 : index
    %0 = vector.load %arg4[%c0, %c0_0] : memref<192x48xf32, #tpu.memory_space<vmem>>, vector<192x48xf32>
    %1 = tpu.iota {dimensions = array<i32: 1>} : vector<1x32xi32>
    %c0_i32 = arith.constant 0 : i32
    %2 = vector.broadcast %c0_i32 : i32 to vector<1x32xi32>
    %3 = arith.cmpi sge, %1, %2 : vector<1x32xi32>
    %c8_i32 = arith.constant 8 : i32
    %4 = vector.broadcast %c8_i32 : i32 to vector<1x32xi32>
    %5 = arith.cmpi slt, %1, %4 : vector<1x32xi32>
    %6 = arith.andi %3, %5 : vector<1x32xi1>
    %7 = arith.extui %6 : vector<1x32xi1> to vector<1x32xi32>
    %8 = arith.sitofp %7 : vector<1x32xi32> to vector<1x32xf32>
    %c8_i32_1 = arith.constant 8 : i32
    %9 = vector.broadcast %c8_i32_1 : i32 to vector<1x32xi32>
    %10 = arith.cmpi sge, %1, %9 : vector<1x32xi32>
    %c16_i32 = arith.constant 16 : i32
    %11 = vector.broadcast %c16_i32 : i32 to vector<1x32xi32>
    %12 = arith.cmpi slt, %1, %11 : vector<1x32xi32>
    %13 = arith.andi %10, %12 : vector<1x32xi1>
    %14 = arith.extui %13 : vector<1x32xi1> to vector<1x32xi32>
    %15 = arith.sitofp %14 : vector<1x32xi32> to vector<1x32xf32>
    %c16_i32_2 = arith.constant 16 : i32
    %16 = vector.broadcast %c16_i32_2 : i32 to vector<1x32xi32>
    %17 = arith.cmpi sge, %1, %16 : vector<1x32xi32>
    %c24_i32 = arith.constant 24 : i32
    %18 = vector.broadcast %c24_i32 : i32 to vector<1x32xi32>
    %19 = arith.cmpi slt, %1, %18 : vector<1x32xi32>
    %20 = arith.andi %17, %19 : vector<1x32xi1>
    %21 = arith.extui %20 : vector<1x32xi1> to vector<1x32xi32>
    %22 = arith.sitofp %21 : vector<1x32xi32> to vector<1x32xf32>
    %c24_i32_3 = arith.constant 24 : i32
    %23 = vector.broadcast %c24_i32_3 : i32 to vector<1x32xi32>
    %24 = arith.cmpi sge, %1, %23 : vector<1x32xi32>
    %c32_i32 = arith.constant 32 : i32
    %25 = vector.broadcast %c32_i32 : i32 to vector<1x32xi32>
    %26 = arith.cmpi slt, %1, %25 : vector<1x32xi32>
    %27 = arith.andi %24, %26 : vector<1x32xi1>
    %28 = arith.extui %27 : vector<1x32xi1> to vector<1x32xi32>
    %29 = arith.sitofp %28 : vector<1x32xi32> to vector<1x32xf32>
    %c0_4 = arith.constant 0 : index
    %c0_5 = arith.constant 0 : index
    %c0_6 = arith.constant 0 : index
    %30 = vector.load %arg1[%c0_4, %c0_5, %c0_6] : memref<1x48x64xbf16, #tpu.memory_space<vmem>>, vector<1x48x64xbf16>
    %31 = vector.shape_cast %30 : vector<1x48x64xbf16> to vector<48x64xbf16>
    %c0_7 = arith.constant 0 : index
    %c0_8 = arith.constant 0 : index
    %32 = vector.load %arg3[%c0_7, %c0_8] : memref<64x32xbf16, #tpu.memory_space<vmem>>, vector<64x32xbf16>
    %cst = arith.constant dense<0.000000e+00> : vector<48x32xf32>
    %33 = tpu.matmul %31, %32, %cst {dimension_numbers = #tpu.dot_dimension_numbers<[1], [0], [0], [1], [0, 0, 1, 1], [], []>} : vector<48x64xbf16>, vector<64x32xbf16>, vector<48x32xf32> -> vector<48x32xf32>
    %c0_9 = arith.constant 0 : index
    %c0_10 = arith.constant 0 : index
    %34 = vector.load %arg2[%c0_9, %c0_10] : memref<48x32xf32, #tpu.memory_space<vmem>>, vector<48x32xf32>
    %35 = arith.addf %33, %34 : vector<48x32xf32>
    %c0_11 = arith.constant 0 : index
    %c0_12 = arith.constant 0 : index
    %c0_13 = arith.constant 0 : index
    %36 = vector.load %arg5[%c0_11, %c0_12, %c0_13] : memref<2x1x32xf32, #tpu.memory_space<vmem>>, vector<1x1x32xf32>
    %37 = vector.shape_cast %36 : vector<1x1x32xf32> to vector<1x32xf32>
    %c0_14 = arith.constant 0 : index
    %c0_15 = arith.constant 0 : index
    %c0_16 = arith.constant 0 : index
    %38 = vector.load %arg6[%c0_14, %c0_15, %c0_16] : memref<2x1x32xf32, #tpu.memory_space<vmem>>, vector<1x1x32xf32>
    %39 = vector.shape_cast %38 : vector<1x1x32xf32> to vector<1x32xf32>
    %cst_17 = arith.constant dense<0.000000e+00> : vector<48xf32>
    %40 = vector.multi_reduction <add>, %35, %cst_17 [1] : vector<48x32xf32> to vector<48xf32>
    %41 = vector.shape_cast %40 : vector<48xf32> to vector<48x1xf32>
    %cst_18 = arith.constant 3.200000e+01 : f32
    %42 = vector.broadcast %cst_18 : f32 to vector<48x1xf32>
    %43 = arith.divf %41, %42 : vector<48x1xf32>
    %44 = vector.broadcast %43 : vector<48x1xf32> to vector<48x32xf32>
    %45 = arith.subf %35, %44 : vector<48x32xf32>
    %46 = arith.mulf %45, %45 : vector<48x32xf32>
    %cst_19 = arith.constant dense<0.000000e+00> : vector<48xf32>
    %47 = vector.multi_reduction <add>, %46, %cst_19 [1] : vector<48x32xf32> to vector<48xf32>
    %48 = vector.shape_cast %47 : vector<48xf32> to vector<48x1xf32>
    %cst_20 = arith.constant 3.200000e+01 : f32
    %49 = vector.broadcast %cst_20 : f32 to vector<48x1xf32>
    %50 = arith.divf %48, %49 : vector<48x1xf32>
    %51 = vector.broadcast %43 : vector<48x1xf32> to vector<48x32xf32>
    %52 = arith.subf %35, %51 : vector<48x32xf32>
    %cst_21 = arith.constant 9.99999974E-6 : f32
    %53 = vector.broadcast %cst_21 : f32 to vector<48x1xf32>
    %54 = arith.addf %50, %53 : vector<48x1xf32>
    %55 = math.rsqrt %54 : vector<48x1xf32>
    %56 = vector.broadcast %55 : vector<48x1xf32> to vector<48x32xf32>
    %57 = arith.mulf %52, %56 : vector<48x32xf32>
    %58 = vector.broadcast %37 : vector<1x32xf32> to vector<48x32xf32>
    %59 = arith.mulf %57, %58 : vector<48x32xf32>
    %60 = vector.broadcast %39 : vector<1x32xf32> to vector<48x32xf32>
    %61 = arith.addf %59, %60 : vector<48x32xf32>
    %c0_22 = arith.constant 0 : index
    %c0_23 = arith.constant 0 : index
    %c0_24 = arith.constant 0 : index
    %62 = vector.load %arg7[%c0_22, %c0_23, %c0_24] : memref<2x32x32xbf16, #tpu.memory_space<vmem>>, vector<1x32x32xbf16>
    %63 = vector.shape_cast %62 : vector<1x32x32xbf16> to vector<32x32xbf16>
    %64 = arith.truncf %61 : vector<48x32xf32> to vector<48x32xbf16>
    %cst_25 = arith.constant dense<0.000000e+00> : vector<48x32xf32>
    %65 = tpu.matmul %64, %63, %cst_25 {dimension_numbers = #tpu.dot_dimension_numbers<[1], [0], [0], [1], [0, 0, 1, 1], [], []>} : vector<48x32xbf16>, vector<32x32xbf16>, vector<48x32xf32> -> vector<48x32xf32>
    %c0_26 = arith.constant 0 : index
    %c0_27 = arith.constant 0 : index
    %c0_28 = arith.constant 0 : index
    %66 = vector.load %arg8[%c0_26, %c0_27, %c0_28] : memref<2x1x32xf32, #tpu.memory_space<vmem>>, vector<1x1x32xf32>
    %67 = vector.shape_cast %66 : vector<1x1x32xf32> to vector<1x32xf32>
    %68 = vector.broadcast %67 : vector<1x32xf32> to vector<48x32xf32>
    %69 = arith.addf %65, %68 : vector<48x32xf32>
    %cst_29 = arith.constant 3.125000e-02 : f32
    %70 = vector.broadcast %cst_29 : f32 to vector<48x32xf32>
    %71 = arith.mulf %69, %70 : vector<48x32xf32>
    %c0_30 = arith.constant 0 : index
    %c0_31 = arith.constant 0 : index
    %c0_32 = arith.constant 0 : index
    %72 = vector.load %arg9[%c0_30, %c0_31, %c0_32] : memref<2x32x32xbf16, #tpu.memory_space<vmem>>, vector<1x32x32xbf16>
    %73 = vector.shape_cast %72 : vector<1x32x32xbf16> to vector<32x32xbf16>
    %74 = arith.truncf %61 : vector<48x32xf32> to vector<48x32xbf16>
    %cst_33 = arith.constant dense<0.000000e+00> : vector<48x32xf32>
    %75 = tpu.matmul %74, %73, %cst_33 {dimension_numbers = #tpu.dot_dimension_numbers<[1], [0], [0], [1], [0, 0, 1, 1], [], []>} : vector<48x32xbf16>, vector<32x32xbf16>, vector<48x32xf32> -> vector<48x32xf32>
    %c0_34 = arith.constant 0 : index
    %c0_35 = arith.constant 0 : index
    %c0_36 = arith.constant 0 : index
    %76 = vector.load %arg10[%c0_34, %c0_35, %c0_36] : memref<2x1x32xf32, #tpu.memory_space<vmem>>, vector<1x1x32xf32>
    %77 = vector.shape_cast %76 : vector<1x1x32xf32> to vector<1x32xf32>
    %78 = vector.broadcast %77 : vector<1x32xf32> to vector<48x32xf32>
    %79 = arith.addf %75, %78 : vector<48x32xf32>
    %c0_37 = arith.constant 0 : index
    %c0_38 = arith.constant 0 : index
    %c0_39 = arith.constant 0 : index
    %80 = vector.load %arg11[%c0_37, %c0_38, %c0_39] : memref<2x32x32xbf16, #tpu.memory_space<vmem>>, vector<1x32x32xbf16>
    %81 = vector.shape_cast %80 : vector<1x32x32xbf16> to vector<32x32xbf16>
    %82 = arith.truncf %61 : vector<48x32xf32> to vector<48x32xbf16>
    %cst_40 = arith.constant dense<0.000000e+00> : vector<48x32xf32>
    %83 = tpu.matmul %82, %81, %cst_40 {dimension_numbers = #tpu.dot_dimension_numbers<[1], [0], [0], [1], [0, 0, 1, 1], [], []>} : vector<48x32xbf16>, vector<32x32xbf16>, vector<48x32xf32> -> vector<48x32xf32>
    %c0_41 = arith.constant 0 : index
    %c0_42 = arith.constant 0 : index
    %c0_43 = arith.constant 0 : index
    %84 = vector.load %arg12[%c0_41, %c0_42, %c0_43] : memref<2x1x32xf32, #tpu.memory_space<vmem>>, vector<1x1x32xf32>
    %85 = vector.shape_cast %84 : vector<1x1x32xf32> to vector<1x32xf32>
    %86 = vector.broadcast %85 : vector<1x32xf32> to vector<48x32xf32>
    %87 = arith.addf %83, %86 : vector<48x32xf32>
    %88 = vector.broadcast %8 : vector<1x32xf32> to vector<48x32xf32>
    %89 = arith.mulf %71, %88 : vector<48x32xf32>
    %90 = vector.broadcast %15 : vector<1x32xf32> to vector<48x32xf32>
    %91 = arith.mulf %71, %90 : vector<48x32xf32>
    %92 = vector.broadcast %22 : vector<1x32xf32> to vector<48x32xf32>
    %93 = arith.mulf %71, %92 : vector<48x32xf32>
    %94 = vector.broadcast %29 : vector<1x32xf32> to vector<48x32xf32>
    %95 = arith.mulf %71, %94 : vector<48x32xf32>
    %96 = tpu.concatenate %89, %91, %93, %95 in 0 : vector<48x32xf32>, vector<48x32xf32>, vector<48x32xf32>, vector<48x32xf32> -> vector<192x32xf32>
    %97 = arith.truncf %96 : vector<192x32xf32> to vector<192x32xbf16>
    %98 = arith.truncf %79 : vector<48x32xf32> to vector<48x32xbf16>
    %cst_44 = arith.constant dense<0.000000e+00> : vector<192x48xf32>
    %99 = tpu.matmul %97, %98, %cst_44 {dimension_numbers = #tpu.dot_dimension_numbers<[1], [1], [0], [0], [0, 0, 1, 0], [], []>} : vector<192x32xbf16>, vector<48x32xbf16>, vector<192x48xf32> -> vector<192x48xf32>
    %100 = arith.addf %99, %0 : vector<192x48xf32>
    %cst_45 = arith.constant dense<0xFF800000> : vector<192xf32>
    %101 = vector.multi_reduction <maximumf>, %100, %cst_45 [1] : vector<192x48xf32> to vector<192xf32>
    %102 = vector.shape_cast %101 : vector<192xf32> to vector<192x1xf32>
    %103 = vector.broadcast %102 : vector<192x1xf32> to vector<192x48xf32>
    %104 = arith.subf %100, %103 : vector<192x48xf32>
    %105 = math.exp %104 : vector<192x48xf32>
    %cst_46 = arith.constant dense<0.000000e+00> : vector<192xf32>
    %106 = vector.multi_reduction <add>, %105, %cst_46 [1] : vector<192x48xf32> to vector<192xf32>
    %107 = vector.shape_cast %106 : vector<192xf32> to vector<192x1xf32>
    %108 = tpu.reciprocal %107 {approx = true} : vector<192x1xf32> -> vector<192x1xf32>
    %109 = vector.broadcast %108 : vector<192x1xf32> to vector<192x48xf32>
    %110 = arith.mulf %105, %109 : vector<192x48xf32>
    %111 = arith.truncf %110 : vector<192x48xf32> to vector<192x48xbf16>
    %112 = arith.truncf %87 : vector<48x32xf32> to vector<48x32xbf16>
    %cst_47 = arith.constant dense<0.000000e+00> : vector<192x32xf32>
    %113 = tpu.matmul %111, %112, %cst_47 {dimension_numbers = #tpu.dot_dimension_numbers<[1], [0], [0], [1], [0, 0, 1, 1], [], []>} : vector<192x48xbf16>, vector<48x32xbf16>, vector<192x32xf32> -> vector<192x32xf32>
    %114 = vector.extract_strided_slice %113 {offsets = [0, 0], sizes = [48, 32], strides = [1, 1]} : vector<192x32xf32> to vector<48x32xf32>
    %115 = vector.broadcast %8 : vector<1x32xf32> to vector<48x32xf32>
    %116 = arith.mulf %114, %115 : vector<48x32xf32>
    %117 = vector.extract_strided_slice %113 {offsets = [48, 0], sizes = [48, 32], strides = [1, 1]} : vector<192x32xf32> to vector<48x32xf32>
    %118 = vector.broadcast %15 : vector<1x32xf32> to vector<48x32xf32>
    %119 = arith.mulf %117, %118 : vector<48x32xf32>
    %120 = arith.addf %116, %119 : vector<48x32xf32>
    %121 = vector.extract_strided_slice %113 {offsets = [96, 0], sizes = [48, 32], strides = [1, 1]} : vector<192x32xf32> to vector<48x32xf32>
    %122 = vector.broadcast %22 : vector<1x32xf32> to vector<48x32xf32>
    %123 = arith.mulf %121, %122 : vector<48x32xf32>
    %124 = arith.addf %120, %123 : vector<48x32xf32>
    %125 = vector.extract_strided_slice %113 {offsets = [144, 0], sizes = [48, 32], strides = [1, 1]} : vector<192x32xf32> to vector<48x32xf32>
    %126 = vector.broadcast %29 : vector<1x32xf32> to vector<48x32xf32>
    %127 = arith.mulf %125, %126 : vector<48x32xf32>
    %128 = arith.addf %124, %127 : vector<48x32xf32>
    %c0_48 = arith.constant 0 : index
    %c0_49 = arith.constant 0 : index
    %c0_50 = arith.constant 0 : index
    %129 = vector.load %arg13[%c0_48, %c0_49, %c0_50] : memref<2x32x32xbf16, #tpu.memory_space<vmem>>, vector<1x32x32xbf16>
    %130 = vector.shape_cast %129 : vector<1x32x32xbf16> to vector<32x32xbf16>
    %131 = arith.truncf %128 : vector<48x32xf32> to vector<48x32xbf16>
    %cst_51 = arith.constant dense<0.000000e+00> : vector<48x32xf32>
    %132 = tpu.matmul %131, %130, %cst_51 {dimension_numbers = #tpu.dot_dimension_numbers<[1], [0], [0], [1], [0, 0, 1, 1], [], []>} : vector<48x32xbf16>, vector<32x32xbf16>, vector<48x32xf32> -> vector<48x32xf32>
    %133 = arith.addf %35, %132 : vector<48x32xf32>
    %c0_52 = arith.constant 0 : index
    %c0_53 = arith.constant 0 : index
    %c0_54 = arith.constant 0 : index
    %134 = vector.load %arg14[%c0_52, %c0_53, %c0_54] : memref<2x1x32xf32, #tpu.memory_space<vmem>>, vector<1x1x32xf32>
    %135 = vector.shape_cast %134 : vector<1x1x32xf32> to vector<1x32xf32>
    %136 = vector.broadcast %135 : vector<1x32xf32> to vector<48x32xf32>
    %137 = arith.addf %133, %136 : vector<48x32xf32>
    %c0_55 = arith.constant 0 : index
    %c0_56 = arith.constant 0 : index
    %c0_57 = arith.constant 0 : index
    %138 = vector.load %arg15[%c0_55, %c0_56, %c0_57] : memref<2x1x32xf32, #tpu.memory_space<vmem>>, vector<1x1x32xf32>
    %139 = vector.shape_cast %138 : vector<1x1x32xf32> to vector<1x32xf32>
    %c0_58 = arith.constant 0 : index
    %c0_59 = arith.constant 0 : index
    %c0_60 = arith.constant 0 : index
    %140 = vector.load %arg16[%c0_58, %c0_59, %c0_60] : memref<2x1x32xf32, #tpu.memory_space<vmem>>, vector<1x1x32xf32>
    %141 = vector.shape_cast %140 : vector<1x1x32xf32> to vector<1x32xf32>
    %cst_61 = arith.constant dense<0.000000e+00> : vector<48xf32>
    %142 = vector.multi_reduction <add>, %137, %cst_61 [1] : vector<48x32xf32> to vector<48xf32>
    %143 = vector.shape_cast %142 : vector<48xf32> to vector<48x1xf32>
    %cst_62 = arith.constant 3.200000e+01 : f32
    %144 = vector.broadcast %cst_62 : f32 to vector<48x1xf32>
    %145 = arith.divf %143, %144 : vector<48x1xf32>
    %146 = vector.broadcast %145 : vector<48x1xf32> to vector<48x32xf32>
    %147 = arith.subf %137, %146 : vector<48x32xf32>
    %148 = arith.mulf %147, %147 : vector<48x32xf32>
    %cst_63 = arith.constant dense<0.000000e+00> : vector<48xf32>
    %149 = vector.multi_reduction <add>, %148, %cst_63 [1] : vector<48x32xf32> to vector<48xf32>
    %150 = vector.shape_cast %149 : vector<48xf32> to vector<48x1xf32>
    %cst_64 = arith.constant 3.200000e+01 : f32
    %151 = vector.broadcast %cst_64 : f32 to vector<48x1xf32>
    %152 = arith.divf %150, %151 : vector<48x1xf32>
    %153 = vector.broadcast %145 : vector<48x1xf32> to vector<48x32xf32>
    %154 = arith.subf %137, %153 : vector<48x32xf32>
    %cst_65 = arith.constant 9.99999974E-6 : f32
    %155 = vector.broadcast %cst_65 : f32 to vector<48x1xf32>
    %156 = arith.addf %152, %155 : vector<48x1xf32>
    %157 = math.rsqrt %156 : vector<48x1xf32>
    %158 = vector.broadcast %157 : vector<48x1xf32> to vector<48x32xf32>
    %159 = arith.mulf %154, %158 : vector<48x32xf32>
    %160 = vector.broadcast %139 : vector<1x32xf32> to vector<48x32xf32>
    %161 = arith.mulf %159, %160 : vector<48x32xf32>
    %162 = vector.broadcast %141 : vector<1x32xf32> to vector<48x32xf32>
    %163 = arith.addf %161, %162 : vector<48x32xf32>
    %c0_66 = arith.constant 0 : index
    %c0_67 = arith.constant 0 : index
    %c0_68 = arith.constant 0 : index
    %164 = vector.load %arg17[%c0_66, %c0_67, %c0_68] : memref<2x32x64xbf16, #tpu.memory_space<vmem>>, vector<1x32x64xbf16>
    %165 = vector.shape_cast %164 : vector<1x32x64xbf16> to vector<32x64xbf16>
    %166 = arith.truncf %163 : vector<48x32xf32> to vector<48x32xbf16>
    %cst_69 = arith.constant dense<0.000000e+00> : vector<48x64xf32>
    %167 = tpu.matmul %166, %165, %cst_69 {dimension_numbers = #tpu.dot_dimension_numbers<[1], [0], [0], [1], [0, 0, 1, 1], [], []>} : vector<48x32xbf16>, vector<32x64xbf16>, vector<48x64xf32> -> vector<48x64xf32>
    %c0_70 = arith.constant 0 : index
    %c0_71 = arith.constant 0 : index
    %c0_72 = arith.constant 0 : index
    %168 = vector.load %arg18[%c0_70, %c0_71, %c0_72] : memref<2x1x64xf32, #tpu.memory_space<vmem>>, vector<1x1x64xf32>
    %169 = vector.shape_cast %168 : vector<1x1x64xf32> to vector<1x64xf32>
    %170 = vector.broadcast %169 : vector<1x64xf32> to vector<48x64xf32>
    %171 = arith.addf %167, %170 : vector<48x64xf32>
    %cst_73 = arith.constant 0.000000e+00 : f32
    %172 = vector.broadcast %cst_73 : f32 to vector<48x64xf32>
    %173 = arith.maximumf %171, %172 : vector<48x64xf32>
    %c0_74 = arith.constant 0 : index
    %c0_75 = arith.constant 0 : index
    %c0_76 = arith.constant 0 : index
    %174 = vector.load %arg19[%c0_74, %c0_75, %c0_76] : memref<2x64x32xbf16, #tpu.memory_space<vmem>>, vector<1x64x32xbf16>
    %175 = vector.shape_cast %174 : vector<1x64x32xbf16> to vector<64x32xbf16>
    %176 = arith.truncf %173 : vector<48x64xf32> to vector<48x64xbf16>
    %cst_77 = arith.constant dense<0.000000e+00> : vector<48x32xf32>
    %177 = tpu.matmul %176, %175, %cst_77 {dimension_numbers = #tpu.dot_dimension_numbers<[1], [0], [0], [1], [0, 0, 1, 1], [], []>} : vector<48x64xbf16>, vector<64x32xbf16>, vector<48x32xf32> -> vector<48x32xf32>
    %178 = arith.addf %137, %177 : vector<48x32xf32>
    %c0_78 = arith.constant 0 : index
    %c0_79 = arith.constant 0 : index
    %c0_80 = arith.constant 0 : index
    %179 = vector.load %arg20[%c0_78, %c0_79, %c0_80] : memref<2x1x32xf32, #tpu.memory_space<vmem>>, vector<1x1x32xf32>
    %180 = vector.shape_cast %179 : vector<1x1x32xf32> to vector<1x32xf32>
    %181 = vector.broadcast %180 : vector<1x32xf32> to vector<48x32xf32>
    %182 = arith.addf %178, %181 : vector<48x32xf32>
    %c1 = arith.constant 1 : index
    %c0_81 = arith.constant 0 : index
    %c0_82 = arith.constant 0 : index
    %183 = vector.load %arg5[%c1, %c0_81, %c0_82] : memref<2x1x32xf32, #tpu.memory_space<vmem>>, vector<1x1x32xf32>
    %184 = vector.shape_cast %183 : vector<1x1x32xf32> to vector<1x32xf32>
    %c1_83 = arith.constant 1 : index
    %c0_84 = arith.constant 0 : index
    %c0_85 = arith.constant 0 : index
    %185 = vector.load %arg6[%c1_83, %c0_84, %c0_85] : memref<2x1x32xf32, #tpu.memory_space<vmem>>, vector<1x1x32xf32>
    %186 = vector.shape_cast %185 : vector<1x1x32xf32> to vector<1x32xf32>
    %cst_86 = arith.constant dense<0.000000e+00> : vector<48xf32>
    %187 = vector.multi_reduction <add>, %182, %cst_86 [1] : vector<48x32xf32> to vector<48xf32>
    %188 = vector.shape_cast %187 : vector<48xf32> to vector<48x1xf32>
    %cst_87 = arith.constant 3.200000e+01 : f32
    %189 = vector.broadcast %cst_87 : f32 to vector<48x1xf32>
    %190 = arith.divf %188, %189 : vector<48x1xf32>
    %191 = vector.broadcast %190 : vector<48x1xf32> to vector<48x32xf32>
    %192 = arith.subf %182, %191 : vector<48x32xf32>
    %193 = arith.mulf %192, %192 : vector<48x32xf32>
    %cst_88 = arith.constant dense<0.000000e+00> : vector<48xf32>
    %194 = vector.multi_reduction <add>, %193, %cst_88 [1] : vector<48x32xf32> to vector<48xf32>
    %195 = vector.shape_cast %194 : vector<48xf32> to vector<48x1xf32>
    %cst_89 = arith.constant 3.200000e+01 : f32
    %196 = vector.broadcast %cst_89 : f32 to vector<48x1xf32>
    %197 = arith.divf %195, %196 : vector<48x1xf32>
    %198 = vector.broadcast %190 : vector<48x1xf32> to vector<48x32xf32>
    %199 = arith.subf %182, %198 : vector<48x32xf32>
    %cst_90 = arith.constant 9.99999974E-6 : f32
    %200 = vector.broadcast %cst_90 : f32 to vector<48x1xf32>
    %201 = arith.addf %197, %200 : vector<48x1xf32>
    %202 = math.rsqrt %201 : vector<48x1xf32>
    %203 = vector.broadcast %202 : vector<48x1xf32> to vector<48x32xf32>
    %204 = arith.mulf %199, %203 : vector<48x32xf32>
    %205 = vector.broadcast %184 : vector<1x32xf32> to vector<48x32xf32>
    %206 = arith.mulf %204, %205 : vector<48x32xf32>
    %207 = vector.broadcast %186 : vector<1x32xf32> to vector<48x32xf32>
    %208 = arith.addf %206, %207 : vector<48x32xf32>
    %c1_91 = arith.constant 1 : index
    %c0_92 = arith.constant 0 : index
    %c0_93 = arith.constant 0 : index
    %209 = vector.load %arg7[%c1_91, %c0_92, %c0_93] : memref<2x32x32xbf16, #tpu.memory_space<vmem>>, vector<1x32x32xbf16>
    %210 = vector.shape_cast %209 : vector<1x32x32xbf16> to vector<32x32xbf16>
    %211 = arith.truncf %208 : vector<48x32xf32> to vector<48x32xbf16>
    %cst_94 = arith.constant dense<0.000000e+00> : vector<48x32xf32>
    %212 = tpu.matmul %211, %210, %cst_94 {dimension_numbers = #tpu.dot_dimension_numbers<[1], [0], [0], [1], [0, 0, 1, 1], [], []>} : vector<48x32xbf16>, vector<32x32xbf16>, vector<48x32xf32> -> vector<48x32xf32>
    %c1_95 = arith.constant 1 : index
    %c0_96 = arith.constant 0 : index
    %c0_97 = arith.constant 0 : index
    %213 = vector.load %arg8[%c1_95, %c0_96, %c0_97] : memref<2x1x32xf32, #tpu.memory_space<vmem>>, vector<1x1x32xf32>
    %214 = vector.shape_cast %213 : vector<1x1x32xf32> to vector<1x32xf32>
    %215 = vector.broadcast %214 : vector<1x32xf32> to vector<48x32xf32>
    %216 = arith.addf %212, %215 : vector<48x32xf32>
    %cst_98 = arith.constant 3.125000e-02 : f32
    %217 = vector.broadcast %cst_98 : f32 to vector<48x32xf32>
    %218 = arith.mulf %216, %217 : vector<48x32xf32>
    %c1_99 = arith.constant 1 : index
    %c0_100 = arith.constant 0 : index
    %c0_101 = arith.constant 0 : index
    %219 = vector.load %arg9[%c1_99, %c0_100, %c0_101] : memref<2x32x32xbf16, #tpu.memory_space<vmem>>, vector<1x32x32xbf16>
    %220 = vector.shape_cast %219 : vector<1x32x32xbf16> to vector<32x32xbf16>
    %221 = arith.truncf %208 : vector<48x32xf32> to vector<48x32xbf16>
    %cst_102 = arith.constant dense<0.000000e+00> : vector<48x32xf32>
    %222 = tpu.matmul %221, %220, %cst_102 {dimension_numbers = #tpu.dot_dimension_numbers<[1], [0], [0], [1], [0, 0, 1, 1], [], []>} : vector<48x32xbf16>, vector<32x32xbf16>, vector<48x32xf32> -> vector<48x32xf32>
    %c1_103 = arith.constant 1 : index
    %c0_104 = arith.constant 0 : index
    %c0_105 = arith.constant 0 : index
    %223 = vector.load %arg10[%c1_103, %c0_104, %c0_105] : memref<2x1x32xf32, #tpu.memory_space<vmem>>, vector<1x1x32xf32>
    %224 = vector.shape_cast %223 : vector<1x1x32xf32> to vector<1x32xf32>
    %225 = vector.broadcast %224 : vector<1x32xf32> to vector<48x32xf32>
    %226 = arith.addf %222, %225 : vector<48x32xf32>
    %c1_106 = arith.constant 1 : index
    %c0_107 = arith.constant 0 : index
    %c0_108 = arith.constant 0 : index
    %227 = vector.load %arg11[%c1_106, %c0_107, %c0_108] : memref<2x32x32xbf16, #tpu.memory_space<vmem>>, vector<1x32x32xbf16>
    %228 = vector.shape_cast %227 : vector<1x32x32xbf16> to vector<32x32xbf16>
    %229 = arith.truncf %208 : vector<48x32xf32> to vector<48x32xbf16>
    %cst_109 = arith.constant dense<0.000000e+00> : vector<48x32xf32>
    %230 = tpu.matmul %229, %228, %cst_109 {dimension_numbers = #tpu.dot_dimension_numbers<[1], [0], [0], [1], [0, 0, 1, 1], [], []>} : vector<48x32xbf16>, vector<32x32xbf16>, vector<48x32xf32> -> vector<48x32xf32>
    %c1_110 = arith.constant 1 : index
    %c0_111 = arith.constant 0 : index
    %c0_112 = arith.constant 0 : index
    %231 = vector.load %arg12[%c1_110, %c0_111, %c0_112] : memref<2x1x32xf32, #tpu.memory_space<vmem>>, vector<1x1x32xf32>
    %232 = vector.shape_cast %231 : vector<1x1x32xf32> to vector<1x32xf32>
    %233 = vector.broadcast %232 : vector<1x32xf32> to vector<48x32xf32>
    %234 = arith.addf %230, %233 : vector<48x32xf32>
    %235 = vector.broadcast %8 : vector<1x32xf32> to vector<48x32xf32>
    %236 = arith.mulf %218, %235 : vector<48x32xf32>
    %237 = vector.broadcast %15 : vector<1x32xf32> to vector<48x32xf32>
    %238 = arith.mulf %218, %237 : vector<48x32xf32>
    %239 = vector.broadcast %22 : vector<1x32xf32> to vector<48x32xf32>
    %240 = arith.mulf %218, %239 : vector<48x32xf32>
    %241 = vector.broadcast %29 : vector<1x32xf32> to vector<48x32xf32>
    %242 = arith.mulf %218, %241 : vector<48x32xf32>
    %243 = tpu.concatenate %236, %238, %240, %242 in 0 : vector<48x32xf32>, vector<48x32xf32>, vector<48x32xf32>, vector<48x32xf32> -> vector<192x32xf32>
    %244 = arith.truncf %243 : vector<192x32xf32> to vector<192x32xbf16>
    %245 = arith.truncf %226 : vector<48x32xf32> to vector<48x32xbf16>
    %cst_113 = arith.constant dense<0.000000e+00> : vector<192x48xf32>
    %246 = tpu.matmul %244, %245, %cst_113 {dimension_numbers = #tpu.dot_dimension_numbers<[1], [1], [0], [0], [0, 0, 1, 0], [], []>} : vector<192x32xbf16>, vector<48x32xbf16>, vector<192x48xf32> -> vector<192x48xf32>
    %247 = arith.addf %246, %0 : vector<192x48xf32>
    %cst_114 = arith.constant dense<0xFF800000> : vector<192xf32>
    %248 = vector.multi_reduction <maximumf>, %247, %cst_114 [1] : vector<192x48xf32> to vector<192xf32>
    %249 = vector.shape_cast %248 : vector<192xf32> to vector<192x1xf32>
    %250 = vector.broadcast %249 : vector<192x1xf32> to vector<192x48xf32>
    %251 = arith.subf %247, %250 : vector<192x48xf32>
    %252 = math.exp %251 : vector<192x48xf32>
    %cst_115 = arith.constant dense<0.000000e+00> : vector<192xf32>
    %253 = vector.multi_reduction <add>, %252, %cst_115 [1] : vector<192x48xf32> to vector<192xf32>
    %254 = vector.shape_cast %253 : vector<192xf32> to vector<192x1xf32>
    %255 = tpu.reciprocal %254 {approx = true} : vector<192x1xf32> -> vector<192x1xf32>
    %256 = vector.broadcast %255 : vector<192x1xf32> to vector<192x48xf32>
    %257 = arith.mulf %252, %256 : vector<192x48xf32>
    %258 = arith.truncf %257 : vector<192x48xf32> to vector<192x48xbf16>
    %259 = arith.truncf %234 : vector<48x32xf32> to vector<48x32xbf16>
    %cst_116 = arith.constant dense<0.000000e+00> : vector<192x32xf32>
    %260 = tpu.matmul %258, %259, %cst_116 {dimension_numbers = #tpu.dot_dimension_numbers<[1], [0], [0], [1], [0, 0, 1, 1], [], []>} : vector<192x48xbf16>, vector<48x32xbf16>, vector<192x32xf32> -> vector<192x32xf32>
    %261 = vector.extract_strided_slice %260 {offsets = [0, 0], sizes = [48, 32], strides = [1, 1]} : vector<192x32xf32> to vector<48x32xf32>
    %262 = vector.broadcast %8 : vector<1x32xf32> to vector<48x32xf32>
    %263 = arith.mulf %261, %262 : vector<48x32xf32>
    %264 = vector.extract_strided_slice %260 {offsets = [48, 0], sizes = [48, 32], strides = [1, 1]} : vector<192x32xf32> to vector<48x32xf32>
    %265 = vector.broadcast %15 : vector<1x32xf32> to vector<48x32xf32>
    %266 = arith.mulf %264, %265 : vector<48x32xf32>
    %267 = arith.addf %263, %266 : vector<48x32xf32>
    %268 = vector.extract_strided_slice %260 {offsets = [96, 0], sizes = [48, 32], strides = [1, 1]} : vector<192x32xf32> to vector<48x32xf32>
    %269 = vector.broadcast %22 : vector<1x32xf32> to vector<48x32xf32>
    %270 = arith.mulf %268, %269 : vector<48x32xf32>
    %271 = arith.addf %267, %270 : vector<48x32xf32>
    %272 = vector.extract_strided_slice %260 {offsets = [144, 0], sizes = [48, 32], strides = [1, 1]} : vector<192x32xf32> to vector<48x32xf32>
    %273 = vector.broadcast %29 : vector<1x32xf32> to vector<48x32xf32>
    %274 = arith.mulf %272, %273 : vector<48x32xf32>
    %275 = arith.addf %271, %274 : vector<48x32xf32>
    %c1_117 = arith.constant 1 : index
    %c0_118 = arith.constant 0 : index
    %c0_119 = arith.constant 0 : index
    %276 = vector.load %arg13[%c1_117, %c0_118, %c0_119] : memref<2x32x32xbf16, #tpu.memory_space<vmem>>, vector<1x32x32xbf16>
    %277 = vector.shape_cast %276 : vector<1x32x32xbf16> to vector<32x32xbf16>
    %278 = arith.truncf %275 : vector<48x32xf32> to vector<48x32xbf16>
    %cst_120 = arith.constant dense<0.000000e+00> : vector<48x32xf32>
    %279 = tpu.matmul %278, %277, %cst_120 {dimension_numbers = #tpu.dot_dimension_numbers<[1], [0], [0], [1], [0, 0, 1, 1], [], []>} : vector<48x32xbf16>, vector<32x32xbf16>, vector<48x32xf32> -> vector<48x32xf32>
    %280 = arith.addf %182, %279 : vector<48x32xf32>
    %c1_121 = arith.constant 1 : index
    %c0_122 = arith.constant 0 : index
    %c0_123 = arith.constant 0 : index
    %281 = vector.load %arg14[%c1_121, %c0_122, %c0_123] : memref<2x1x32xf32, #tpu.memory_space<vmem>>, vector<1x1x32xf32>
    %282 = vector.shape_cast %281 : vector<1x1x32xf32> to vector<1x32xf32>
    %283 = vector.broadcast %282 : vector<1x32xf32> to vector<48x32xf32>
    %284 = arith.addf %280, %283 : vector<48x32xf32>
    %c1_124 = arith.constant 1 : index
    %c0_125 = arith.constant 0 : index
    %c0_126 = arith.constant 0 : index
    %285 = vector.load %arg15[%c1_124, %c0_125, %c0_126] : memref<2x1x32xf32, #tpu.memory_space<vmem>>, vector<1x1x32xf32>
    %286 = vector.shape_cast %285 : vector<1x1x32xf32> to vector<1x32xf32>
    %c1_127 = arith.constant 1 : index
    %c0_128 = arith.constant 0 : index
    %c0_129 = arith.constant 0 : index
    %287 = vector.load %arg16[%c1_127, %c0_128, %c0_129] : memref<2x1x32xf32, #tpu.memory_space<vmem>>, vector<1x1x32xf32>
    %288 = vector.shape_cast %287 : vector<1x1x32xf32> to vector<1x32xf32>
    %cst_130 = arith.constant dense<0.000000e+00> : vector<48xf32>
    %289 = vector.multi_reduction <add>, %284, %cst_130 [1] : vector<48x32xf32> to vector<48xf32>
    %290 = vector.shape_cast %289 : vector<48xf32> to vector<48x1xf32>
    %cst_131 = arith.constant 3.200000e+01 : f32
    %291 = vector.broadcast %cst_131 : f32 to vector<48x1xf32>
    %292 = arith.divf %290, %291 : vector<48x1xf32>
    %293 = vector.broadcast %292 : vector<48x1xf32> to vector<48x32xf32>
    %294 = arith.subf %284, %293 : vector<48x32xf32>
    %295 = arith.mulf %294, %294 : vector<48x32xf32>
    %cst_132 = arith.constant dense<0.000000e+00> : vector<48xf32>
    %296 = vector.multi_reduction <add>, %295, %cst_132 [1] : vector<48x32xf32> to vector<48xf32>
    %297 = vector.shape_cast %296 : vector<48xf32> to vector<48x1xf32>
    %cst_133 = arith.constant 3.200000e+01 : f32
    %298 = vector.broadcast %cst_133 : f32 to vector<48x1xf32>
    %299 = arith.divf %297, %298 : vector<48x1xf32>
    %300 = vector.broadcast %292 : vector<48x1xf32> to vector<48x32xf32>
    %301 = arith.subf %284, %300 : vector<48x32xf32>
    %cst_134 = arith.constant 9.99999974E-6 : f32
    %302 = vector.broadcast %cst_134 : f32 to vector<48x1xf32>
    %303 = arith.addf %299, %302 : vector<48x1xf32>
    %304 = math.rsqrt %303 : vector<48x1xf32>
    %305 = vector.broadcast %304 : vector<48x1xf32> to vector<48x32xf32>
    %306 = arith.mulf %301, %305 : vector<48x32xf32>
    %307 = vector.broadcast %286 : vector<1x32xf32> to vector<48x32xf32>
    %308 = arith.mulf %306, %307 : vector<48x32xf32>
    %309 = vector.broadcast %288 : vector<1x32xf32> to vector<48x32xf32>
    %310 = arith.addf %308, %309 : vector<48x32xf32>
    %c1_135 = arith.constant 1 : index
    %c0_136 = arith.constant 0 : index
    %c0_137 = arith.constant 0 : index
    %311 = vector.load %arg17[%c1_135, %c0_136, %c0_137] : memref<2x32x64xbf16, #tpu.memory_space<vmem>>, vector<1x32x64xbf16>
    %312 = vector.shape_cast %311 : vector<1x32x64xbf16> to vector<32x64xbf16>
    %313 = arith.truncf %310 : vector<48x32xf32> to vector<48x32xbf16>
    %cst_138 = arith.constant dense<0.000000e+00> : vector<48x64xf32>
    %314 = tpu.matmul %313, %312, %cst_138 {dimension_numbers = #tpu.dot_dimension_numbers<[1], [0], [0], [1], [0, 0, 1, 1], [], []>} : vector<48x32xbf16>, vector<32x64xbf16>, vector<48x64xf32> -> vector<48x64xf32>
    %c1_139 = arith.constant 1 : index
    %c0_140 = arith.constant 0 : index
    %c0_141 = arith.constant 0 : index
    %315 = vector.load %arg18[%c1_139, %c0_140, %c0_141] : memref<2x1x64xf32, #tpu.memory_space<vmem>>, vector<1x1x64xf32>
    %316 = vector.shape_cast %315 : vector<1x1x64xf32> to vector<1x64xf32>
    %317 = vector.broadcast %316 : vector<1x64xf32> to vector<48x64xf32>
    %318 = arith.addf %314, %317 : vector<48x64xf32>
    %cst_142 = arith.constant 0.000000e+00 : f32
    %319 = vector.broadcast %cst_142 : f32 to vector<48x64xf32>
    %320 = arith.maximumf %318, %319 : vector<48x64xf32>
    %c1_143 = arith.constant 1 : index
    %c0_144 = arith.constant 0 : index
    %c0_145 = arith.constant 0 : index
    %321 = vector.load %arg19[%c1_143, %c0_144, %c0_145] : memref<2x64x32xbf16, #tpu.memory_space<vmem>>, vector<1x64x32xbf16>
    %322 = vector.shape_cast %321 : vector<1x64x32xbf16> to vector<64x32xbf16>
    %323 = arith.truncf %320 : vector<48x64xf32> to vector<48x64xbf16>
    %cst_146 = arith.constant dense<0.000000e+00> : vector<48x32xf32>
    %324 = tpu.matmul %323, %322, %cst_146 {dimension_numbers = #tpu.dot_dimension_numbers<[1], [0], [0], [1], [0, 0, 1, 1], [], []>} : vector<48x64xbf16>, vector<64x32xbf16>, vector<48x32xf32> -> vector<48x32xf32>
    %325 = arith.addf %284, %324 : vector<48x32xf32>
    %c1_147 = arith.constant 1 : index
    %c0_148 = arith.constant 0 : index
    %c0_149 = arith.constant 0 : index
    %326 = vector.load %arg20[%c1_147, %c0_148, %c0_149] : memref<2x1x32xf32, #tpu.memory_space<vmem>>, vector<1x1x32xf32>
    %327 = vector.shape_cast %326 : vector<1x1x32xf32> to vector<1x32xf32>
    %328 = vector.broadcast %327 : vector<1x32xf32> to vector<48x32xf32>
    %329 = arith.addf %325, %328 : vector<48x32xf32>
    %330 = vector.extract_strided_slice %329 {offsets = [0, 0], sizes = [1, 32], strides = [1, 1]} : vector<48x32xf32> to vector<1x32xf32>
    %331 = vector.extract_strided_slice %329 {offsets = [24, 0], sizes = [1, 32], strides = [1, 1]} : vector<48x32xf32> to vector<1x32xf32>
    %332 = tpu.concatenate %330, %331 in 0 : vector<1x32xf32>, vector<1x32xf32> -> vector<2x32xf32>
    %c0_150 = arith.constant 0 : index
    %c0_151 = arith.constant 0 : index
    %333 = vector.load %arg21[%c0_150, %c0_151] : memref<32x16xbf16, #tpu.memory_space<vmem>>, vector<32x16xbf16>
    %334 = arith.truncf %332 : vector<2x32xf32> to vector<2x32xbf16>
    %cst_152 = arith.constant dense<0.000000e+00> : vector<2x16xf32>
    %335 = tpu.matmul %334, %333, %cst_152 {dimension_numbers = #tpu.dot_dimension_numbers<[1], [0], [0], [1], [0, 0, 1, 1], [], []>} : vector<2x32xbf16>, vector<32x16xbf16>, vector<2x16xf32> -> vector<2x16xf32>
    %c0_153 = arith.constant 0 : index
    %c0_154 = arith.constant 0 : index
    %336 = vector.load %arg22[%c0_153, %c0_154] : memref<1x16xf32, #tpu.memory_space<vmem>>, vector<1x16xf32>
    %337 = vector.broadcast %336 : vector<1x16xf32> to vector<2x16xf32>
    %338 = arith.addf %335, %337 : vector<2x16xf32>
    %cst_155 = arith.constant 0.000000e+00 : f32
    %339 = vector.broadcast %cst_155 : f32 to vector<2x16xf32>
    %340 = arith.maximumf %338, %339 : vector<2x16xf32>
    %c0_156 = arith.constant 0 : index
    %c0_157 = arith.constant 0 : index
    %341 = vector.load %arg23[%c0_156, %c0_157] : memref<16x10xbf16, #tpu.memory_space<vmem>>, vector<16x10xbf16>
    %342 = arith.truncf %340 : vector<2x16xf32> to vector<2x16xbf16>
    %cst_158 = arith.constant dense<0.000000e+00> : vector<2x10xf32>
    %343 = tpu.matmul %342, %341, %cst_158 {dimension_numbers = #tpu.dot_dimension_numbers<[1], [0], [0], [1], [0, 0, 1, 1], [], []>} : vector<2x16xbf16>, vector<16x10xbf16>, vector<2x10xf32> -> vector<2x10xf32>
    %c0_159 = arith.constant 0 : index
    %c0_160 = arith.constant 0 : index
    %344 = vector.load %arg24[%c0_159, %c0_160] : memref<1x10xf32, #tpu.memory_space<vmem>>, vector<1x10xf32>
    %345 = vector.broadcast %344 : vector<1x10xf32> to vector<2x10xf32>
    %346 = arith.addf %343, %345 : vector<2x10xf32>
    %cst_161 = arith.constant 0.000000e+00 : f32
    %347 = vector.broadcast %cst_161 : f32 to vector<2x10xf32>
    %348 = arith.maximumf %346, %347 : vector<2x10xf32>
    %c0_162 = arith.constant 0 : index
    %c0_163 = arith.constant 0 : index
    %c0_164 = arith.constant 0 : index
    %349 = vector.load %arg25[%c0_162, %c0_163, %c0_164] : memref<1x2x10xf32, #tpu.memory_space<vmem>>, vector<1x2x10xf32>
    %350 = vector.shape_cast %349 : vector<1x2x10xf32> to vector<2x10xf32>
    %351 = vector.shape_cast %348 : vector<2x10xf32> to vector<1x2x10xf32>
    tpu.vector_store %arg25[%c0_162, %c0_163, %c0_164], %351 {strides = array<i32>} : memref<1x2x10xf32, #tpu.memory_space<vmem>>, vector<1x2x10xf32>,
    return
  }
  func.func @transform_0(%arg0: i32) -> (i32, i32, i32) {
    %c0_i32 = arith.constant 0 : i32
    %c0_i32_0 = arith.constant 0 : i32
    %c0_i32_1 = arith.constant 0 : i32
    return %arg0, %c0_i32, %c0_i32_0 : i32, i32, i32
  }
  func.func @transform_1(%arg0: i32) -> (i32, i32) {
    %c0_i32 = arith.constant 0 : i32
    %c0_i32_0 = arith.constant 0 : i32
    %c0_i32_1 = arith.constant 0 : i32
    return %c0_i32, %c0_i32_0 : i32, i32
  }
  func.func @transform_2(%arg0: i32) -> (i32, i32) {
    %c0_i32 = arith.constant 0 : i32
    %c0_i32_0 = arith.constant 0 : i32
    %c0_i32_1 = arith.constant 0 : i32
    return %c0_i32, %c0_i32_0 : i32, i32
  }
  func.func @transform_3(%arg0: i32) -> (i32, i32) {
    %c0_i32 = arith.constant 0 : i32
    %c0_i32_0 = arith.constant 0 : i32
    %c0_i32_1 = arith.constant 0 : i32
    return %c0_i32, %c0_i32_0 : i32, i32
  }
  func.func @transform_4(%arg0: i32) -> (i32, i32, i32) {
    %c0_i32 = arith.constant 0 : i32
    %c0_i32_0 = arith.constant 0 : i32
    %c0_i32_1 = arith.constant 0 : i32
    %c0_i32_2 = arith.constant 0 : i32
    return %c0_i32, %c0_i32_0, %c0_i32_1 : i32, i32, i32
  }
  func.func @transform_5(%arg0: i32) -> (i32, i32, i32) {
    %c0_i32 = arith.constant 0 : i32
    %c0_i32_0 = arith.constant 0 : i32
    %c0_i32_1 = arith.constant 0 : i32
    %c0_i32_2 = arith.constant 0 : i32
    return %c0_i32, %c0_i32_0, %c0_i32_1 : i32, i32, i32
  }
  func.func @transform_6(%arg0: i32) -> (i32, i32, i32) {
    %c0_i32 = arith.constant 0 : i32
    %c0_i32_0 = arith.constant 0 : i32
    %c0_i32_1 = arith.constant 0 : i32
    %c0_i32_2 = arith.constant 0 : i32
    return %c0_i32, %c0_i32_0, %c0_i32_1 : i32, i32, i32
  }
  func.func @transform_7(%arg0: i32) -> (i32, i32, i32) {
    %c0_i32 = arith.constant 0 : i32
    %c0_i32_0 = arith.constant 0 : i32
    %c0_i32_1 = arith.constant 0 : i32
    %c0_i32_2 = arith.constant 0 : i32
    return %c0_i32, %c0_i32_0, %c0_i32_1 : i32, i32, i32
  }
  func.func @transform_8(%arg0: i32) -> (i32, i32, i32) {
    %c0_i32 = arith.constant 0 : i32
    %c0_i32_0 = arith.constant 0 : i32
    %c0_i32_1 = arith.constant 0 : i32
    %c0_i32_2 = arith.constant 0 : i32
    return %c0_i32, %c0_i32_0, %c0_i32_1 : i32, i32, i32
  }
  func.func @transform_9(%arg0: i32) -> (i32, i32, i32) {
    %c0_i32 = arith.constant 0 : i32
    %c0_i32_0 = arith.constant 0 : i32
    %c0_i32_1 = arith.constant 0 : i32
    %c0_i32_2 = arith.constant 0 : i32
    return %c0_i32, %c0_i32_0, %c0_i32_1 : i32, i32, i32
  }
  func.func @transform_10(%arg0: i32) -> (i32, i32, i32) {
    %c0_i32 = arith.constant 0 : i32
    %c0_i32_0 = arith.constant 0 : i32
    %c0_i32_1 = arith.constant 0 : i32
    %c0_i32_2 = arith.constant 0 : i32
    return %c0_i32, %c0_i32_0, %c0_i32_1 : i32, i32, i32
  }
  func.func @transform_11(%arg0: i32) -> (i32, i32, i32) {
    %c0_i32 = arith.constant 0 : i32
    %c0_i32_0 = arith.constant 0 : i32
    %c0_i32_1 = arith.constant 0 : i32
    %c0_i32_2 = arith.constant 0 : i32
    return %c0_i32, %c0_i32_0, %c0_i32_1 : i32, i32, i32
  }
  func.func @transform_12(%arg0: i32) -> (i32, i32, i32) {
    %c0_i32 = arith.constant 0 : i32
    %c0_i32_0 = arith.constant 0 : i32
    %c0_i32_1 = arith.constant 0 : i32
    %c0_i32_2 = arith.constant 0 : i32
    return %c0_i32, %c0_i32_0, %c0_i32_1 : i32, i32, i32
  }
  func.func @transform_13(%arg0: i32) -> (i32, i32, i32) {
    %c0_i32 = arith.constant 0 : i32
    %c0_i32_0 = arith.constant 0 : i32
    %c0_i32_1 = arith.constant 0 : i32
    %c0_i32_2 = arith.constant 0 : i32
    return %c0_i32, %c0_i32_0, %c0_i32_1 : i32, i32, i32
  }
  func.func @transform_14(%arg0: i32) -> (i32, i32, i32) {
    %c0_i32 = arith.constant 0 : i32
    %c0_i32_0 = arith.constant 0 : i32
    %c0_i32_1 = arith.constant 0 : i32
    %c0_i32_2 = arith.constant 0 : i32
    return %c0_i32, %c0_i32_0, %c0_i32_1 : i32, i32, i32
  }
  func.func @transform_15(%arg0: i32) -> (i32, i32, i32) {
    %c0_i32 = arith.constant 0 : i32
    %c0_i32_0 = arith.constant 0 : i32
    %c0_i32_1 = arith.constant 0 : i32
    %c0_i32_2 = arith.constant 0 : i32
    return %c0_i32, %c0_i32_0, %c0_i32_1 : i32, i32, i32
  }
  func.func @transform_16(%arg0: i32) -> (i32, i32, i32) {
    %c0_i32 = arith.constant 0 : i32
    %c0_i32_0 = arith.constant 0 : i32
    %c0_i32_1 = arith.constant 0 : i32
    %c0_i32_2 = arith.constant 0 : i32
    return %c0_i32, %c0_i32_0, %c0_i32_1 : i32, i32, i32
  }
  func.func @transform_17(%arg0: i32) -> (i32, i32, i32) {
    %c0_i32 = arith.constant 0 : i32
    %c0_i32_0 = arith.constant 0 : i32
    %c0_i32_1 = arith.constant 0 : i32
    %c0_i32_2 = arith.constant 0 : i32
    return %c0_i32, %c0_i32_0, %c0_i32_1 : i32, i32, i32
  }
  func.func @transform_18(%arg0: i32) -> (i32, i32, i32) {
    %c0_i32 = arith.constant 0 : i32
    %c0_i32_0 = arith.constant 0 : i32
    %c0_i32_1 = arith.constant 0 : i32
    %c0_i32_2 = arith.constant 0 : i32
    return %c0_i32, %c0_i32_0, %c0_i32_1 : i32, i32, i32
  }
  func.func @transform_19(%arg0: i32) -> (i32, i32, i32) {
    %c0_i32 = arith.constant 0 : i32
    %c0_i32_0 = arith.constant 0 : i32
    %c0_i32_1 = arith.constant 0 : i32
    %c0_i32_2 = arith.constant 0 : i32
    return %c0_i32, %c0_i32_0, %c0_i32_1 : i32, i32, i32
  }
  func.func @transform_20(%arg0: i32) -> (i32, i32) {
    %c0_i32 = arith.constant 0 : i32
    %c0_i32_0 = arith.constant 0 : i32
    %c0_i32_1 = arith.constant 0 : i32
    return %c0_i32, %c0_i32_0 : i32, i32
  }
  func.func @transform_21(%arg0: i32) -> (i32, i32) {
    %c0_i32 = arith.constant 0 : i32
    %c0_i32_0 = arith.constant 0 : i32
    %c0_i32_1 = arith.constant 0 : i32
    return %c0_i32, %c0_i32_0 : i32, i32
  }
  func.func @transform_22(%arg0: i32) -> (i32, i32) {
    %c0_i32 = arith.constant 0 : i32
    %c0_i32_0 = arith.constant 0 : i32
    %c0_i32_1 = arith.constant 0 : i32
    return %c0_i32, %c0_i32_0 : i32, i32
  }
  func.func @transform_23(%arg0: i32) -> (i32, i32) {
    %c0_i32 = arith.constant 0 : i32
    %c0_i32_0 = arith.constant 0 : i32
    %c0_i32_1 = arith.constant 0 : i32
    return %c0_i32, %c0_i32_0 : i32, i32
  }
  func.func @transform_24(%arg0: i32) -> (i32, i32, i32) {
    %c0_i32 = arith.constant 0 : i32
    %c0_i32_0 = arith.constant 0 : i32
    %c0_i32_1 = arith.constant 0 : i32
    return %arg0, %c0_i32, %c0_i32_0 : i32, i32, i32
  }
}

</mosaic_0001>

<bundles_post_ra>
// kernel: _lambda_.1
= control target key start
LH: loop header
LB: loop body
LE: loop exit
PB: predicated region body
PF: predicated region fallthrough
CT: control target
= control target key end

     0   :  { %s5975_s0 = inlined_call_operand.vmem [shape: bf16[1,48,64], index: 0, kind: input, shape index: {}]   ;;  %s5976_s1 = inlined_call_operand.vmem [shape: f32[48,32], index: 1, kind: input, shape index: {}]   ;;  %s5977_s2 = inlined_call_operand.vmem [shape: bf16[64,32], index: 2, kind: input, shape index: {}]   ;;  %s5978_s3 = inlined_call_operand.vmem [shape: f32[192,48], index: 3, kind: input, shape index: {}]   ;;  %s5979_s4 = inlined_call_operand.vmem [shape: f32[2,1,32], index: 4, kind: input, shape index: {}]   ;;  %s5980_s5 = inlined_call_operand.vmem [shape: f32[2,1,32], index: 5, kind: input, shape index: {}]   ;;  %s5981_s6 = inlined_call_operand.vmem [shape: bf16[2,32,32], index: 6, kind: input, shape index: {}]   ;;  %s5982_s7 = inlined_call_operand.vmem [shape: f32[2,1,32], index: 7, kind: input, shape index: {}]   ;;  %s5983_s8 = inlined_call_operand.vmem [shape: bf16[2,32,32], index: 8, kind: input, shape index: {}]   ;;  %s5984_s9 = inlined_call_operand.vmem [shape: f32[2,1,32], index: 9, kind: input, shape index: {}]   ;;  %s5985_s10 = inlined_call_operand.vmem [shape: bf16[2,32,32], index: 10, kind: input, shape index: {}]   ;;  %s5986_s11 = inlined_call_operand.vmem [shape: f32[2,1,32], index: 11, kind: input, shape index: {}]   ;;  %s5987_s12 = inlined_call_operand.vmem [shape: bf16[2,32,32], index: 12, kind: input, shape index: {}]   ;;  %s5988_s13 = inlined_call_operand.vmem [shape: f32[2,1,32], index: 13, kind: input, shape index: {}]   ;;  %s5989_s14 = inlined_call_operand.vmem [shape: f32[2,1,32], index: 14, kind: input, shape index: {}]   ;;  %s5990_s15 = inlined_call_operand.vmem [shape: f32[2,1,32], index: 15, kind: input, shape index: {}]   ;;  %s5991_s16 = inlined_call_operand.vmem [shape: bf16[2,32,64], index: 16, kind: input, shape index: {}]   ;;  %s5992_s17 = inlined_call_operand.vmem [shape: f32[2,1,64], index: 17, kind: input, shape index: {}]   ;;  %s5993_s18 = inlined_call_operand.vmem [shape: bf16[2,64,32], index: 18, kind: input, shape index: {}]   ;;  %s5994_s19 = inlined_call_operand.vmem [shape: f32[2,1,32], index: 19, kind: input, shape index: {}]   ;;  %s5995_s20 = inlined_call_operand.vmem [shape: bf16[32,16], index: 20, kind: input, shape index: {}]   ;;  %s5996_s21 = inlined_call_operand.vmem [shape: f32[1,16], index: 21, kind: input, shape index: {}]   ;;  %s5997_s22 = inlined_call_operand.vmem [shape: bf16[16,10], index: 22, kind: input, shape index: {}]   ;;  %s5998_s23 = inlined_call_operand.vmem [shape: f32[1,10], index: 23, kind: input, shape index: {}]   ;;  %s5999_s24 = inlined_call_operand.hbm [shape: f32[1,2,10], index: 24, kind: output, shape index: {}]  }
   0x1   :  { %6009 = sst [smem:[#allocation5_spill]] %s5975_s0 }
   0x2   :  { %6010 = sst [smem:[#allocation6_spill]] %s5976_s1 }
   0x3   :  { %6011 = sst [smem:[#allocation7_spill]] %s5977_s2 }
   0x4   :  { %6012 = sst [smem:[#allocation8_spill]] %s5978_s3 }
   0x5   :  { %6013 = sst [smem:[#allocation9_spill]] %s5979_s4 }
   0x6   :  { %6014 = sst [smem:[#allocation10_spill]] %s5980_s5 }
   0x7   :  { %6015 = sst [smem:[#allocation11_spill]] %s5981_s6 }
   0x8   :  { %6016 = sst [smem:[#allocation12_spill]] %s5982_s7 }
   0x9   :  { %6017 = sst [smem:[#allocation13_spill]] %s5983_s8 }
   0xa   :  { %s6018_s27 = sld [smem:[#allocation7_spill]]  ;;  %v4396_v1 = vmov 0.0   ;;  %vm4397_vm0 = vmmov 0   ;;  %vm184_vm1 = vcmask 523264  }
   0xb   :  { %3709 = vmatprep.subr.bf16.mxu0 %v4396_v1  ;;  %3729 = vmatprep.subr.bf16.mxu1 %v4396_v1  ;;  %s6019_s25 = sld [smem:[#allocation5_spill]] }
   0xc   :  { %3717 = vmatprep.mubr.msk.bf16.mxu0 %vm4397_vm0, %v4396_v1  ;;  %3733 = vmatprep.mubr.msk.bf16.mxu1 %vm4397_vm0, %v4396_v1 }
  0x10   :  { %v4072_v0 = vld [vmem:[%s6018_s27 + $0x18] sm:$0xff]   ;;  %v4073_v2 = vld [vmem:[%s6018_s27 + $0x10] sm:$0xff]   ;;  %v4074_v3 = vld [vmem:[%s6018_s27 + $0x8] sm:$0xff]  }
  0x11   :  { %3710 = vmatpush3.bf16.msra.mxu0 %v4072_v0  ;;  %v4075_v4 = vld [vmem:[%s6018_s27] sm:$0xff]   ;;  %v4077_v6 = vld [vmem:[%s6019_s25 + $0x8] sm:$0xff]  }
  0x12   :  { %3711 = vmatprep.subr.bf16.mxu0 %v4396_v1  ;;  %v4076_v5 = vld [vmem:[%s6019_s25] sm:$0xff]  }
  0x15   :  { %3712 = vmatpush3.bf16.msra.mxu0 %v4073_v2 }
  0x16   :  { %3713 = vmatprep.subr.bf16.mxu0 %v4396_v1 }
  0x19   :  { %3714 = vmatpush3.bf16.msra.mxu0 %v4074_v3 }
  0x1a   :  { %3715 = vmatprep.subr.bf16.mxu0 %v4396_v1 }
  0x1d   :  { %3716 = vmatpush3.bf16.msra.mxu0 %v4075_v4 }
  0x1e   :  { %3761 = vmatprep.subr.bf16.mxu0 %v4396_v1 }
  0x20   :  { %3718 = vmatmul.mubr.msk.bf16.vlgmr.msra.gmra.mxu0 %vm184_vm1, %v4076_v5 }
  0x21   :  { %3721 = vmatprep.mubr.msk.bf16.mxu0 %vm4397_vm0, %v4396_v1 }
  0x28   :  { %3722 = vmatmul.mubr.msk.bf16.gmra.mxu0 %vm184_vm1, %v4077_v6 }
  0x29   :  { %3725 = vmatprep.mubr.msk.bf16.mxu0 %vm4397_vm0, %v4396_v1 }
  0x2a   :  { %29 = vsyncpa [#allocation3], 0  ;;  %v4078_v7 = vld [vmem:[%s6019_s25 + $0x10] sm:$0xff]   ;;  %s6020_s28 = sld [smem:[#allocation6_spill]]  ;;  %vm253_vm2 = vcmask 261120   ;;  %v4080_v6 = vld [vmem:[%s5985_s10 + $0x8] sm:$0xff]  }
  0x2b   :  { %s6021_s26 = sld [smem:[#allocation11_spill]]  ;;  %3762 = vmatpush3.bf16.msra.mxu0 %v4080_v6  ;;  %vm828_vm13 = vcmask 392192   ;;  %vm3235_vm14 = vcmask 1040384   ;;  %vm3321_vm15 = vcmask 130048   ;;  %s4398_s1 = smov [#allocation2]  }
  0x2c   :  { %3763 = vmatprep.subr.bf16.mxu0 %v4396_v1  ;;  %s6022_s3 = sld [smem:[#allocation9_spill]] }
  0x2d   :  { %s6023_s4 = sld [smem:[#allocation10_spill]] }
  0x2e   :  { %s6024_s27 = sld [smem:[#allocation13_spill]] }
  0x2f   :  { %s6025_s0 = sld [smem:[#allocation12_spill]] }
  0x30   :  { %3726 = vmatmul.mubr.msk.bf16.gmra.mxu0 %vm184_vm1, %v4078_v7  ;;  %v139_v8 = vld [vmem:[%s6020_s28] sm:$0xff]  ;;  %v140_v12 = vld [vmem:[%s6020_s28 + $0x8] sm:$0xff]  ;;  %v141_v17 = vld [vmem:[%s6020_s28 + $0x10] sm:$0xff] }
  0x31   :  { %3765 = vmatprep.mubr.msk.bf16.mxu0 %vm4397_vm0, %v4396_v1  ;;  %v142_v22 = vld [vmem:[%s6020_s28 + $0x18] sm:$0xff]  ;;  %v143_v27 = vld [vmem:[%s6020_s28 + $0x20] sm:$0xff]  ;;  %v144_v32 = vld [vmem:[%s6020_s28 + $0x28] sm:$0xff]  ;;  %s6026_s28 = sld [smem:[#allocation8_spill]] }
  0x32   :  { %v4079_v5 = vld [vmem:[%s6021_s26 + $0x8] sm:$0xff]   ;;  %v4081_v7 = vld [vmem:[%s6021_s26] sm:$0xff]  }
  0x33   :  { %3730 = vmatpush3.bf16.msra.mxu1 %v4079_v5 }
  0x34   :  { %3731 = vmatprep.subr.bf16.mxu1 %v4396_v1 }
  0x37   :  { %3732 = vmatpush3.bf16.msra.mxu1 %v4081_v7 }
  0x38   :  { %3745 = vmatprep.subr.bf16.mxu1 %v4396_v1 }
  0xe0   :  { %v228_v9 = vpop.f32.mrf.mxu0 }
  0xe1   :  { %v4567_v10 = vadd.f32 %v228_v9, %v139_v8  ;;  %v4082_v8 = vld [vmem:[%s5985_s10] sm:$0xff]  }
  0xe2   :  { %v3719_v11 = vpop.f32.mrf.mxu0  ;;  %3764 = vmatpush3.bf16.msra.mxu0 %v4082_v8 }
  0xe3   :  { %v254_v13 = vsel %vm253_vm2, %v4567_v10, 0.0 }
  0xe4   :  { %255 = vadd.xlane.f32.xlu0 %v254_v13  ;;  %v231_v14 = vpop.f32.mrf.mxu0 }
  0xe5   :  { %v4574_v15 = vadd.f32 %v231_v14, %v140_v12 }
  0xe6   :  { %v3720_v16 = vpop.f32.mrf.mxu0 }
  0xe7   :  { %v257_v18 = vsel %vm253_vm2, %v4574_v15, 0.0 }
  0xe8   :  { %258 = vadd.xlane.f32.xlu0 %v257_v18  ;;  %v236_v19 = vpop.f32.mrf.mxu0 }
  0xe9   :  { %v4581_v20 = vadd.f32 %v236_v19, %v141_v17 }
  0xea   :  { %v3723_v21 = vpop.f32.mrf.mxu0 }
  0xeb   :  { %v260_v23 = vsel %vm253_vm2, %v4581_v20, 0.0 }
  0xec   :  { %261 = vadd.xlane.f32.xlu1 %v260_v23  ;;  %v239_v24 = vpop.f32.mrf.mxu0 }
  0xed   :  { %v4588_v25 = vadd.f32 %v239_v24, %v142_v22 }
  0xee   :  { %v3724_v26 = vpop.f32.mrf.mxu0 }
  0xef   :  { %v263_v28 = vsel %vm253_vm2, %v4588_v25, 0.0 }
  0xf0   :  { %264 = vadd.xlane.f32.xlu1 %v263_v28  ;;  %v244_v29 = vpop.f32.mrf.mxu0 }
  0xf1   :  { %v4595_v30 = vadd.f32 %v244_v29, %v143_v27 }
  0xf2   :  { %v3727_v31 = vpop.f32.mrf.mxu0 }
  0xf3   :  { %v266_v33 = vsel %vm253_vm2, %v4595_v30, 0.0 }
  0xf4   :  { %267 = vadd.xlane.f32.xlu0 %v266_v33  ;;  %v247_v34 = vpop.f32.mrf.mxu0 }
  0xf5   :  { %v4602_v35 = vadd.f32 %v247_v34, %v144_v32  ;;  %v3396_v32 = vld [vmem:[%s6022_s3] ss:$0 sm:$0xff] }
  0xf6   :  { %v3728_v36 = vpop.f32.mrf.mxu0 }
  0xf7   :  { %v269_v37 = vsel %vm253_vm2, %v4602_v35, 0.0 }
  0xf8   :  { %270 = vadd.xlane.f32.xlu1 %v269_v37 }
 0x16d   :  { %v256_v38 = vpop.xlane.xlu0 %255 }
 0x16e   :  { %v273_v39 = vmul.f32 0.03125, %v256_v38 }
 0x170   :  { %v4607_v40 = vsub.f32 %v4567_v10, %v273_v39  ;;  %v3397_v39 = vld [vmem:[%s6023_s4] ss:$0 sm:$0xff] }
 0x171   :  { %v259_v41 = vpop.xlane.xlu0 %258 }
 0x172   :  { %v274_v42 = vmul.f32 0.03125, %v259_v41  ;;  %v285_v43 = vmul.f32 %v4607_v40, %v4607_v40 }
 0x174   :  { %v4612_v44 = vsub.f32 %v4574_v15, %v274_v42  ;;  %v291_v45 = vsel %vm253_vm2, %v285_v43, 0.0 }
 0x175   :  { %v262_v46 = vpop.xlane.xlu1 %261  ;;  %292 = vadd.xlane.f32.xlu0 %v291_v45 }
 0x176   :  { %v275_v47 = vmul.f32 0.03125, %v262_v46  ;;  %v286_v48 = vmul.f32 %v4612_v44, %v4612_v44  ;;  %v4083_v46 = vld [vmem:[%s6024_s27 + $0x8] sm:$0xff]  }
 0x178   :  { %v4618_v49 = vsub.f32 %v4581_v20, %v275_v47  ;;  %v294_v50 = vsel %vm253_vm2, %v286_v48, 0.0 }
 0x179   :  { %v265_v51 = vpop.xlane.xlu1 %264  ;;  %295 = vadd.xlane.f32.xlu1 %v294_v50 }
 0x17a   :  { %v276_v52 = vmul.f32 0.03125, %v265_v51  ;;  %v287_v53 = vmul.f32 %v4618_v49, %v4618_v49 }
 0x17c   :  { %v4624_v54 = vsub.f32 %v4588_v25, %v276_v52  ;;  %v297_v55 = vsel %vm253_vm2, %v287_v53, 0.0 }
 0x17d   :  { %298 = vadd.xlane.f32.xlu0 %v297_v55  ;;  %v268_v56 = vpop.xlane.xlu0 %267 }
 0x17e   :  { %v277_v57 = vmul.f32 0.03125, %v268_v56  ;;  %v288_v58 = vmul.f32 %v4624_v54, %v4624_v54 }
 0x180   :  { %v4630_v59 = vsub.f32 %v4595_v30, %v277_v57  ;;  %v300_v60 = vsel %vm253_vm2, %v288_v58, 0.0 }
 0x181   :  { %301 = vadd.xlane.f32.xlu1 %v300_v60  ;;  %v271_v61 = vpop.xlane.xlu1 %270 }
 0x182   :  { %v278_v62 = vmul.f32 0.03125, %v271_v61  ;;  %v289_v63 = vmul.f32 %v4630_v59, %v4630_v59 }
 0x184   :  { %v4636_v0 = vsub.f32 %v4602_v35, %v278_v62  ;;  %v303_v2 = vsel %vm253_vm2, %v289_v63, 0.0 }
 0x185   :  { %304 = vadd.xlane.f32.xlu0 %v303_v2 }
 0x186   :  { %v290_v3 = vmul.f32 %v4636_v0, %v4636_v0 }
 0x188   :  { %v306_v4 = vsel %vm253_vm2, %v290_v3, 0.0  ;;  %v4702_v3 = vld [vmem:[%s6025_s0] ss:$0 sm:$0xff] }
 0x189   :  { %307 = vadd.xlane.f32.xlu1 %v306_v4 }
 0x1fe   :  { %v293_v9 = vpop.xlane.xlu0 %292 }
 0x1ff   :  { %v309_v11 = vmul.f32 0.03125, %v293_v9 }
 0x201   :  { %v315_v12 = vadd.f32 1e-05, %v309_v11 }
 0x202   :  { %v296_v13 = vpop.xlane.xlu1 %295 }
 0x203   :  { %4110 = vrsqrt.f32 %v315_v12  ;;  %v310_v14 = vmul.f32 0.03125, %v296_v13 }
 0x205   :  { %v316_v16 = vadd.f32 1e-05, %v310_v14 }
 0x206   :  { %v299_v17 = vpop.xlane.xlu0 %298 }
 0x207   :  { %4112 = vrsqrt.f32 %v316_v16  ;;  %v311_v18 = vmul.f32 0.03125, %v299_v17 }
 0x209   :  { %v317_v19 = vadd.f32 1e-05, %v311_v18 }
 0x20a   :  { %v302_v21 = vpop.xlane.xlu1 %301 }
 0x20b   :  { %4114 = vrsqrt.f32 %v317_v19  ;;  %v312_v22 = vmul.f32 0.03125, %v302_v21 }
 0x20d   :  { %v318_v23 = vadd.f32 1e-05, %v312_v22 }
 0x20e   :  { %v305_v24 = vpop.xlane.xlu0 %304 }
 0x20f   :  { %4116 = vrsqrt.f32 %v318_v23  ;;  %v313_v26 = vmul.f32 0.03125, %v305_v24 }
 0x210   :  { %v4111_v27 = vpop.eup %4110 }
 0x211   :  { %v319_v28 = vadd.f32 1e-05, %v313_v26  ;;  %v327_v29 = vmul.f32 %v4111_v27, %v4607_v40 }
 0x212   :  { %v308_v31 = vpop.xlane.xlu1 %307 }
 0x213   :  { %4118 = vrsqrt.f32 %v319_v28  ;;  %v314_v33 = vmul.f32 0.03125, %v308_v31  ;;  %v339_v38 = vmul.f32 %v3396_v32, %v327_v29 }
 0x214   :  { %v4113_v34 = vpop.eup %4112 }
 0x215   :  { %v320_v36 = vadd.f32 1e-05, %v314_v33  ;;  %v328_v37 = vmul.f32 %v4113_v34, %v4612_v44  ;;  %v351_v40 = vadd.f32 %v3397_v39, %v339_v38 }
 0x217   :  { %4120 = vrsqrt.f32 %v320_v36  ;;  %v340_v41 = vmul.f32 %v3396_v32, %v328_v37 }
 0x218   :  { %v4115_v42 = vpop.eup %4114 }
 0x219   :  { %v352_v43 = vadd.f32 %v3397_v39, %v340_v41  ;;  %v329_v45 = vmul.f32 %v4115_v42, %v4618_v49  ;;  %v4084_v49 = vld [vmem:[%s6024_s27] sm:$0xff]  }
 0x21b   :  { %v361_v47 = vpack.c.bf16 %v352_v43, %v351_v40  ;;  %v341_v50 = vmul.f32 %v3396_v32, %v329_v45 }
 0x21c   :  { %v4117_v48 = vpop.eup %4116 }
 0x21d   :  { %3734 = vmatmul.mubr.msk.bf16.vlgmr.msra.gmra.mxu1 %vm253_vm2, %v361_v47  ;;  %3766 = vmatmul.mubr.msk.bf16.vlgmr.msra.gmra.mxu0 %vm253_vm2, %v361_v47  ;;  %v330_v44 = vmul.f32 %v4117_v48, %v4624_v54  ;;  %v353_v53 = vadd.f32 %v3397_v39, %v341_v50 }
 0x21e   :  { %3746 = vmatpush3.bf16.msra.mxu1 %v4083_v46  ;;  %3737 = vmatprep.mubr.msk.bf16.mxu1 %vm4397_vm0, %v4396_v1 }
 0x21f   :  { %3769 = vmatprep.mubr.msk.bf16.mxu0 %vm4397_vm0, %v4396_v1  ;;  %v342_v51 = vmul.f32 %v3396_v32, %v330_v44  ;;  %3747 = vmatprep.subr.bf16.mxu1 %v4396_v1 }
 0x220   :  { %v4119_v52 = vpop.eup %4118 }
 0x221   :  { %v354_v55 = vadd.f32 %v3397_v39, %v342_v51  ;;  %v331_v54 = vmul.f32 %v4119_v52, %v4630_v59  ;;  %v3410_v52 = vld [vmem:[%s5986_s11] ss:$0 sm:$0xff] }
 0x222   :  { %3748 = vmatpush3.bf16.msra.mxu1 %v4084_v49 }
 0x223   :  { %v362_v56 = vpack.c.bf16 %v354_v55, %v353_v53  ;;  %v343_v60 = vmul.f32 %v3396_v32, %v331_v54 }
 0x224   :  { %v4121_v57 = vpop.eup %4120 }
 0x225   :  { %3738 = vmatmul.mubr.msk.bf16.gmra.mxu1 %vm253_vm2, %v362_v56  ;;  %3770 = vmatmul.mubr.msk.bf16.gmra.mxu0 %vm253_vm2, %v362_v56  ;;  %v332_v58 = vmul.f32 %v4121_v57, %v4636_v0  ;;  %v355_v62 = vadd.f32 %v3397_v39, %v343_v60  ;;  %v103_v0 = vlaneseq }
 0x226   :  { %3741 = vmatprep.mubr.msk.bf16.mxu1 %vm4397_vm0, %v4396_v1  ;;  %3773 = vmatprep.mubr.msk.bf16.mxu0 %vm4397_vm0, %v4396_v1 }
 0x227   :  { %v344_v61 = vmul.f32 %v3396_v32, %v332_v58  ;;  %v104_v2 = vand.u32 127, %v103_v0 }
 0x229   :  { %v356_v63 = vadd.f32 %v3397_v39, %v344_v61  ;;  %vm110_vm3 = vcmp.ge.s32.totalorder %v104_v2, 8  ;;  %vm111_vm4 = vcmp.lt.s32.totalorder %v104_v2, 16  ;;  %vm115_vm5 = vcmp.ge.s32.totalorder %v104_v2, 16 }
 0x22a   :  { %vm116_vm6 = vcmp.lt.s32.totalorder %v104_v2, 24  ;;  %vm120_vm7 = vcmp.ge.s32.totalorder %v104_v2, 24  ;;  %vm121_vm8 = vcmp.lt.s32.totalorder %v104_v2, 32  ;;  %vm112_vm9 = vmand %vm110_vm3, %vm111_vm4  ;;  %vm106_vm10 = vcmp.lt.s32.totalorder %v104_v2, 8 }
 0x22b   :  { %v363_v59 = vpack.c.bf16 %v356_v63, %v355_v62  ;;  %vm117_vm11 = vmand %vm115_vm5, %vm116_vm6  ;;  %v4706_v12 = vsel %vm106_vm10, 1.0, %v4396_v1  ;;  %v4709_v14 = vsel %vm112_vm9, 1.0, %v4396_v1 }
 0x22c   :  { %vm122_vm12 = vmand %vm120_vm7, %vm121_vm8  ;;  %v4712_v16 = vsel %vm117_vm11, 1.0, %v4396_v1 }
 0x22d   :  { %3742 = vmatmul.mubr.msk.bf16.gmra.mxu1 %vm253_vm2, %v363_v59  ;;  %3774 = vmatmul.mubr.msk.bf16.gmra.mxu0 %vm253_vm2, %v363_v59  ;;  %v4715_v17 = vsel %vm122_vm12, 1.0, %v4396_v1 }
 0x22e   :  { %3749 = vmatprep.mubr.msk.bf16.mxu1 %vm4397_vm0, %v4396_v1 }
 0x235   :  { %3750 = vmatmul.mubr.msk.bf16.vlgmr.msra.gmra.mxu1 %vm253_vm2, %v361_v47 }
 0x236   :  { %3753 = vmatprep.mubr.msk.bf16.mxu1 %vm4397_vm0, %v4396_v1 }
 0x23d   :  { %3754 = vmatmul.mubr.msk.bf16.gmra.mxu1 %vm253_vm2, %v362_v56 }
 0x23e   :  { %3757 = vmatprep.mubr.msk.bf16.mxu1 %vm4397_vm0, %v4396_v1 }
 0x245   :  { %3758 = vmatmul.mubr.msk.bf16.gmra.mxu1 %vm253_vm2, %v363_v59 }
 0x2dd   :  { %v426_v4 = vpop.f32.mrf.mxu1  ;;  %v592_v5 = vpop.f32.mrf.mxu0 }
 0x2de   :  { %v427_v6 = vadd.f32 %v4702_v3, %v426_v4  ;;  %v593_v0 = vadd.f32 %v3410_v52, %v592_v5 }
 0x2df   :  { %v3735_v7 = vpop.f32.mrf.mxu1  ;;  %v3767_v8 = vpop.f32.mrf.mxu0 }
 0x2e0   :  { %v449_v13 = vmul.f32 0.03125, %v427_v6 }
 0x2e1   :  { %v429_v9 = vpop.f32.mrf.mxu1  ;;  %v595_v11 = vpop.f32.mrf.mxu0 }
 0x2e2   :  { %v430_v18 = vadd.f32 %v4702_v3, %v429_v9  ;;  %v615_v26 = vmul.f32 %v4706_v12, %v449_v13  ;;  %v4722_v27 = vmul.f32 %v4709_v14, %v449_v13  ;;  %v4725_v28 = vmul.f32 %v4712_v16, %v449_v13 }
 0x2e3   :  { %v3736_v19 = vpop.f32.mrf.mxu1  ;;  %v3768_v21 = vpop.f32.mrf.mxu0  ;;  %v4728_v29 = vmul.f32 %v4715_v17, %v449_v13  ;;  %v596_v62 = vadd.f32 %v3410_v52, %v595_v11 }
 0x2e4   :  { %v450_v22 = vmul.f32 0.03125, %v430_v18  ;;  %v3404_v19 = vld [vmem:[%s5984_s9] ss:$0 sm:$0xff] }
 0x2e5   :  { %v4718_v23 = vpop.f32.mrf.mxu1  ;;  %v600_v24 = vpop.f32.mrf.mxu0  ;;  %v1105_v4 = vpack.c.bf16 %v596_v62, %v593_v0 }
 0x2e6   :  { %v616_v31 = vmul.f32 %v4706_v12, %v450_v22  ;;  %v4732_v32 = vmul.f32 %v4709_v14, %v450_v22  ;;  %v4735_v33 = vmul.f32 %v4712_v16, %v450_v22  ;;  %v4738_v34 = vmul.f32 %v4715_v17, %v450_v22 }
 0x2e7   :  { %v3739_v36 = vpop.f32.mrf.mxu1  ;;  %v3771_v37 = vpop.f32.mrf.mxu0  ;;  %v601_v58 = vadd.f32 %v3410_v52, %v600_v24 }
 0x2e8   :  { %v639_v41 = vpack.c.bf16 %v616_v31, %v615_v26  ;;  %v642_v42 = vpack.c.bf16 %v4732_v32, %v4722_v27  ;;  %v645_v40 = vpack.c.bf16 %v4735_v33, %v4725_v28  ;;  %v648_v43 = vpack.c.bf16 %v4738_v34, %v4728_v29  ;;  %v81_v29 = vld [vmem:[%s6026_s28 + $0x10] sm:$0xff] }
 0x2e9   :  { %v437_v38 = vpop.f32.mrf.mxu1  ;;  %v603_v39 = vpop.f32.mrf.mxu0 }
 0x2ea   :  { %3783 = vmatprep.mubr.msk.bf16.mxu1 %vm253_vm2, %v639_v41  ;;  %v604_v53 = vadd.f32 %v3410_v52, %v603_v39 }
 0x2eb   :  { %v3740_v45 = vpop.f32.mrf.mxu1  ;;  %v3772_v46 = vpop.f32.mrf.mxu0 }
 0x2ec   :  { %v1106_v63 = vpack.c.bf16 %v604_v53, %v601_v58 }
 0x2ed   :  { %v442_v47 = vpop.f32.mrf.mxu1  ;;  %v608_v48 = vpop.f32.mrf.mxu0 }
 0x2ee   :  { %v609_v55 = vadd.f32 %v3410_v52, %v608_v48 }
 0x2ef   :  { %v3743_v44 = vpop.f32.mrf.mxu1  ;;  %v3775_v50 = vpop.f32.mrf.mxu0 }
 0x2f0   :  { %v438_v44 = vadd.f32 %v4702_v3, %v437_v38 }
 0x2f1   :  { %v445_v49 = vpop.f32.mrf.mxu1  ;;  %v611_v51 = vpop.f32.mrf.mxu0 }
 0x2f2   :  { %v612_v54 = vadd.f32 %v3410_v52, %v611_v51  ;;  %v446_v50 = vadd.f32 %v4702_v3, %v445_v49  ;;  %v435_v51 = vadd.f32 %v4702_v3, %v4718_v23  ;;  %v443_v52 = vadd.f32 %v4702_v3, %v442_v47 }
 0x2f3   :  { %v3744_v56 = vpop.f32.mrf.mxu1  ;;  %v3776_v57 = vpop.f32.mrf.mxu0  ;;  %v452_v53 = vmul.f32 0.03125, %v438_v44 }
 0x2f4   :  { %v1107_v60 = vpack.c.bf16 %v612_v54, %v609_v55  ;;  %v454_v55 = vmul.f32 0.03125, %v446_v50  ;;  %v451_v54 = vmul.f32 0.03125, %v435_v51  ;;  %v453_v57 = vmul.f32 0.03125, %v443_v52  ;;  %v84_v50 = vld [vmem:[%s6026_s28 + $0x28] sm:$0xff] }
 0x2f5   :  { %v512_v61 = vpop.f32.mrf.mxu1  ;;  %v618_v58 = vmul.f32 %v4706_v12, %v452_v53  ;;  %v624_v3 = vmul.f32 %v4709_v14, %v452_v53 }
 0x2f6   :  { %3807 = vmatprep.subr.bf16.mxu0 %v1107_v60  ;;  %v513_v45 = vadd.f32 %v3404_v19, %v512_v61  ;;  %v620_v38 = vmul.f32 %v4706_v12, %v454_v55  ;;  %v617_v49 = vmul.f32 %v4706_v12, %v451_v54  ;;  %v623_v47 = vmul.f32 %v4709_v14, %v451_v54 }
 0x2f7   :  { %v3751_v59 = vpop.f32.mrf.mxu1  ;;  %3808 = vmatpush3.bf16.msra.mxu0 %v1107_v60  ;;  %v619_v60 = vmul.f32 %v4706_v12, %v453_v57  ;;  %v632_v27 = vmul.f32 %v4712_v16, %v454_v55  ;;  %v629_v32 = vmul.f32 %v4712_v16, %v451_v54  ;;  %v635_v28 = vmul.f32 %v4715_v17, %v451_v54 }
 0x2f8   :  { %3809 = vmatprep.subr.bf16.mxu0 %v1106_v63  ;;  %v640_v23 = vpack.c.bf16 %v618_v58, %v617_v49  ;;  %v643_v62 = vpack.c.bf16 %v624_v3, %v623_v47  ;;  %v625_v59 = vmul.f32 %v4709_v14, %v453_v57  ;;  %v87_v58 = vld [vmem:[%s6026_s28 + $0x40] sm:$0xff] }
 0x2f9   :  { %v515_v2 = vpop.f32.mrf.mxu1  ;;  %v641_v61 = vpack.c.bf16 %v620_v38, %v619_v60 }
 0x2fa   :  { %v516_v41 = vadd.f32 %v3404_v19, %v515_v2  ;;  %v630_v2 = vmul.f32 %v4712_v16, %v452_v53 }
 0x2fb   :  { %v3752_v6 = vpop.f32.mrf.mxu1  ;;  %3810 = vmatpush3.bf16.msra.mxu0 %v1106_v63  ;;  %v626_v63 = vmul.f32 %v4709_v14, %v454_v55 }
 0x2fc   :  { %3811 = vmatprep.subr.bf16.mxu0 %v1105_v4  ;;  %v651_v46 = vpack.c.bf16 %v516_v41, %v513_v45  ;;  %v85_v45 = vld [vmem:[%s6026_s28 + $0x30] sm:$0xff] }
 0x2fd   :  { %v520_v7 = vpop.f32.mrf.mxu1  ;;  %v644_v0 = vpack.c.bf16 %v626_v63, %v625_v59 }
 0x2fe   :  { %v521_v31 = vadd.f32 %v3404_v19, %v520_v7  ;;  %v691_v56 = vsel %vm253_vm2, %v651_v46, 0  ;;  %v636_v7 = vmul.f32 %v4715_v17, %v452_v53 }
 0x2ff   :  { %v3755_v8 = vpop.f32.mrf.mxu1  ;;  %3812 = vmatpush3.bf16.msra.mxu0 %v1105_v4  ;;  %v646_v4 = vpack.c.bf16 %v630_v2, %v629_v32  ;;  %v90_v2 = vld [vmem:[%s6026_s28 + $0x58] sm:$0xff] }
 0x300   :  { %3853 = vmatprep.subr.bf16.mxu0 %v4396_v1  ;;  %v649_v33 = vpack.c.bf16 %v636_v7, %v635_v28  ;;  %v637_v8 = vmul.f32 %v4715_v17, %v453_v57 }
 0x301   :  { %v523_v9 = vpop.f32.mrf.mxu1 }
 0x302   :  { %v524_v21 = vadd.f32 %v3404_v19, %v523_v9 }
 0x303   :  { %v3756_v13 = vpop.f32.mrf.mxu1 }
 0x304   :  { %v652_v37 = vpack.c.bf16 %v524_v21, %v521_v31 }
 0x305   :  { %v528_v18 = vpop.f32.mrf.mxu1 }
 0x306   :  { %v529_v22 = vadd.f32 %v3404_v19, %v528_v18  ;;  %v694_v48 = vsel %vm253_vm2, %v652_v37, 0  ;;  %v79_v18 = vld [vmem:[%s6026_s28] sm:$0xff] }
 0x307   :  { %v3759_v11 = vpop.f32.mrf.mxu1 }
 0x309   :  { %v531_v5 = vpop.f32.mrf.mxu1 }
 0x30a   :  { %v532_v24 = vadd.f32 %v3404_v19, %v531_v5  ;;  %v80_v19 = vld [vmem:[%s6026_s28 + $0x8] sm:$0xff] }
 0x30b   :  { %v3760_v26 = vpop.f32.mrf.mxu1 }
 0x30c   :  { %v653_v36 = vpack.c.bf16 %v532_v24, %v529_v22  ;;  %v82_v22 = vld [vmem:[%s6026_s28 + $0x18] sm:$0xff] }
 0x30e   :  { %4063 = vmatprep.subr.msk.bf16.mxu1 %vm253_vm2, %v653_v36  ;;  %v697_v39 = vsel %vm253_vm2, %v653_v36, 0  ;;  %v83_v36 = vld [vmem:[%s6026_s28 + $0x20] sm:$0xff] }
 0x30f   :  { %3778 = vmatpush3.bf16.xpose.msra.mxu1 %v697_v39 }
 0x310   :  { %4064 = vmatprep.subr.msk.bf16.mxu1 %vm253_vm2, %v652_v37 }
 0x317   :  { %3780 = vmatpush3.bf16.xpose.msra.mxu1 %v694_v48 }
 0x318   :  { %4065 = vmatprep.subr.msk.bf16.mxu1 %vm253_vm2, %v651_v46 }
 0x31f   :  { %3782 = vmatpush3.bf16.xpose.msra.mxu1 %v691_v56 }
 0x320   :  { %3837 = vmatprep.subr.bf16.mxu1 %v4396_v1 }
 0x326   :  { %3784 = vmatmul.mubr.msk.bf16.vlgmr.msra.gmra.mxu1 %vm253_vm2, %v640_v23  ;;  %v89_v23 = vld [vmem:[%s6026_s28 + $0x50] sm:$0xff] }
 0x327   :  { %3787 = vmatprep.mubr.msk.bf16.mxu1 %vm253_vm2, %v641_v61 }
 0x32e   :  { %3788 = vmatmul.mubr.msk.bf16.gmra.mxu1 %vm253_vm2, %v642_v42  ;;  %v631_v42 = vmul.f32 %v4712_v16, %v453_v57 }
 0x32f   :  { %3791 = vmatprep.mubr.msk.bf16.mxu1 %vm253_vm2, %v643_v62  ;;  %v88_v62 = vld [vmem:[%s6026_s28 + $0x48] sm:$0xff] }
 0x330   :  { %v647_v6 = vpack.c.bf16 %v632_v27, %v631_v42 }
 0x336   :  { %3792 = vmatmul.mubr.msk.bf16.gmra.mxu1 %vm253_vm2, %v644_v0 }
 0x337   :  { %3795 = vmatprep.mubr.msk.bf16.mxu1 %vm253_vm2, %v645_v40  ;;  %v638_v40 = vmul.f32 %v4715_v17, %v454_v55  ;;  %v86_v55 = vld [vmem:[%s6026_s28 + $0x38] sm:$0xff] }
 0x339   :  { %v650_v9 = vpack.c.bf16 %v638_v40, %v637_v8 }
 0x33e   :  { %3796 = vmatmul.mubr.msk.bf16.gmra.mxu1 %vm253_vm2, %v646_v4  ;;  %v91_v4 = vld [vmem:[%s6026_s28 + $0x60] sm:$0xff] }
 0x33f   :  { %3799 = vmatprep.mubr.msk.bf16.mxu1 %vm253_vm2, %v647_v6 }
 0x346   :  { %3800 = vmatmul.mubr.msk.bf16.gmra.mxu1 %vm253_vm2, %v648_v43 }
 0x347   :  { %3803 = vmatprep.mubr.msk.bf16.mxu1 %vm253_vm2, %v649_v33  ;;  %v93_v33 = vld [vmem:[%s6026_s28 + $0x70] sm:$0xff] }
 0x34e   :  { %3804 = vmatmul.mubr.msk.bf16.gmra.mxu1 %vm253_vm2, %v650_v9 }
 0x34f   :  { %3841 = vmatprep.mubr.msk.bf16.mxu1 %vm4397_vm0, %v4396_v1 }
 0x3e6   :  { %v3785_v13 = vpop.f32.mrf.mxu1 }
 0x3e7   :  { %v4815_v5 = vadd.f32 %v3785_v13, %v81_v29  ;;  %v92_v13 = vld [vmem:[%s6026_s28 + $0x68] sm:$0xff] }
 0x3e8   :  { %v733_v34 = vpop.f32.mrf.mxu1 }
 0x3e9   :  { %v4810_v43 = vadd.f32 %v733_v34, %v79_v18  ;;  %v835_v41 = vsel %vm828_vm13, %v4815_v5, -inf }
 0x3ea   :  { %v3786_v11 = vpop.f32.mrf.mxu1 }
 0x3eb   :  { %v829_v21 = vsel %vm828_vm13, %v4810_v43, -inf  ;;  %v4827_v37 = vadd.f32 %v3786_v11, %v82_v22  ;;  %v94_v11 = vld [vmem:[%s6026_s28 + $0x78] sm:$0xff] }
 0x3ec   :  { %v736_v24 = vpop.f32.mrf.mxu1  ;;  %830 = vmax.xlane.f32.xlu0 %v829_v21 }
 0x3ed   :  { %v4822_v26 = vadd.f32 %v736_v24, %v80_v19  ;;  %v838_v52 = vsel %vm828_vm13, %v4827_v37, -inf  ;;  %v95_v24 = vld [vmem:[%s6026_s28 + $0x80] sm:$0xff] }
 0x3ee   :  { %v3789_v31 = vpop.f32.mrf.mxu1 }
 0x3ef   :  { %v832_v39 = vsel %vm828_vm13, %v4822_v26, -inf  ;;  %v4841_v51 = vadd.f32 %v3789_v31, %v85_v45 }
 0x3f0   :  { %v749_v46 = vpop.f32.mrf.mxu1  ;;  %833 = vmax.xlane.f32.xlu1 %v832_v39  ;;  %836 = vmax.xlane.f32.xlu0 %v835_v41  ;;  %v97_v41 = vld [vmem:[%s6026_s28 + $0x90] sm:$0xff] }
 0x3f1   :  { %v4836_v48 = vadd.f32 %v749_v46, %v83_v36  ;;  %v847_v60 = vsel %vm828_vm13, %v4841_v51, -inf }
 0x3f2   :  { %v3790_v44 = vpop.f32.mrf.mxu1 }
 0x3f3   :  { %v841_v53 = vsel %vm828_vm13, %v4836_v48, -inf  ;;  %v4855_v38 = vadd.f32 %v3790_v44, %v86_v55 }
 0x3f4   :  { %v752_v54 = vpop.f32.mrf.mxu1  ;;  %839 = vmax.xlane.f32.xlu1 %v838_v52  ;;  %842 = vmax.xlane.f32.xlu0 %v841_v53 }
 0x3f5   :  { %v4850_v56 = vadd.f32 %v752_v54, %v84_v50  ;;  %v850_v59 = vsel %vm828_vm13, %v4855_v38, -inf  ;;  %v96_v50 = vld [vmem:[%s6026_s28 + $0x88] sm:$0xff]  ;;  %v98_v54 = vld [vmem:[%s6026_s28 + $0x98] sm:$0xff] }
 0x3f6   :  { %v3793_v57 = vpop.f32.mrf.mxu1 }
 0x3f7   :  { %v844_v49 = vsel %vm828_vm13, %v4850_v56, -inf  ;;  %v4869_v63 = vadd.f32 %v3793_v57, %v89_v23 }
 0x3f8   :  { %v765_v61 = vpop.f32.mrf.mxu1  ;;  %845 = vmax.xlane.f32.xlu1 %v844_v49  ;;  %848 = vmax.xlane.f32.xlu0 %v847_v60  ;;  %v99_v60 = vld [vmem:[%s6026_s28 + $0xa0] sm:$0xff] }
 0x3f9   :  { %v4864_v3 = vadd.f32 %v765_v61, %v87_v58  ;;  %v859_v28 = vsel %vm828_vm13, %v4869_v63, -inf }
 0x3fa   :  { %v3794_v47 = vpop.f32.mrf.mxu1 }
 0x3fb   :  { %v853_v0 = vsel %vm828_vm13, %v4864_v3, -inf  ;;  %v4883_v6 = vadd.f32 %v3794_v47, %v90_v2 }
 0x3fc   :  { %v768_v27 = vpop.f32.mrf.mxu1  ;;  %851 = vmax.xlane.f32.xlu1 %v850_v59  ;;  %854 = vmax.xlane.f32.xlu0 %v853_v0 }
 0x3fd   :  { %v4878_v32 = vadd.f32 %v768_v27, %v88_v62  ;;  %v862_v29 = vsel %vm828_vm13, %v4883_v6, -inf  ;;  %v101_v62 = vld [vmem:[%s6026_s28 + $0xb0] sm:$0xff]  ;;  %v100_v27 = vld [vmem:[%s6026_s28 + $0xa8] sm:$0xff] }
 0x3fe   :  { %v3797_v42 = vpop.f32.mrf.mxu1 }
 0x3ff   :  { %v856_v7 = vsel %vm828_vm13, %v4878_v32, -inf  ;;  %v4897_v18 = vadd.f32 %v3797_v42, %v93_v33 }
 0x400   :  { %v781_v40 = vpop.f32.mrf.mxu1  ;;  %857 = vmax.xlane.f32.xlu1 %v856_v7  ;;  %860 = vmax.xlane.f32.xlu0 %v859_v28  ;;  %v102_v28 = vld [vmem:[%s6026_s28 + $0xb8] sm:$0xff] }
 0x401   :  { %v4892_v8 = vadd.f32 %v781_v40, %v91_v4  ;;  %v871_v39 = vsel %vm828_vm13, %v4897_v18, -inf }
 0x402   :  { %v3798_v9 = vpop.f32.mrf.mxu1 }
 0x403   :  { %v865_v34 = vsel %vm828_vm13, %v4892_v8, -inf  ;;  %v4911_v31 = vadd.f32 %v3798_v9, %v94_v11 }
 0x404   :  { %v784_v19 = vpop.f32.mrf.mxu1  ;;  %863 = vmax.xlane.f32.xlu1 %v862_v29  ;;  %866 = vmax.xlane.f32.xlu0 %v865_v34 }
 0x405   :  { %v4906_v21 = vadd.f32 %v784_v19, %v92_v13  ;;  %v874_v53 = vsel %vm828_vm13, %v4911_v31, -inf }
 0x406   :  { %v3801_v22 = vpop.f32.mrf.mxu1 }
 0x407   :  { %v868_v36 = vsel %vm828_vm13, %v4906_v21, -inf  ;;  %v4925_v52 = vadd.f32 %v3801_v22, %v97_v41 }
 0x408   :  { %v797_v45 = vpop.f32.mrf.mxu1  ;;  %869 = vmax.xlane.f32.xlu1 %v868_v36  ;;  %872 = vmax.xlane.f32.xlu0 %v871_v39 }
 0x409   :  { %v4920_v46 = vadd.f32 %v797_v45, %v95_v24  ;;  %v883_v47 = vsel %vm828_vm13, %v4925_v52, -inf }
 0x40a   :  { %v3802_v44 = vpop.f32.mrf.mxu1 }
 0x40b   :  { %v877_v55 = vsel %vm828_vm13, %v4920_v46, -inf  ;;  %v4939_v23 = vadd.f32 %v3802_v44, %v98_v54 }
 0x40c   :  { %v800_v57 = vpop.f32.mrf.mxu1  ;;  %875 = vmax.xlane.f32.xlu1 %v874_v53  ;;  %878 = vmax.xlane.f32.xlu0 %v877_v55 }
 0x40d   :  { %v4934_v58 = vadd.f32 %v800_v57, %v96_v50  ;;  %v886_v4 = vsel %vm828_vm13, %v4939_v23, -inf }
 0x40e   :  { %v3805_v49 = vpop.f32.mrf.mxu1 }
 0x40f   :  { %v880_v61 = vsel %vm828_vm13, %v4934_v58, -inf  ;;  %v4953_v42 = vadd.f32 %v3805_v49, %v101_v62 }
 0x410   :  { %v813_v59 = vpop.f32.mrf.mxu1  ;;  %881 = vmax.xlane.f32.xlu1 %v880_v61  ;;  %884 = vmax.xlane.f32.xlu0 %v883_v47 }
 0x411   :  { %v4948_v0 = vadd.f32 %v813_v59, %v99_v60  ;;  %v895_v29 = vsel %vm828_vm13, %v4953_v42, -inf }
 0x412   :  { %v3806_v2 = vpop.f32.mrf.mxu1 }
 0x413   :  { %v889_v7 = vsel %vm828_vm13, %v4948_v0, -inf  ;;  %v4964_v9 = vadd.f32 %v3806_v2, %v102_v28 }
 0x414   :  { %v816_v33 = vpop.f32.mrf.mxu1  ;;  %887 = vmax.xlane.f32.xlu1 %v886_v4  ;;  %890 = vmax.xlane.f32.xlu0 %v889_v7 }
 0x415   :  { %v4962_v40 = vadd.f32 %v816_v33, %v100_v27  ;;  %v898_v34 = vsel %vm828_vm13, %v4964_v9, -inf }
 0x417   :  { %v892_v13 = vsel %vm828_vm13, %v4962_v40, -inf }
 0x418   :  { %893 = vmax.xlane.f32.xlu1 %v892_v13  ;;  %896 = vmax.xlane.f32.xlu0 %v895_v29 }
 0x41c   :  { %899 = vmax.xlane.f32.xlu1 %v898_v34 }
 0x475   :  { %v831_v11 = vpop.xlane.xlu0 %830 }
 0x476   :  { %v901_v19 = vsub.f32 %v4810_v43, %v831_v11 }
 0x478   :  { %v925_v22 = vmul.f32 1.442695, %v901_v19 }
 0x479   :  { %v834_v24 = vpop.xlane.xlu1 %833  ;;  %v837_v36 = vpop.xlane.xlu0 %836 }
 0x47a   :  { %4122 = vpow2.f32 %v925_v22  ;;  %v902_v39 = vsub.f32 %v4822_v26, %v834_v24  ;;  %v903_v41 = vsub.f32 %v4815_v5, %v837_v36 }
 0x47c   :  { %v927_v45 = vmul.f32 1.442695, %v902_v39  ;;  %v929_v44 = vmul.f32 1.442695, %v903_v41 }
 0x47d   :  { %v840_v50 = vpop.xlane.xlu1 %839  ;;  %v843_v53 = vpop.xlane.xlu0 %842 }
 0x47e   :  { %4124 = vpow2.f32 %v927_v45  ;;  %v904_v55 = vsub.f32 %v4827_v37, %v840_v50  ;;  %v905_v54 = vsub.f32 %v4836_v48, %v843_v53 }
 0x47f   :  { %4126 = vpow2.f32 %v929_v44 }
 0x480   :  { %v931_v57 = vmul.f32 1.442695, %v904_v55  ;;  %v933_v43 = vmul.f32 1.442695, %v905_v54 }
 0x481   :  { %v846_v49 = vpop.xlane.xlu1 %845  ;;  %v849_v60 = vpop.xlane.xlu0 %848 }
 0x482   :  { %4128 = vpow2.f32 %v931_v57  ;;  %v906_v61 = vsub.f32 %v4850_v56, %v846_v49  ;;  %v907_v26 = vsub.f32 %v4841_v51, %v849_v60 }
 0x483   :  { %4130 = vpow2.f32 %v933_v43 }
 0x484   :  { %v935_v5 = vmul.f32 1.442695, %v906_v61  ;;  %v937_v47 = vmul.f32 1.442695, %v907_v26 }
 0x485   :  { %v852_v62 = vpop.xlane.xlu1 %851  ;;  %v855_v59 = vpop.xlane.xlu0 %854 }
 0x486   :  { %4132 = vpow2.f32 %v935_v5  ;;  %v908_v37 = vsub.f32 %v4855_v38, %v852_v62  ;;  %v909_v48 = vsub.f32 %v4864_v3, %v855_v59 }
 0x487   :  { %v4981_v2 = vpop.eup %4122  ;;  %4134 = vpow2.f32 %v937_v47 }
 0x488   :  { %v939_v27 = vmul.f32 1.442695, %v908_v37  ;;  %v941_v4 = vmul.f32 1.442695, %v909_v48  ;;  %v973_v56 = vsel %vm828_vm13, %v4981_v2, 0.0 }
 0x489   :  { %v858_v7 = vpop.xlane.xlu1 %857  ;;  %974 = vadd.xlane.f32.xlu0 %v973_v56  ;;  %v861_v51 = vpop.xlane.xlu0 %860 }
 0x48a   :  { %4136 = vpow2.f32 %v939_v27  ;;  %v910_v28 = vsub.f32 %v4878_v32, %v858_v7  ;;  %v911_v33 = vsub.f32 %v4869_v63, %v861_v51 }
 0x48b   :  { %v4987_v13 = vpop.eup %4124  ;;  %4138 = vpow2.f32 %v941_v4 }
 0x48c   :  { %v4989_v38 = vpop.eup %4126  ;;  %v943_v3 = vmul.f32 1.442695, %v910_v28  ;;  %v945_v29 = vmul.f32 1.442695, %v911_v33  ;;  %v976_v34 = vsel %vm828_vm13, %v4987_v13, 0.0 }
 0x48d   :  { %977 = vadd.xlane.f32.xlu1 %v976_v34  ;;  %v864_v11 = vpop.xlane.xlu1 %863  ;;  %v979_v19 = vsel %vm828_vm13, %v4989_v38, 0.0  ;;  %v867_v22 = vpop.xlane.xlu0 %866 }
 0x48e   :  { %4140 = vpow2.f32 %v943_v3  ;;  %v912_v32 = vsub.f32 %v4883_v6, %v864_v11  ;;  %980 = vadd.xlane.f32.xlu0 %v979_v19  ;;  %v913_v63 = vsub.f32 %v4892_v8, %v867_v22 }
 0x48f   :  { %v4997_v24 = vpop.eup %4128  ;;  %4142 = vpow2.f32 %v945_v29 }
 0x490   :  { %v4999_v36 = vpop.eup %4130  ;;  %v947_v39 = vmul.f32 1.442695, %v912_v32  ;;  %v949_v41 = vmul.f32 1.442695, %v913_v63  ;;  %v982_v45 = vsel %vm828_vm13, %v4997_v24, 0.0 }
 0x491   :  { %983 = vadd.xlane.f32.xlu1 %v982_v45  ;;  %v870_v44 = vpop.xlane.xlu1 %869  ;;  %v985_v50 = vsel %vm828_vm13, %v4999_v36, 0.0  ;;  %v873_v53 = vpop.xlane.xlu0 %872 }
 0x492   :  { %4144 = vpow2.f32 %v947_v39  ;;  %v914_v6 = vsub.f32 %v4906_v21, %v870_v44  ;;  %986 = vadd.xlane.f32.xlu0 %v985_v50  ;;  %v915_v8 = vsub.f32 %v4897_v18, %v873_v53 }
 0x493   :  { %v5007_v55 = vpop.eup %4132  ;;  %4146 = vpow2.f32 %v949_v41 }
 0x494   :  { %v5009_v54 = vpop.eup %4134  ;;  %v951_v57 = vmul.f32 1.442695, %v914_v6  ;;  %v953_v43 = vmul.f32 1.442695, %v915_v8  ;;  %v988_v49 = vsel %vm828_vm13, %v5007_v55, 0.0 }
 0x495   :  { %989 = vadd.xlane.f32.xlu1 %v988_v49  ;;  %v876_v60 = vpop.xlane.xlu1 %875  ;;  %v991_v61 = vsel %vm828_vm13, %v5009_v54, 0.0  ;;  %v879_v26 = vpop.xlane.xlu0 %878 }
 0x496   :  { %4148 = vpow2.f32 %v951_v57  ;;  %v916_v21 = vsub.f32 %v4911_v31, %v876_v60  ;;  %992 = vadd.xlane.f32.xlu0 %v991_v61  ;;  %v917_v18 = vsub.f32 %v4920_v46, %v879_v26 }
 0x497   :  { %v5017_v5 = vpop.eup %4136  ;;  %4150 = vpow2.f32 %v953_v43 }
 0x498   :  { %v5019_v47 = vpop.eup %4138  ;;  %v955_v62 = vmul.f32 1.442695, %v916_v21  ;;  %v957_v59 = vmul.f32 1.442695, %v917_v18  ;;  %v994_v37 = vsel %vm828_vm13, %v5017_v5, 0.0 }
 0x499   :  { %995 = vadd.xlane.f32.xlu1 %v994_v37  ;;  %v882_v48 = vpop.xlane.xlu1 %881  ;;  %v997_v27 = vsel %vm828_vm13, %v5019_v47, 0.0  ;;  %v885_v4 = vpop.xlane.xlu0 %884 }
 0x49a   :  { %4152 = vpow2.f32 %v955_v62  ;;  %v918_v31 = vsub.f32 %v4934_v58, %v882_v48  ;;  %998 = vadd.xlane.f32.xlu0 %v997_v27  ;;  %v919_v46 = vsub.f32 %v4925_v52, %v885_v4 }
 0x49b   :  { %v5027_v56 = vpop.eup %4140  ;;  %4154 = vpow2.f32 %v957_v59 }
 0x49c   :  { %v5029_v7 = vpop.eup %4142  ;;  %v959_v51 = vmul.f32 1.442695, %v918_v31  ;;  %v961_v28 = vmul.f32 1.442695, %v919_v46  ;;  %v1000_v33 = vsel %vm828_vm13, %v5027_v56, 0.0 }
 0x49d   :  { %1001 = vadd.xlane.f32.xlu1 %v1000_v33  ;;  %v888_v3 = vpop.xlane.xlu1 %887  ;;  %v1003_v29 = vsel %vm828_vm13, %v5029_v7, 0.0  ;;  %v891_v34 = vpop.xlane.xlu0 %890 }
 0x49e   :  { %4156 = vpow2.f32 %v959_v51  ;;  %v920_v58 = vsub.f32 %v4939_v23, %v888_v3  ;;  %1004 = vadd.xlane.f32.xlu0 %v1003_v29  ;;  %v921_v52 = vsub.f32 %v4948_v0, %v891_v34  ;;  %v4085_v3 = vld [vmem:[%s5987_s12 + $0x8] sm:$0xff]  }
 0x49f   :  { %v5037_v11 = vpop.eup %4144  ;;  %4158 = vpow2.f32 %v961_v28  ;;  %3838 = vmatpush3.bf16.msra.mxu1 %v4085_v3 }
 0x4a0   :  { %v5039_v19 = vpop.eup %4146  ;;  %v963_v22 = vmul.f32 1.442695, %v920_v58  ;;  %v965_v32 = vmul.f32 1.442695, %v921_v52  ;;  %v1006_v63 = vsel %vm828_vm13, %v5037_v11, 0.0  ;;  %3839 = vmatprep.subr.bf16.mxu1 %v4396_v1 }
 0x4a1   :  { %1007 = vadd.xlane.f32.xlu1 %v1006_v63  ;;  %v894_v39 = vpop.xlane.xlu1 %893  ;;  %v1009_v41 = vsel %vm828_vm13, %v5039_v19, 0.0  ;;  %v897_v45 = vpop.xlane.xlu0 %896 }
 0x4a2   :  { %4160 = vpow2.f32 %v963_v22  ;;  %v922_v23 = vsub.f32 %v4962_v40, %v894_v39  ;;  %1010 = vadd.xlane.f32.xlu0 %v1009_v41  ;;  %v923_v0 = vsub.f32 %v4953_v42, %v897_v45 }
 0x4a3   :  { %v5047_v44 = vpop.eup %4148  ;;  %4162 = vpow2.f32 %v965_v32 }
 0x4a4   :  { %v5049_v50 = vpop.eup %4150  ;;  %v967_v53 = vmul.f32 1.442695, %v922_v23  ;;  %v969_v6 = vmul.f32 1.442695, %v923_v0  ;;  %v1012_v8 = vsel %vm828_vm13, %v5047_v44, 0.0 }
 0x4a5   :  { %1013 = vadd.xlane.f32.xlu1 %v1012_v8  ;;  %v900_v57 = vpop.xlane.xlu1 %899  ;;  %v1015_v43 = vsel %vm828_vm13, %v5049_v50, 0.0 }
 0x4a6   :  { %4164 = vpow2.f32 %v967_v53  ;;  %v924_v40 = vsub.f32 %v4964_v9, %v900_v57  ;;  %1016 = vadd.xlane.f32.xlu0 %v1015_v43 }
 0x4a7   :  { %v5056_v42 = vpop.eup %4152  ;;  %4166 = vpow2.f32 %v969_v6 }
 0x4a8   :  { %v5058_v49 = vpop.eup %4154  ;;  %v971_v60 = vmul.f32 1.442695, %v924_v40  ;;  %v1018_v61 = vsel %vm828_vm13, %v5056_v42, 0.0 }
 0x4a9   :  { %1019 = vadd.xlane.f32.xlu1 %v1018_v61  ;;  %v1021_v26 = vsel %vm828_vm13, %v5058_v49, 0.0 }
 0x4aa   :  { %4168 = vpow2.f32 %v971_v60  ;;  %1022 = vadd.xlane.f32.xlu0 %v1021_v26 }
 0x4ab   :  { %v5064_v21 = vpop.eup %4156 }
 0x4ac   :  { %v5066_v18 = vpop.eup %4158  ;;  %v1024_v9 = vsel %vm828_vm13, %v5064_v21, 0.0 }
 0x4ad   :  { %1025 = vadd.xlane.f32.xlu1 %v1024_v9  ;;  %v1027_v62 = vsel %vm828_vm13, %v5066_v18, 0.0 }
 0x4ae   :  { %1028 = vadd.xlane.f32.xlu0 %v1027_v62 }
 0x4af   :  { %v5072_v59 = vpop.eup %4160 }
 0x4b0   :  { %v5074_v37 = vpop.eup %4162  ;;  %v1030_v48 = vsel %vm828_vm13, %v5072_v59, 0.0 }
 0x4b1   :  { %1031 = vadd.xlane.f32.xlu1 %v1030_v48  ;;  %v1033_v27 = vsel %vm828_vm13, %v5074_v37, 0.0 }
 0x4b2   :  { %1034 = vadd.xlane.f32.xlu0 %v1033_v27 }
 0x4b3   :  { %v5080_v4 = vpop.eup %4164 }
 0x4b4   :  { %v5082_v31 = vpop.eup %4166  ;;  %v1036_v46 = vsel %vm828_vm13, %v5080_v4, 0.0 }
 0x4b5   :  { %1037 = vadd.xlane.f32.xlu1 %v1036_v46  ;;  %v1039_v51 = vsel %vm828_vm13, %v5082_v31, 0.0 }
 0x4b6   :  { %1040 = vadd.xlane.f32.xlu0 %v1039_v51 }
 0x4b7   :  { %v5088_v28 = vpop.eup %4168 }
 0x4b8   :  { %v1042_v33 = vsel %vm828_vm13, %v5088_v28, 0.0 }
 0x4b9   :  { %1043 = vadd.xlane.f32.xlu1 %v1042_v33 }
 0x512   :  { %v975_v29 = vpop.xlane.xlu0 %974 }
 0x513   :  { %4170 = vrcp.f32 %v975_v29 }
 0x516   :  { %v978_v34 = vpop.xlane.xlu1 %977 }
 0x517   :  { %4172 = vrcp.f32 %v978_v34  ;;  %v981_v58 = vpop.xlane.xlu0 %980 }
 0x518   :  { %4174 = vrcp.f32 %v981_v58 }
 0x51a   :  { %v984_v52 = vpop.xlane.xlu1 %983 }
 0x51b   :  { %4176 = vrcp.f32 %v984_v52  ;;  %v987_v22 = vpop.xlane.xlu0 %986 }
 0x51c   :  { %4178 = vrcp.f32 %v987_v22 }
 0x51e   :  { %v990_v32 = vpop.xlane.xlu1 %989 }
 0x51f   :  { %4180 = vrcp.f32 %v990_v32  ;;  %v993_v63 = vpop.xlane.xlu0 %992 }
 0x520   :  { %4182 = vrcp.f32 %v993_v63  ;;  %v4171_v39 = vpop.eup %4170 }
 0x521   :  { %v1069_v0 = vmul.f32 %v4171_v39, %v4981_v2 }
 0x522   :  { %v996_v41 = vpop.xlane.xlu1 %995 }
 0x523   :  { %4184 = vrcp.f32 %v996_v41  ;;  %v999_v45 = vpop.xlane.xlu0 %998 }
 0x524   :  { %v4173_v23 = vpop.eup %4172  ;;  %4186 = vrcp.f32 %v999_v45 }
 0x525   :  { %v1070_v53 = vmul.f32 %v4173_v23, %v4987_v13  ;;  %v4175_v6 = vpop.eup %4174 }
 0x526   :  { %v1002_v8 = vpop.xlane.xlu1 %1001  ;;  %v1071_v60 = vmul.f32 %v4175_v6, %v4989_v38 }
 0x527   :  { %4188 = vrcp.f32 %v1002_v8  ;;  %v1005_v57 = vpop.xlane.xlu0 %1004  ;;  %v1093_v43 = vpack.c.bf16 %v1070_v53, %v1069_v0 }
 0x528   :  { %v4177_v40 = vpop.eup %4176  ;;  %4190 = vrcp.f32 %v1005_v57 }
 0x529   :  { %v1072_v61 = vmul.f32 %v4177_v40, %v4997_v24  ;;  %3813 = vmatprep.mubr.msk.bf16.mxu0 %vm828_vm13, %v1093_v43  ;;  %v4179_v26 = vpop.eup %4178 }
 0x52a   :  { %v1008_v9 = vpop.xlane.xlu1 %1007  ;;  %v1073_v13 = vmul.f32 %v4179_v26, %v4999_v36 }
 0x52b   :  { %4192 = vrcp.f32 %v1008_v9  ;;  %v1011_v62 = vpop.xlane.xlu0 %1010  ;;  %v1094_v2 = vpack.c.bf16 %v1072_v61, %v1071_v60 }
 0x52c   :  { %v4181_v48 = vpop.eup %4180  ;;  %4194 = vrcp.f32 %v1011_v62 }
 0x52d   :  { %3814 = vmatmul.mubr.msk.bf16.vlgmr.msra.gmra.mxu0 %vm828_vm13, %v1094_v2  ;;  %v1074_v27 = vmul.f32 %v4181_v48, %v5007_v55  ;;  %v4183_v46 = vpop.eup %4182 }
 0x52e   :  { %v1014_v38 = vpop.xlane.xlu1 %1013  ;;  %v1075_v3 = vmul.f32 %v4183_v46, %v5009_v54 }
 0x52f   :  { %4196 = vrcp.f32 %v1014_v38  ;;  %v1017_v24 = vpop.xlane.xlu0 %1016  ;;  %v1095_v51 = vpack.c.bf16 %v1074_v27, %v1073_v13 }
 0x530   :  { %v4185_v33 = vpop.eup %4184  ;;  %4198 = vrcp.f32 %v1017_v24 }
 0x531   :  { %3817 = vmatprep.mubr.msk.bf16.mxu0 %vm828_vm13, %v1095_v51  ;;  %v1076_v29 = vmul.f32 %v4185_v33, %v5017_v5  ;;  %v4187_v34 = vpop.eup %4186 }
 0x532   :  { %v1020_v58 = vpop.xlane.xlu1 %1019  ;;  %v1077_v55 = vmul.f32 %v4187_v34, %v5019_v47 }
 0x533   :  { %4200 = vrcp.f32 %v1020_v58  ;;  %v1023_v52 = vpop.xlane.xlu0 %1022  ;;  %v1096_v36 = vpack.c.bf16 %v1076_v29, %v1075_v3 }
 0x534   :  { %v4189_v22 = vpop.eup %4188  ;;  %4202 = vrcp.f32 %v1023_v52 }
 0x535   :  { %3818 = vmatmul.mubr.msk.bf16.gmra.mxu0 %vm828_vm13, %v1096_v36  ;;  %v1078_v32 = vmul.f32 %v4189_v22, %v5027_v56  ;;  %v4191_v63 = vpop.eup %4190 }
 0x536   :  { %v1026_v39 = vpop.xlane.xlu1 %1025  ;;  %v1079_v5 = vmul.f32 %v4191_v63, %v5029_v7 }
 0x537   :  { %4204 = vrcp.f32 %v1026_v39  ;;  %v1029_v41 = vpop.xlane.xlu0 %1028  ;;  %v1097_v54 = vpack.c.bf16 %v1078_v32, %v1077_v55 }
 0x538   :  { %v4193_v45 = vpop.eup %4192  ;;  %4206 = vrcp.f32 %v1029_v41 }
 0x539   :  { %3821 = vmatprep.mubr.msk.bf16.mxu0 %vm828_vm13, %v1097_v54  ;;  %v1080_v23 = vmul.f32 %v4193_v45, %v5037_v11  ;;  %v4195_v0 = vpop.eup %4194 }
 0x53a   :  { %v1032_v53 = vpop.xlane.xlu1 %1031  ;;  %v1081_v56 = vmul.f32 %v4195_v0, %v5039_v19 }
 0x53b   :  { %4208 = vrcp.f32 %v1032_v53  ;;  %v1035_v6 = vpop.xlane.xlu0 %1034  ;;  %v1098_v47 = vpack.c.bf16 %v1080_v23, %v1079_v5 }
 0x53c   :  { %v4197_v8 = vpop.eup %4196  ;;  %4210 = vrcp.f32 %v1035_v6 }
 0x53d   :  { %3822 = vmatmul.mubr.msk.bf16.gmra.mxu0 %vm828_vm13, %v1098_v47  ;;  %v1082_v57 = vmul.f32 %v4197_v8, %v5047_v44  ;;  %v4199_v43 = vpop.eup %4198 }
 0x53e   :  { %v1038_v40 = vpop.xlane.xlu1 %1037  ;;  %v1083_v11 = vmul.f32 %v4199_v43, %v5049_v50 }
 0x53f   :  { %4212 = vrcp.f32 %v1038_v40  ;;  %v1041_v60 = vpop.xlane.xlu0 %1040  ;;  %v1099_v7 = vpack.c.bf16 %v1082_v57, %v1081_v56 }
 0x540   :  { %v4201_v61 = vpop.eup %4200  ;;  %4214 = vrcp.f32 %v1041_v60 }
 0x541   :  { %3825 = vmatprep.mubr.msk.bf16.mxu0 %vm828_vm13, %v1099_v7  ;;  %v1084_v26 = vmul.f32 %v4201_v61, %v5056_v42  ;;  %v4203_v9 = vpop.eup %4202 }
 0x542   :  { %v1044_v62 = vpop.xlane.xlu1 %1043  ;;  %v1085_v44 = vmul.f32 %v4203_v9, %v5058_v49 }
 0x543   :  { %4216 = vrcp.f32 %v1044_v62  ;;  %v1100_v2 = vpack.c.bf16 %v1084_v26, %v1083_v11 }
 0x544   :  { %v4205_v19 = vpop.eup %4204 }
 0x545   :  { %3826 = vmatmul.mubr.msk.bf16.gmra.mxu0 %vm828_vm13, %v1100_v2  ;;  %v1086_v48 = vmul.f32 %v4205_v19, %v5064_v21  ;;  %v4207_v13 = vpop.eup %4206 }
 0x546   :  { %v1087_v50 = vmul.f32 %v4207_v13, %v5066_v18 }
 0x547   :  { %v1101_v27 = vpack.c.bf16 %v1086_v48, %v1085_v44 }
 0x548   :  { %v4209_v46 = vpop.eup %4208 }
 0x549   :  { %3829 = vmatprep.mubr.msk.bf16.mxu0 %vm828_vm13, %v1101_v27  ;;  %v1088_v42 = vmul.f32 %v4209_v46, %v5072_v59  ;;  %v4211_v38 = vpop.eup %4210  ;;  %v4086_v59 = vld [vmem:[%s5987_s12] sm:$0xff]  }
 0x54a   :  { %v1089_v33 = vmul.f32 %v4211_v38, %v5074_v37  ;;  %3840 = vmatpush3.bf16.msra.mxu1 %v4086_v59 }
 0x54b   :  { %v1102_v24 = vpack.c.bf16 %v1088_v42, %v1087_v50  ;;  %3869 = vmatprep.subr.bf16.mxu1 %v4396_v1 }
 0x54c   :  { %v4213_v51 = vpop.eup %4212 }
 0x54d   :  { %3830 = vmatmul.mubr.msk.bf16.gmra.mxu0 %vm828_vm13, %v1102_v24  ;;  %v1090_v49 = vmul.f32 %v4213_v51, %v5080_v4  ;;  %v4215_v3 = vpop.eup %4214 }
 0x54e   :  { %v1091_v34 = vmul.f32 %v4215_v3, %v5082_v31 }
 0x54f   :  { %v1103_v21 = vpack.c.bf16 %v1090_v49, %v1089_v33 }
 0x550   :  { %v4217_v29 = vpop.eup %4216 }
 0x551   :  { %3833 = vmatprep.mubr.msk.bf16.mxu0 %vm828_vm13, %v1103_v21  ;;  %v1092_v18 = vmul.f32 %v4217_v29, %v5088_v28 }
 0x553   :  { %v1104_v58 = vpack.c.bf16 %v1092_v18, %v1091_v34 }
 0x555   :  { %3834 = vmatmul.mubr.msk.bf16.gmra.mxu0 %vm828_vm13, %v1104_v58 }
 0x556   :  { %3857 = vmatprep.mubr.msk.bf16.mxu0 %vm4397_vm0, %v4396_v1 }
 0x5ed   :  { %v3815_v37 = vpop.f32.mrf.mxu0 }
 0x5ee   :  { %v1275_v50 = vmul.f32 %v3815_v37, %v4706_v12 }
 0x5ef   :  { %v1178_v4 = vpop.f32.mrf.mxu0 }
 0x5f0   :  { %v1273_v47 = vmul.f32 %v4706_v12, %v1178_v4 }
 0x5f1   :  { %v3816_v52 = vpop.f32.mrf.mxu0 }
 0x5f2   :  { %v1276_v42 = vmul.f32 %v3816_v52, %v4706_v12 }
 0x5f3   :  { %v1181_v36 = vpop.f32.mrf.mxu0 }
 0x5f4   :  { %v1274_v8 = vmul.f32 %v4706_v12, %v1181_v36 }
 0x5f5   :  { %v3819_v31 = vpop.f32.mrf.mxu0 }
 0x5f6   :  { %v1279_v0 = vmul.f32 %v3819_v31, %v4709_v14 }
 0x5f7   :  { %v1194_v22 = vpop.f32.mrf.mxu0 }
 0x5f8   :  { %v1285_v40 = vadd.f32 %v1279_v0, %v1273_v47  ;;  %v1277_v31 = vmul.f32 %v4706_v12, %v1194_v22 }
 0x5f9   :  { %v3820_v28 = vpop.f32.mrf.mxu0 }
 0x5fa   :  { %v1280_v53 = vmul.f32 %v3820_v28, %v4709_v14 }
 0x5fb   :  { %v1197_v55 = vpop.f32.mrf.mxu0 }
 0x5fc   :  { %v1286_v60 = vadd.f32 %v1280_v53, %v1274_v8  ;;  %v1278_v59 = vmul.f32 %v4706_v12, %v1197_v55  ;;  %v3445_v53 = vld [vmem:[%s5988_s13] ss:$0 sm:$0xff] }
 0x5fd   :  { %v3823_v32 = vpop.f32.mrf.mxu0 }
 0x5fe   :  { %v1283_v37 = vmul.f32 %v3823_v32, %v4709_v14 }
 0x5ff   :  { %v1210_v63 = vpop.f32.mrf.mxu0 }
 0x600   :  { %v1281_v48 = vmul.f32 %v4709_v14, %v1210_v63 }
 0x601   :  { %v3824_v39 = vpop.f32.mrf.mxu0 }
 0x602   :  { %v1287_v33 = vadd.f32 %v1281_v48, %v1275_v50  ;;  %v1284_v29 = vmul.f32 %v3824_v39, %v4709_v14 }
 0x603   :  { %v1213_v41 = vpop.f32.mrf.mxu0 }
 0x604   :  { %v1282_v13 = vmul.f32 %v4709_v14, %v1213_v41  ;;  %v1290_v28 = vadd.f32 %v1284_v29, %v1278_v59 }
 0x605   :  { %v3827_v54 = vpop.f32.mrf.mxu0 }
 0x606   :  { %v1293_v38 = vmul.f32 %v3827_v54, %v4712_v16  ;;  %v1288_v49 = vadd.f32 %v1282_v13, %v1276_v42  ;;  %v1289_v54 = vadd.f32 %v1283_v37, %v1277_v31 }
 0x607   :  { %v1226_v45 = vpop.f32.mrf.mxu0 }
 0x608   :  { %v1291_v56 = vmul.f32 %v4712_v16, %v1226_v45  ;;  %v1299_v34 = vadd.f32 %v1293_v38, %v1287_v33 }
 0x609   :  { %v3828_v5 = vpop.f32.mrf.mxu0 }
 0x60a   :  { %v1297_v11 = vadd.f32 %v1291_v56, %v1285_v40  ;;  %v1294_v24 = vmul.f32 %v3828_v5, %v4712_v16 }
 0x60b   :  { %v1229_v23 = vpop.f32.mrf.mxu0 }
 0x60c   :  { %v1292_v57 = vmul.f32 %v4712_v16, %v1229_v23  ;;  %v1300_v18 = vadd.f32 %v1294_v24, %v1288_v49  ;;  %v4087_v24 = vld [vmem:[%s5991_s16 + $0x8] sm:$0xff]  }
 0x60d   :  { %v3831_v6 = vpop.f32.mrf.mxu0  ;;  %3854 = vmatpush3.bf16.msra.mxu0 %v4087_v24 }
 0x60e   :  { %v1303_v7 = vmul.f32 %v3831_v6, %v4715_v17  ;;  %v1298_v26 = vadd.f32 %v1292_v57, %v1286_v60  ;;  %3855 = vmatprep.subr.bf16.mxu0 %v4396_v1 }
 0x60f   :  { %v1242_v43 = vpop.f32.mrf.mxu0 }
 0x610   :  { %v1309_v2 = vadd.f32 %v1303_v7, %v1297_v11  ;;  %v1295_v63 = vmul.f32 %v4712_v16, %v1242_v43 }
 0x611   :  { %v3832_v61 = vpop.f32.mrf.mxu0 }
 0x612   :  { %v1304_v9 = vmul.f32 %v3832_v61, %v4715_v17  ;;  %v1301_v55 = vadd.f32 %v1295_v63, %v1289_v54 }
 0x613   :  { %v1245_v62 = vpop.f32.mrf.mxu0 }
 0x614   :  { %v1310_v19 = vadd.f32 %v1304_v9, %v1298_v26  ;;  %v1296_v4 = vmul.f32 %v4712_v16, %v1245_v62 }
 0x615   :  { %v3835_v44 = vpop.f32.mrf.mxu0 }
 0x616   :  { %v1319_v27 = vpack.c.bf16 %v1310_v19, %v1309_v2  ;;  %v1302_v45 = vadd.f32 %v1296_v4, %v1290_v28  ;;  %v1307_v5 = vmul.f32 %v3835_v44, %v4715_v17 }
 0x617   :  { %v1258_v46 = vpop.f32.mrf.mxu0 }
 0x618   :  { %3842 = vmatmul.mubr.msk.bf16.vlgmr.msra.gmra.mxu1 %vm253_vm2, %v1319_v27  ;;  %v1305_v3 = vmul.f32 %v4715_v17, %v1258_v46  ;;  %v1313_v23 = vadd.f32 %v1307_v5, %v1301_v55 }
 0x619   :  { %v3836_v51 = vpop.f32.mrf.mxu0  ;;  %3845 = vmatprep.mubr.msk.bf16.mxu1 %vm4397_vm0, %v4396_v1 }
 0x61a   :  { %v1311_v52 = vadd.f32 %v1305_v3, %v1299_v34  ;;  %v1308_v41 = vmul.f32 %v3836_v51, %v4715_v17 }
 0x61b   :  { %v1261_v21 = vpop.f32.mrf.mxu0 }
 0x61c   :  { %v1306_v58 = vmul.f32 %v4715_v17, %v1261_v21  ;;  %v1314_v32 = vadd.f32 %v1308_v41, %v1302_v45 }
 0x61e   :  { %v1312_v36 = vadd.f32 %v1306_v58, %v1300_v18  ;;  %v1321_v0 = vpack.c.bf16 %v1314_v32, %v1313_v23 }
 0x620   :  { %v1320_v39 = vpack.c.bf16 %v1312_v36, %v1311_v52 }
 0x622   :  { %3846 = vmatmul.mubr.msk.bf16.gmra.mxu1 %vm253_vm2, %v1320_v39 }
 0x623   :  { %3849 = vmatprep.mubr.msk.bf16.mxu1 %vm4397_vm0, %v4396_v1 }
 0x62a   :  { %3850 = vmatmul.mubr.msk.bf16.gmra.mxu1 %vm253_vm2, %v1321_v0 }
 0x62b   :  { %3877 = vmatprep.mubr.msk.bf16.mxu1 %vm4397_vm0, %v4396_v1 }
 0x6d8   :  { %v1377_v22 = vpop.f32.mrf.mxu1 }
 0x6d9   :  { %v1400_v6 = vadd.f32 %v1377_v22, %v4567_v10 }
 0x6da   :  { %v3843_v47 = vpop.f32.mrf.mxu1 }
 0x6db   :  { %v5175_v8 = vadd.f32 %v3445_v53, %v1400_v6  ;;  %v4088_v47 = vld [vmem:[%s5991_s16] sm:$0xff]  }
 0x6dc   :  { %v1380_v56 = vpop.f32.mrf.mxu1  ;;  %3856 = vmatpush3.bf16.msra.mxu0 %v4088_v47 }
 0x6dd   :  { %v1401_v57 = vadd.f32 %v1380_v56, %v4574_v15  ;;  %v1421_v43 = vsel %vm253_vm2, %v5175_v8, 0.0  ;;  %3889 = vmatprep.subr.bf16.mxu0 %v4396_v1  ;;  %v4089_v56 = vld [vmem:[%s5993_s18 + $0x18] sm:$0xff]  }
 0x6de   :  { %1422 = vadd.xlane.f32.xlu0 %v1421_v43  ;;  %v3844_v40 = vpop.f32.mrf.mxu1  ;;  %3870 = vmatpush3.bf16.msra.mxu1 %v4089_v56 }
 0x6df   :  { %v5180_v60 = vadd.f32 %v3445_v53, %v1401_v57  ;;  %v4090_v57 = vld [vmem:[%s5993_s18 + $0x10] sm:$0xff]   ;;  %3871 = vmatprep.subr.bf16.mxu1 %v4396_v1 }
 0x6e1   :  { %v1424_v7 = vsel %vm253_vm2, %v5180_v60, 0.0 }
 0x6e2   :  { %1425 = vadd.xlane.f32.xlu1 %v1424_v7  ;;  %v1385_v61 = vpop.f32.mrf.mxu1  ;;  %3872 = vmatpush3.bf16.msra.mxu1 %v4090_v57 }
 0x6e3   :  { %v1402_v10 = vadd.f32 %v1385_v61, %v4581_v20  ;;  %3873 = vmatprep.subr.bf16.mxu1 %v4396_v1 }
 0x6e4   :  { %v3847_v11 = vpop.f32.mrf.mxu1 }
 0x6e5   :  { %v5185_v26 = vadd.f32 %v3445_v53, %v1402_v10 }
 0x6e6   :  { %v1388_v9 = vpop.f32.mrf.mxu1 }
 0x6e7   :  { %v1403_v15 = vadd.f32 %v1388_v9, %v4588_v25  ;;  %v1427_v62 = vsel %vm253_vm2, %v5185_v26, 0.0 }
 0x6e8   :  { %1428 = vadd.xlane.f32.xlu0 %v1427_v62  ;;  %v3848_v2 = vpop.f32.mrf.mxu1 }
 0x6e9   :  { %v5190_v19 = vadd.f32 %v3445_v53, %v1403_v15 }
 0x6ea   :  { %v1393_v44 = vpop.f32.mrf.mxu1 }
 0x6eb   :  { %v1404_v48 = vadd.f32 %v1393_v44, %v4595_v30  ;;  %v1430_v13 = vsel %vm253_vm2, %v5190_v19, 0.0 }
 0x6ec   :  { %1431 = vadd.xlane.f32.xlu1 %v1430_v13  ;;  %v3851_v20 = vpop.f32.mrf.mxu1 }
 0x6ed   :  { %v5195_v27 = vadd.f32 %v3445_v53, %v1404_v48 }
 0x6ee   :  { %v1396_v46 = vpop.f32.mrf.mxu1 }
 0x6ef   :  { %v1405_v25 = vadd.f32 %v1396_v46, %v4602_v35  ;;  %v1433_v50 = vsel %vm253_vm2, %v5195_v27, 0.0 }
 0x6f0   :  { %1434 = vadd.xlane.f32.xlu0 %v1433_v50  ;;  %v3852_v42 = vpop.f32.mrf.mxu1  ;;  %v3446_v50 = vld [vmem:[%s5989_s14] ss:$0 sm:$0xff] }
 0x6f1   :  { %v5200_v38 = vadd.f32 %v3445_v53, %v1405_v25 }
 0x6f3   :  { %v1436_v30 = vsel %vm253_vm2, %v5200_v38, 0.0 }
 0x6f4   :  { %1437 = vadd.xlane.f32.xlu1 %v1436_v30 }
 0x767   :  { %v1423_v51 = vpop.xlane.xlu0 %1422 }
 0x768   :  { %v1439_v35 = vmul.f32 0.03125, %v1423_v51 }
 0x76a   :  { %v1445_v33 = vsub.f32 %v5175_v8, %v1439_v35 }
 0x76b   :  { %v1426_v49 = vpop.xlane.xlu1 %1425 }
 0x76c   :  { %v1440_v3 = vmul.f32 0.03125, %v1426_v49  ;;  %v1451_v21 = vmul.f32 %v1445_v33, %v1445_v33 }
 0x76e   :  { %v5210_v29 = vsub.f32 %v5180_v60, %v1440_v3  ;;  %v1457_v34 = vsel %vm253_vm2, %v1451_v21, 0.0  ;;  %v3447_v3 = vld [vmem:[%s5990_s15] ss:$0 sm:$0xff] }
 0x76f   :  { %1458 = vadd.xlane.f32.xlu0 %v1457_v34 }
 0x770   :  { %v1452_v18 = vmul.f32 %v5210_v29, %v5210_v29 }
 0x771   :  { %v1429_v58 = vpop.xlane.xlu0 %1428 }
 0x772   :  { %v1441_v59 = vmul.f32 0.03125, %v1429_v58  ;;  %v1460_v37 = vsel %vm253_vm2, %v1452_v18, 0.0 }
 0x773   :  { %1461 = vadd.xlane.f32.xlu1 %v1460_v37 }
 0x774   :  { %v5217_v4 = vsub.f32 %v5185_v26, %v1441_v59 }
 0x775   :  { %v1432_v52 = vpop.xlane.xlu1 %1431 }
 0x776   :  { %v1442_v36 = vmul.f32 0.03125, %v1432_v52  ;;  %v1453_v31 = vmul.f32 %v5217_v4, %v5217_v4 }
 0x778   :  { %v5222_v28 = vsub.f32 %v5190_v19, %v1442_v36  ;;  %v1463_v63 = vsel %vm253_vm2, %v1453_v31, 0.0 }
 0x779   :  { %1464 = vadd.xlane.f32.xlu0 %v1463_v63  ;;  %v1435_v41 = vpop.xlane.xlu0 %1434 }
 0x77a   :  { %v1443_v39 = vmul.f32 0.03125, %v1435_v41  ;;  %v1454_v54 = vmul.f32 %v5222_v28, %v5222_v28 }
 0x77c   :  { %v5228_v45 = vsub.f32 %v5195_v27, %v1443_v39  ;;  %v1466_v5 = vsel %vm253_vm2, %v1454_v54, 0.0 }
 0x77d   :  { %1467 = vadd.xlane.f32.xlu1 %v1466_v5  ;;  %v1438_v55 = vpop.xlane.xlu1 %1437 }
 0x77e   :  { %v1444_v32 = vmul.f32 0.03125, %v1438_v55  ;;  %v1455_v23 = vmul.f32 %v5228_v45, %v5228_v45 }
 0x780   :  { %v5234_v0 = vsub.f32 %v5200_v38, %v1444_v32  ;;  %v1469_v22 = vsel %vm253_vm2, %v1455_v23, 0.0 }
 0x781   :  { %1470 = vadd.xlane.f32.xlu0 %v1469_v22 }
 0x782   :  { %v1456_v53 = vmul.f32 %v5234_v0, %v5234_v0 }
 0x784   :  { %v1472_v6 = vsel %vm253_vm2, %v1456_v53, 0.0 }
 0x785   :  { %1473 = vadd.xlane.f32.xlu1 %v1472_v6  ;;  %v3448_v6 = vld [vmem:[%s5992_s17] ss:$0 sm:$0xff] }
 0x7f8   :  { %v1459_v43 = vpop.xlane.xlu0 %1458 }
 0x7f9   :  { %v1475_v40 = vmul.f32 0.03125, %v1459_v43 }
 0x7fb   :  { %v1481_v7 = vadd.f32 1e-05, %v1475_v40 }
 0x7fc   :  { %v1462_v61 = vpop.xlane.xlu1 %1461 }
 0x7fd   :  { %4218 = vrsqrt.f32 %v1481_v7  ;;  %v1476_v10 = vmul.f32 0.03125, %v1462_v61 }
 0x7ff   :  { %v1482_v11 = vadd.f32 1e-05, %v1476_v10 }
 0x801   :  { %4220 = vrsqrt.f32 %v1482_v11 }
 0x802   :  { %v1465_v9 = vpop.xlane.xlu0 %1464 }
 0x803   :  { %v1477_v15 = vmul.f32 0.03125, %v1465_v9 }
 0x805   :  { %v1483_v62 = vadd.f32 1e-05, %v1477_v15 }
 0x806   :  { %v1468_v2 = vpop.xlane.xlu1 %1467 }
 0x807   :  { %4222 = vrsqrt.f32 %v1483_v62  ;;  %v1478_v44 = vmul.f32 0.03125, %v1468_v2 }
 0x809   :  { %v1484_v48 = vadd.f32 1e-05, %v1478_v44 }
 0x80a   :  { %v4219_v13 = vpop.eup %4218  ;;  %v1471_v20 = vpop.xlane.xlu0 %1470 }
 0x80b   :  { %v1493_v46 = vmul.f32 %v4219_v13, %v1445_v33  ;;  %4224 = vrsqrt.f32 %v1484_v48  ;;  %v1479_v25 = vmul.f32 0.03125, %v1471_v20 }
 0x80d   :  { %v1485_v42 = vadd.f32 1e-05, %v1479_v25  ;;  %v1505_v51 = vmul.f32 %v3446_v50, %v1493_v46 }
 0x80e   :  { %v4221_v30 = vpop.eup %4220  ;;  %v1474_v24 = vpop.xlane.xlu1 %1473 }
 0x80f   :  { %v1494_v35 = vmul.f32 %v4221_v30, %v5210_v29  ;;  %4226 = vrsqrt.f32 %v1485_v42  ;;  %v1480_v49 = vmul.f32 0.03125, %v1474_v24  ;;  %v1517_v34 = vadd.f32 %v3447_v3, %v1505_v51 }
 0x811   :  { %v1506_v21 = vmul.f32 %v3446_v50, %v1494_v35  ;;  %v1486_v33 = vadd.f32 1e-05, %v1480_v49 }
 0x813   :  { %4228 = vrsqrt.f32 %v1486_v33  ;;  %v1518_v18 = vadd.f32 %v3447_v3, %v1506_v21  ;;  %v3461_v33 = vld [vmem:[%s5994_s19] ss:$0 sm:$0xff] }
 0x814   :  { %v4223_v58 = vpop.eup %4222 }
 0x815   :  { %v1527_v59 = vpack.c.bf16 %v1518_v18, %v1517_v34  ;;  %v1495_v37 = vmul.f32 %v4223_v58, %v5217_v4 }
 0x817   :  { %3858 = vmatmul.mubr.msk.bf16.vlgmr.msra.gmra.mxu0 %vm253_vm2, %v1527_v59  ;;  %v1507_v36 = vmul.f32 %v3446_v50, %v1495_v37 }
 0x818   :  { %v4225_v52 = vpop.eup %4224  ;;  %3861 = vmatprep.mubr.msk.bf16.mxu0 %vm4397_vm0, %v4396_v1 }
 0x819   :  { %v1496_v29 = vmul.f32 %v4225_v52, %v5222_v28  ;;  %v1519_v41 = vadd.f32 %v3447_v3, %v1507_v36 }
 0x81b   :  { %v1508_v31 = vmul.f32 %v3446_v50, %v1496_v29 }
 0x81c   :  { %v4227_v63 = vpop.eup %4226 }
 0x81d   :  { %v1520_v39 = vadd.f32 %v3447_v3, %v1508_v31  ;;  %v1497_v54 = vmul.f32 %v4227_v63, %v5228_v45  ;;  %v4091_v45 = vld [vmem:[%s5993_s18 + $0x8] sm:$0xff]  }
 0x81e   :  { %3874 = vmatpush3.bf16.msra.mxu1 %v4091_v45 }
 0x81f   :  { %v1528_v5 = vpack.c.bf16 %v1520_v39, %v1519_v41  ;;  %v1509_v32 = vmul.f32 %v3446_v50, %v1497_v54  ;;  %3875 = vmatprep.subr.bf16.mxu1 %v4396_v1 }
 0x820   :  { %v4229_v55 = vpop.eup %4228 }
 0x821   :  { %3862 = vmatmul.mubr.msk.bf16.gmra.mxu0 %vm253_vm2, %v1528_v5  ;;  %v1498_v4 = vmul.f32 %v4229_v55, %v5234_v0  ;;  %v1521_v22 = vadd.f32 %v3447_v3, %v1509_v32  ;;  %v4092_v0 = vld [vmem:[%s5993_s18] sm:$0xff]  }
 0x822   :  { %3865 = vmatprep.mubr.msk.bf16.mxu0 %vm4397_vm0, %v4396_v1  ;;  %3876 = vmatpush3.bf16.msra.mxu1 %v4092_v0 }
 0x823   :  { %v1510_v23 = vmul.f32 %v3446_v50, %v1498_v4  ;;  %3905 = vmatprep.subr.bf16.mxu1 %v4396_v1 }
 0x825   :  { %v1522_v28 = vadd.f32 %v3447_v3, %v1510_v23 }
 0x827   :  { %v1529_v53 = vpack.c.bf16 %v1522_v28, %v1521_v22 }
 0x829   :  { %3866 = vmatmul.mubr.msk.bf16.gmra.mxu0 %vm253_vm2, %v1529_v53 }
 0x82a   :  { %3893 = vmatprep.mubr.msk.bf16.mxu0 %vm4397_vm0, %v4396_v1 }
 0x8d7   :  { %v1592_v47 = vpop.f32.mrf.mxu0 }
 0x8d8   :  { %v1593_v57 = vadd.f32 %v3448_v6, %v1592_v47 }
 0x8d9   :  { %v3859_v56 = vpop.f32.mrf.mxu0 }
 0x8da   :  { %v1615_v61 = vmax.f32 %v1593_v57, 0.0 }
 0x8db   :  { %v1595_v43 = vpop.f32.mrf.mxu0 }
 0x8dc   :  { %v1596_v40 = vadd.f32 %v3448_v6, %v1595_v43 }
 0x8dd   :  { %v3860_v7 = vpop.f32.mrf.mxu0 }
 0x8de   :  { %v1616_v10 = vmax.f32 %v1596_v40, 0.0 }
 0x8e0   :  { %v1629_v11 = vpack.c.bf16 %v1616_v10, %v1615_v61 }
 0x8e1   :  { %v1600_v9 = vpop.f32.mrf.mxu0 }
 0x8e2   :  { %3878 = vmatmul.mubr.msk.bf16.vlgmr.msra.gmra.mxu1 %vm184_vm1, %v1629_v11  ;;  %v1601_v62 = vadd.f32 %v3448_v6, %v1600_v9 }
 0x8e3   :  { %v3863_v15 = vpop.f32.mrf.mxu0  ;;  %3881 = vmatprep.mubr.msk.bf16.mxu1 %vm4397_vm0, %v4396_v1 }
 0x8e4   :  { %v1617_v13 = vmax.f32 %v1601_v62, 0.0 }
 0x8e5   :  { %v1603_v2 = vpop.f32.mrf.mxu0 }
 0x8e6   :  { %v1604_v44 = vadd.f32 %v3448_v6, %v1603_v2 }
 0x8e7   :  { %v3864_v48 = vpop.f32.mrf.mxu0 }
 0x8e8   :  { %v1618_v20 = vmax.f32 %v1604_v44, 0.0 }
 0x8e9   :  { %v1608_v46 = vpop.f32.mrf.mxu0 }
 0x8ea   :  { %v1630_v25 = vpack.c.bf16 %v1618_v20, %v1617_v13  ;;  %v1609_v42 = vadd.f32 %v3448_v6, %v1608_v46 }
 0x8eb   :  { %v3867_v50 = vpop.f32.mrf.mxu0 }
 0x8ec   :  { %3882 = vmatmul.mubr.msk.bf16.gmra.mxu1 %vm184_vm1, %v1630_v25  ;;  %v1619_v35 = vmax.f32 %v1609_v42, 0.0 }
 0x8ed   :  { %v1611_v30 = vpop.f32.mrf.mxu0  ;;  %3885 = vmatprep.mubr.msk.bf16.mxu1 %vm4397_vm0, %v4396_v1 }
 0x8ee   :  { %v1612_v24 = vadd.f32 %v3448_v6, %v1611_v30 }
 0x8ef   :  { %v3868_v51 = vpop.f32.mrf.mxu0 }
 0x8f0   :  { %v1620_v49 = vmax.f32 %v1612_v24, 0.0 }
 0x8f2   :  { %v1631_v3 = vpack.c.bf16 %v1620_v49, %v1619_v35 }
 0x8f4   :  { %3886 = vmatmul.mubr.msk.bf16.gmra.mxu1 %vm184_vm1, %v1631_v3 }
 0x8f5   :  { %3909 = vmatprep.mubr.msk.bf16.mxu1 %vm4397_vm0, %v4396_v1 }
 0x9a2   :  { %v1699_v21 = vpop.f32.mrf.mxu1 }
 0x9a3   :  { %v1722_v34 = vadd.f32 %v1699_v21, %v5175_v8 }
 0x9a4   :  { %v3879_v18 = vpop.f32.mrf.mxu1 }
 0x9a5   :  { %v5296_v58 = vadd.f32 %v3461_v33, %v1722_v34  ;;  %v4093_v34 = vld [vmem:[%s6024_s27 + $0x18] sm:$0xff]  }
 0x9a6   :  { %v1702_v59 = vpop.f32.mrf.mxu1  ;;  %v4095_v18 = vld [vmem:[%s6021_s26 + $0x18] sm:$0xff]   ;;  %3906 = vmatpush3.bf16.msra.mxu1 %v4093_v34 }
 0x9a7   :  { %v1723_v37 = vadd.f32 %v1702_v59, %v5180_v60  ;;  %v1745_v52 = vsel %vm253_vm2, %v5296_v58, 0.0  ;;  %v4094_v59 = vld [vmem:[%s6024_s27 + $0x10] sm:$0xff]   ;;  %3890 = vmatpush3.bf16.msra.mxu0 %v4095_v18  ;;  %3907 = vmatprep.subr.bf16.mxu1 %v4396_v1 }
 0x9a8   :  { %1746 = vadd.xlane.f32.xlu0 %v1745_v52  ;;  %v3880_v29 = vpop.f32.mrf.mxu1  ;;  %3891 = vmatprep.subr.bf16.mxu0 %v4396_v1 }
 0x9a9   :  { %v5301_v36 = vadd.f32 %v3461_v33, %v1723_v37  ;;  %v4096_v37 = vld [vmem:[%s6021_s26 + $0x10] sm:$0xff]   ;;  %s3374_s26 = sshll.u32 %s4398_s1, 4  ;;  %s3375_s26 = int_to_ptr.vmem [resolvable:$true] %s3374_s26 }
 0x9aa   :  { %3908 = vmatpush3.bf16.msra.mxu1 %v4094_v59  ;;  %p4379_p1 = scmp.lt.s32.totalorder %s3375_s26, %s3375_s26 }
 0x9ab   :  { %v1748_v31 = vsel %vm253_vm2, %v5301_v36, 0.0  ;;  %3892 = vmatpush3.bf16.msra.mxu0 %v4096_v37 }
 0x9ac   :  { %1749 = vadd.xlane.f32.xlu1 %v1748_v31  ;;  %v1707_v63 = vpop.f32.mrf.mxu1  ;;  %3921 = vmatprep.subr.bf16.mxu0 %v4396_v1 }
 0x9ad   :  { %v1724_v8 = vadd.f32 %v1707_v63, %v5185_v26 }
 0x9ae   :  { %v3883_v41 = vpop.f32.mrf.mxu1 }
 0x9af   :  { %v5306_v39 = vadd.f32 %v3461_v33, %v1724_v8 }
 0x9b0   :  { %v1710_v54 = vpop.f32.mrf.mxu1 }
 0x9b1   :  { %v1725_v60 = vadd.f32 %v1710_v54, %v5190_v19  ;;  %v1751_v5 = vsel %vm253_vm2, %v5306_v39, 0.0 }
 0x9b2   :  { %1752 = vadd.xlane.f32.xlu0 %v1751_v5  ;;  %v3884_v55 = vpop.f32.mrf.mxu1 }
 0x9b3   :  { %v5311_v4 = vadd.f32 %v3461_v33, %v1725_v60 }
 0x9b4   :  { %v1715_v32 = vpop.f32.mrf.mxu1 }
 0x9b5   :  { %v1726_v23 = vadd.f32 %v1715_v32, %v5195_v27  ;;  %v1754_v22 = vsel %vm253_vm2, %v5311_v4, 0.0 }
 0x9b6   :  { %1755 = vadd.xlane.f32.xlu1 %v1754_v22  ;;  %v3887_v26 = vpop.f32.mrf.mxu1 }
 0x9b7   :  { %v5316_v28 = vadd.f32 %v3461_v33, %v1726_v23 }
 0x9b8   :  { %v1718_v53 = vpop.f32.mrf.mxu1 }
 0x9b9   :  { %v1727_v19 = vadd.f32 %v1718_v53, %v5200_v38  ;;  %v1757_v45 = vsel %vm253_vm2, %v5316_v28, 0.0 }
 0x9ba   :  { %1758 = vadd.xlane.f32.xlu0 %v1757_v45  ;;  %v3888_v0 = vpop.f32.mrf.mxu1  ;;  %v3464_v45 = vld [vmem:[%s6022_s3 + $0x1] ss:$0 sm:$0xff] }
 0x9bb   :  { %v5321_v6 = vadd.f32 %v3461_v33, %v1727_v19 }
 0x9bd   :  { %v1760_v27 = vsel %vm253_vm2, %v5321_v6, 0.0 }
 0x9be   :  { %1761 = vadd.xlane.f32.xlu1 %v1760_v27 }
 0xa31   :  { %v1747_v47 = vpop.xlane.xlu0 %1746 }
 0xa32   :  { %v1763_v56 = vmul.f32 0.03125, %v1747_v47 }
 0xa34   :  { %v1769_v57 = vsub.f32 %v5296_v58, %v1763_v56 }
 0xa35   :  { %v1750_v43 = vpop.xlane.xlu1 %1749 }
 0xa36   :  { %v1764_v40 = vmul.f32 0.03125, %v1750_v43  ;;  %v1775_v7 = vmul.f32 %v1769_v57, %v1769_v57 }
 0xa38   :  { %v5327_v38 = vsub.f32 %v5301_v36, %v1764_v40  ;;  %v1781_v61 = vsel %vm253_vm2, %v1775_v7, 0.0  ;;  %v3465_v7 = vld [vmem:[%s6023_s4 + $0x1] ss:$0 sm:$0xff] }
 0xa39   :  { %1782 = vadd.xlane.f32.xlu0 %v1781_v61 }
 0xa3a   :  { %v1776_v10 = vmul.f32 %v5327_v38, %v5327_v38 }
 0xa3b   :  { %v1753_v11 = vpop.xlane.xlu0 %1752 }
 0xa3c   :  { %v1765_v9 = vmul.f32 0.03125, %v1753_v11  ;;  %v1784_v15 = vsel %vm253_vm2, %v1776_v10, 0.0 }
 0xa3d   :  { %1785 = vadd.xlane.f32.xlu1 %v1784_v15 }
 0xa3e   :  { %v5334_v62 = vsub.f32 %v5306_v39, %v1765_v9 }
 0xa3f   :  { %v1756_v2 = vpop.xlane.xlu1 %1755 }
 0xa40   :  { %v1766_v44 = vmul.f32 0.03125, %v1756_v2  ;;  %v1777_v48 = vmul.f32 %v5334_v62, %v5334_v62 }
 0xa42   :  { %v5339_v13 = vsub.f32 %v5311_v4, %v1766_v44  ;;  %v1787_v20 = vsel %vm253_vm2, %v1777_v48, 0.0  ;;  %v4097_v44 = vld [vmem:[%s5985_s10 + $0x18] sm:$0xff]  }
 0xa43   :  { %1788 = vadd.xlane.f32.xlu0 %v1787_v20  ;;  %v1759_v46 = vpop.xlane.xlu0 %1758 }
 0xa44   :  { %v1767_v25 = vmul.f32 0.03125, %v1759_v46  ;;  %v1778_v50 = vmul.f32 %v5339_v13, %v5339_v13 }
 0xa46   :  { %v5345_v42 = vsub.f32 %v5316_v28, %v1767_v25  ;;  %v1790_v30 = vsel %vm253_vm2, %v1778_v50, 0.0 }
 0xa47   :  { %1791 = vadd.xlane.f32.xlu1 %v1790_v30  ;;  %v1762_v24 = vpop.xlane.xlu1 %1761 }
 0xa48   :  { %v1768_v51 = vmul.f32 0.03125, %v1762_v24  ;;  %v1779_v35 = vmul.f32 %v5345_v42, %v5345_v42 }
 0xa4a   :  { %v5351_v49 = vsub.f32 %v5321_v6, %v1768_v51  ;;  %v1793_v3 = vsel %vm253_vm2, %v1779_v35, 0.0 }
 0xa4b   :  { %1794 = vadd.xlane.f32.xlu0 %v1793_v3 }
 0xa4c   :  { %v1780_v21 = vmul.f32 %v5351_v49, %v5351_v49 }
 0xa4e   :  { %v1796_v33 = vsel %vm253_vm2, %v1780_v21, 0.0 }
 0xa4f   :  { %1797 = vadd.xlane.f32.xlu1 %v1796_v33 }
 0xac2   :  { %v1783_v52 = vpop.xlane.xlu0 %1782 }
 0xac3   :  { %v1799_v29 = vmul.f32 0.03125, %v1783_v52 }
 0xac5   :  { %v1805_v31 = vadd.f32 1e-05, %v1799_v29 }
 0xac6   :  { %v1786_v63 = vpop.xlane.xlu1 %1785 }
 0xac7   :  { %4230 = vrsqrt.f32 %v1805_v31  ;;  %v1800_v8 = vmul.f32 0.03125, %v1786_v63 }
 0xac9   :  { %v1806_v41 = vadd.f32 1e-05, %v1800_v8 }
 0xacb   :  { %4232 = vrsqrt.f32 %v1806_v41 }
 0xacc   :  { %v1789_v54 = vpop.xlane.xlu0 %1788 }
 0xacd   :  { %v1801_v60 = vmul.f32 0.03125, %v1789_v54 }
 0xacf   :  { %v1807_v5 = vadd.f32 1e-05, %v1801_v60 }
 0xad0   :  { %v1792_v55 = vpop.xlane.xlu1 %1791 }
 0xad1   :  { %4234 = vrsqrt.f32 %v1807_v5  ;;  %v1802_v32 = vmul.f32 0.03125, %v1792_v55 }
 0xad3   :  { %v1808_v23 = vadd.f32 1e-05, %v1802_v32 }
 0xad4   :  { %v4231_v22 = vpop.eup %4230  ;;  %v1795_v26 = vpop.xlane.xlu0 %1794 }
 0xad5   :  { %v1817_v53 = vmul.f32 %v4231_v22, %v1769_v57  ;;  %4236 = vrsqrt.f32 %v1808_v23  ;;  %v1803_v19 = vmul.f32 0.03125, %v1795_v26 }
 0xad7   :  { %v1809_v0 = vadd.f32 1e-05, %v1803_v19  ;;  %v1829_v56 = vmul.f32 %v3464_v45, %v1817_v53 }
 0xad8   :  { %v4233_v27 = vpop.eup %4232  ;;  %v1798_v47 = vpop.xlane.xlu1 %1797 }
 0xad9   :  { %v1818_v43 = vmul.f32 %v4233_v27, %v5327_v38  ;;  %4238 = vrsqrt.f32 %v1809_v0  ;;  %v1804_v40 = vmul.f32 0.03125, %v1798_v47  ;;  %v1841_v10 = vadd.f32 %v3465_v7, %v1829_v56 }
 0xadb   :  { %v1830_v61 = vmul.f32 %v3464_v45, %v1818_v43  ;;  %v1810_v57 = vadd.f32 1e-05, %v1804_v40 }
 0xadd   :  { %4240 = vrsqrt.f32 %v1810_v57  ;;  %v1842_v11 = vadd.f32 %v3465_v7, %v1830_v61 }
 0xade   :  { %v4235_v9 = vpop.eup %4234 }
 0xadf   :  { %v1852_v15 = vpack.c.bf16 %v1842_v11, %v1841_v10  ;;  %v1819_v2 = vmul.f32 %v4235_v9, %v5334_v62  ;;  %v4098_v62 = vld [vmem:[%s5985_s10 + $0x10] sm:$0xff]  }
 0xae1   :  { %3894 = vmatmul.mubr.msk.bf16.vlgmr.msra.gmra.mxu0 %vm253_vm2, %v1852_v15  ;;  %3910 = vmatmul.mubr.msk.bf16.vlgmr.msra.gmra.mxu1 %vm253_vm2, %v1852_v15  ;;  %v1831_v20 = vmul.f32 %v3464_v45, %v1819_v2 }
 0xae2   :  { %v4237_v38 = vpop.eup %4236  ;;  %3897 = vmatprep.mubr.msk.bf16.mxu0 %vm4397_vm0, %v4396_v1  ;;  %3913 = vmatprep.mubr.msk.bf16.mxu1 %vm4397_vm0, %v4396_v1 }
 0xae3   :  { %v1820_v48 = vmul.f32 %v4237_v38, %v5339_v13  ;;  %3922 = vmatpush3.bf16.msra.mxu0 %v4097_v44  ;;  %v1843_v50 = vadd.f32 %v3465_v7, %v1831_v20 }
 0xae4   :  { %3923 = vmatprep.subr.bf16.mxu0 %v4396_v1 }
 0xae5   :  { %v1832_v46 = vmul.f32 %v3464_v45, %v1820_v48 }
 0xae6   :  { %v4239_v25 = vpop.eup %4238 }
 0xae7   :  { %v1844_v30 = vadd.f32 %v3465_v7, %v1832_v46  ;;  %v1821_v24 = vmul.f32 %v4239_v25, %v5345_v42  ;;  %3924 = vmatpush3.bf16.msra.mxu0 %v4098_v62 }
 0xae9   :  { %v1853_v51 = vpack.c.bf16 %v1844_v30, %v1843_v50  ;;  %v1833_v3 = vmul.f32 %v3464_v45, %v1821_v24 }
 0xaea   :  { %v4241_v35 = vpop.eup %4240 }
 0xaeb   :  { %3898 = vmatmul.mubr.msk.bf16.gmra.mxu0 %vm253_vm2, %v1853_v51  ;;  %3914 = vmatmul.mubr.msk.bf16.gmra.mxu1 %vm253_vm2, %v1853_v51  ;;  %v1822_v13 = vmul.f32 %v4241_v35, %v5351_v49  ;;  %v1845_v33 = vadd.f32 %v3465_v7, %v1833_v3  ;;  %v5416_v49 = vld [vmem:[%s6025_s0 + $0x1] ss:$0 sm:$0xff] }
 0xaec   :  { %3901 = vmatprep.mubr.msk.bf16.mxu0 %vm4397_vm0, %v4396_v1  ;;  %3917 = vmatprep.mubr.msk.bf16.mxu1 %vm4397_vm0, %v4396_v1 }
 0xaed   :  { %v1834_v21 = vmul.f32 %v3464_v45, %v1822_v13 }
 0xaef   :  { %v1846_v34 = vadd.f32 %v3465_v7, %v1834_v21 }
 0xaf1   :  { %v1854_v42 = vpack.c.bf16 %v1846_v34, %v1845_v33 }
 0xaf3   :  { %3902 = vmatmul.mubr.msk.bf16.gmra.mxu0 %vm253_vm2, %v1854_v42  ;;  %3918 = vmatmul.mubr.msk.bf16.gmra.mxu1 %vm253_vm2, %v1854_v42 }
 0xaf4   :  { %3925 = vmatprep.mubr.msk.bf16.mxu0 %vm4397_vm0, %v4396_v1 }
 0xafb   :  { %3926 = vmatmul.mubr.msk.bf16.vlgmr.msra.gmra.mxu0 %vm253_vm2, %v1852_v15  ;;  %v3482_v15 = vld [vmem:[%s5984_s9 + $0x1] ss:$0 sm:$0xff] }
 0xafc   :  { %3929 = vmatprep.mubr.msk.bf16.mxu0 %vm4397_vm0, %v4396_v1 }
 0xb03   :  { %3930 = vmatmul.mubr.msk.bf16.gmra.mxu0 %vm253_vm2, %v1853_v51 }
 0xb04   :  { %3933 = vmatprep.mubr.msk.bf16.mxu0 %vm4397_vm0, %v4396_v1 }
 0xb0b   :  { %3934 = vmatmul.mubr.msk.bf16.gmra.mxu0 %vm253_vm2, %v1854_v42 }
 0xba1   :  { %v1918_v18 = vpop.f32.mrf.mxu0  ;;  %v2006_v59 = vpop.f32.mrf.mxu1 }
 0xba2   :  { %v1919_v37 = vadd.f32 %v5416_v49, %v1918_v18  ;;  %v2007_v21 = vadd.f32 %v3482_v15, %v2006_v59 }
 0xba3   :  { %v3895_v52 = vpop.f32.mrf.mxu0  ;;  %v3911_v29 = vpop.f32.mrf.mxu1 }
 0xba4   :  { %v5419_v8 = vmul.f32 0.03125, %v1919_v37 }
 0xba5   :  { %v1921_v31 = vpop.f32.mrf.mxu0  ;;  %v2009_v63 = vpop.f32.mrf.mxu1 }
 0xba6   :  { %v1922_v41 = vadd.f32 %v5416_v49, %v1921_v31  ;;  %v2111_v55 = vmul.f32 %v4706_v12, %v5419_v8  ;;  %v5428_v32 = vmul.f32 %v4715_v17, %v5419_v8  ;;  %v2010_v13 = vadd.f32 %v3482_v15, %v2009_v63 }
 0xba7   :  { %v3896_v54 = vpop.f32.mrf.mxu0  ;;  %v3912_v60 = vpop.f32.mrf.mxu1 }
 0xba8   :  { %v5422_v5 = vmul.f32 0.03125, %v1922_v41  ;;  %v2147_v34 = vpack.c.bf16 %v2010_v13, %v2007_v21 }
 0xbaa   :  { %v2112_v23 = vmul.f32 %v4706_v12, %v5422_v5  ;;  %v5434_v22 = vmul.f32 %v4715_v17, %v5422_v5 }
 0xbab   :  { %v1926_v26 = vpop.f32.mrf.mxu0  ;;  %v2014_v53 = vpop.f32.mrf.mxu1 }
 0xbac   :  { %v2135_v0 = vpack.c.bf16 %v2112_v23, %v2111_v55  ;;  %v2144_v27 = vpack.c.bf16 %v5434_v22, %v5428_v32  ;;  %v2015_v25 = vadd.f32 %v3482_v15, %v2014_v53  ;;  %v1927_v31 = vadd.f32 %v5416_v49, %v1926_v26  ;;  %v4350_v32 = vld [vmem:[%s6026_s28] sm:$0xff] }
 0xbad   :  { %v3899_v19 = vpop.f32.mrf.mxu0  ;;  %v3915_v45 = vpop.f32.mrf.mxu1  ;;  %v2187_v23 = vsel %vm253_vm2, %v2147_v34, 0 }
 0xbae   :  { %3943 = vmatprep.mubr.msk.bf16.mxu1 %vm253_vm2, %v2135_v0  ;;  %v1943_v55 = vmul.f32 0.03125, %v1927_v31  ;;  %v3493_v19 = vld [vmem:[%s5986_s11 + $0x1] ss:$0 sm:$0xff] }
 0xbaf   :  { %v1929_v47 = vpop.f32.mrf.mxu0  ;;  %v2017_v56 = vpop.f32.mrf.mxu1 }
 0xbb0   :  { %v2018_v20 = vadd.f32 %v3482_v15, %v2017_v56  ;;  %v1930_v37 = vadd.f32 %v5416_v49, %v1929_v47 }
 0xbb1   :  { %v3900_v43 = vpop.f32.mrf.mxu0  ;;  %v3916_v40 = vpop.f32.mrf.mxu1 }
 0xbb2   :  { %v2148_v30 = vpack.c.bf16 %v2018_v20, %v2015_v25  ;;  %v1944_v54 = vmul.f32 0.03125, %v1930_v37  ;;  %v2113_v40 = vmul.f32 %v4706_v12, %v1943_v55  ;;  %v2117_v20 = vmul.f32 %v4709_v14, %v5419_v8 }
 0xbb3   :  { %v1934_v7 = vpop.f32.mrf.mxu0  ;;  %v2022_v61 = vpop.f32.mrf.mxu1 }
 0xbb4   :  { %v2023_v2 = vadd.f32 %v3482_v15, %v2022_v61  ;;  %v2190_v42 = vsel %vm253_vm2, %v2148_v30, 0  ;;  %v1935_v41 = vadd.f32 %v5416_v49, %v1934_v7  ;;  %v2114_v0 = vmul.f32 %v4706_v12, %v1944_v54 }
 0xbb5   :  { %v3903_v57 = vpop.f32.mrf.mxu0  ;;  %v3919_v10 = vpop.f32.mrf.mxu1 }
 0xbb6   :  { %v1945_v53 = vmul.f32 0.03125, %v1935_v41  ;;  %v2136_v10 = vpack.c.bf16 %v2114_v0, %v2113_v40 }
 0xbb7   :  { %v1937_v11 = vpop.f32.mrf.mxu0  ;;  %v2025_v9 = vpop.f32.mrf.mxu1 }
 0xbb8   :  { %v2026_v44 = vadd.f32 %v3482_v15, %v2025_v9  ;;  %v1938_v52 = vadd.f32 %v5416_v49, %v1937_v11  ;;  %v2115_v57 = vmul.f32 %v4706_v12, %v1945_v53 }
 0xbb9   :  { %v3904_v38 = vpop.f32.mrf.mxu0  ;;  %v3920_v48 = vpop.f32.mrf.mxu1 }
 0xbba   :  { %v2149_v62 = vpack.c.bf16 %v2026_v44, %v2023_v2  ;;  %v5451_v59 = vmul.f32 0.03125, %v1938_v52  ;;  %v2118_v44 = vmul.f32 %v4709_v14, %v5422_v5  ;;  %v2120_v48 = vmul.f32 %v4709_v14, %v1944_v54 }
 0xbbb   :  { %v2088_v46 = vpop.f32.mrf.mxu0 }
 0xbbc   :  { %4066 = vmatprep.subr.msk.bf16.mxu1 %vm253_vm2, %v2149_v62  ;;  %v2193_v24 = vsel %vm253_vm2, %v2149_v62, 0  ;;  %v2116_v56 = vmul.f32 %v4706_v12, %v5451_v59  ;;  %v2089_v2 = vadd.f32 %v3493_v19, %v2088_v46  ;;  %v2119_v62 = vmul.f32 %v4709_v14, %v1943_v55 }
 0xbbd   :  { %v3927_v50 = vpop.f32.mrf.mxu0  ;;  %3938 = vmatpush3.bf16.xpose.msra.mxu1 %v2193_v24  ;;  %v2138_v25 = vpack.c.bf16 %v2118_v44, %v2117_v20  ;;  %v2121_v24 = vmul.f32 %v4709_v14, %v1945_v53  ;;  %v2128_v21 = vmul.f32 %v4712_v16, %v5451_v59  ;;  %v2134_v52 = vmul.f32 %v4715_v17, %v5451_v59  ;;  %v4357_v44 = vld [vmem:[%s6026_s28 + $0x38] sm:$0xff] }
 0xbbe   :  { %4067 = vmatprep.subr.msk.bf16.mxu1 %vm253_vm2, %v2148_v30  ;;  %v2137_v15 = vpack.c.bf16 %v2116_v56, %v2115_v57  ;;  %v2139_v46 = vpack.c.bf16 %v2120_v48, %v2119_v62  ;;  %v2122_v50 = vmul.f32 %v4709_v14, %v5451_v59  ;;  %v2124_v30 = vmul.f32 %v4712_v16, %v5422_v5  ;;  %v4354_v56 = vld [vmem:[%s6026_s28 + $0x20] sm:$0xff] }
 0xbbf   :  { %v2091_v51 = vpop.f32.mrf.mxu0  ;;  %v2127_v5 = vmul.f32 %v4712_v16, %v1945_v53 }
 0xbc0   :  { %v2092_v11 = vadd.f32 %v3493_v19, %v2091_v51  ;;  %v2123_v51 = vmul.f32 %v4712_v16, %v5419_v8  ;;  %v2132_v8 = vmul.f32 %v4715_v17, %v1944_v54 }
 0xbc1   :  { %v3928_v35 = vpop.f32.mrf.mxu0 }
 0xbc2   :  { %v2600_v38 = vpack.c.bf16 %v2092_v11, %v2089_v2  ;;  %v2140_v35 = vpack.c.bf16 %v2122_v50, %v2121_v24  ;;  %v2141_v13 = vpack.c.bf16 %v2124_v30, %v2123_v51  ;;  %v4359_v30 = vld [vmem:[%s6026_s28 + $0x50] sm:$0xff] }
 0xbc3   :  { %v2096_v3 = vpop.f32.mrf.mxu0 }
 0xbc4   :  { %v2097_v7 = vadd.f32 %v3493_v19, %v2096_v3  ;;  %v2126_v3 = vmul.f32 %v4712_v16, %v1944_v54  ;;  %v4351_v54 = vld [vmem:[%s6026_s28 + $0x10] sm:$0xff] }
 0xbc5   :  { %v3931_v33 = vpop.f32.mrf.mxu0  ;;  %3940 = vmatpush3.bf16.xpose.msra.mxu1 %v2190_v42  ;;  %v2143_v42 = vpack.c.bf16 %v2128_v21, %v2127_v5  ;;  %v4361_v5 = vld [vmem:[%s6026_s28 + $0x58] sm:$0xff] }
 0xbc6   :  { %4068 = vmatprep.subr.msk.bf16.mxu1 %vm253_vm2, %v2147_v34  ;;  %v2125_v33 = vmul.f32 %v4712_v16, %v1943_v55 }
 0xbc7   :  { %v2099_v18 = vpop.f32.mrf.mxu0 }
 0xbc8   :  { %v2100_v26 = vadd.f32 %v3493_v19, %v2099_v18  ;;  %v2142_v34 = vpack.c.bf16 %v2126_v3, %v2125_v33  ;;  %v2131_v18 = vmul.f32 %v4715_v17, %v1943_v55  ;;  %v4360_v3 = vld [vmem:[%s6026_s28 + $0x48] sm:$0xff] }
 0xbc9   :  { %v3932_v29 = vpop.f32.mrf.mxu0 }
 0xbca   :  { %v2601_v9 = vpack.c.bf16 %v2100_v26, %v2097_v7  ;;  %v2145_v37 = vpack.c.bf16 %v2132_v8, %v2131_v18  ;;  %v2133_v29 = vmul.f32 %v4715_v17, %v1945_v53  ;;  %v4355_v7 = vld [vmem:[%s6026_s28 + $0x30] sm:$0xff] }
 0xbcb   :  { %v2104_v63 = vpop.f32.mrf.mxu0 }
 0xbcc   :  { %v2105_v47 = vadd.f32 %v3493_v19, %v2104_v63  ;;  %v2146_v31 = vpack.c.bf16 %v2134_v52, %v2133_v29 }
 0xbcd   :  { %v3935_v60 = vpop.f32.mrf.mxu0  ;;  %3942 = vmatpush3.bf16.xpose.msra.mxu1 %v2187_v23  ;;  %v4352_v23 = vld [vmem:[%s6026_s28 + $0x8] sm:$0xff] }
 0xbce   :  { %3997 = vmatprep.subr.bf16.mxu1 %v4396_v1 }
 0xbcf   :  { %v2107_v45 = vpop.f32.mrf.mxu0 }
 0xbd0   :  { %v2108_v49 = vadd.f32 %v3493_v19, %v2107_v45  ;;  %v4353_v45 = vld [vmem:[%s6026_s28 + $0x18] sm:$0xff] }
 0xbd1   :  { %v3936_v43 = vpop.f32.mrf.mxu0 }
 0xbd2   :  { %v2602_v61 = vpack.c.bf16 %v2108_v49, %v2105_v47 }
 0xbd4   :  { %3967 = vmatprep.subr.bf16.mxu0 %v2602_v61  ;;  %3944 = vmatmul.mubr.msk.bf16.vlgmr.msra.gmra.mxu1 %vm253_vm2, %v2136_v10 }
 0xbd5   :  { %3968 = vmatpush3.bf16.msra.mxu0 %v2602_v61  ;;  %3947 = vmatprep.mubr.msk.bf16.mxu1 %vm253_vm2, %v2137_v15 }
 0xbd6   :  { %3969 = vmatprep.subr.bf16.mxu0 %v2601_v9 }
 0xbd9   :  { %3970 = vmatpush3.bf16.msra.mxu0 %v2601_v9  ;;  %v4356_v9 = vld [vmem:[%s6026_s28 + $0x28] sm:$0xff] }
 0xbda   :  { %3971 = vmatprep.subr.bf16.mxu0 %v2600_v38 }
 0xbdc   :  { %3948 = vmatmul.mubr.msk.bf16.gmra.mxu1 %vm253_vm2, %v2138_v25  ;;  %v4358_v25 = vld [vmem:[%s6026_s28 + $0x40] sm:$0xff] }
 0xbdd   :  { %3972 = vmatpush3.bf16.msra.mxu0 %v2600_v38  ;;  %3951 = vmatprep.mubr.msk.bf16.mxu1 %vm253_vm2, %v2139_v46 }
 0xbde   :  { %4013 = vmatprep.subr.bf16.mxu0 %v4396_v1 }
 0xbe4   :  { %3952 = vmatmul.mubr.msk.bf16.gmra.mxu1 %vm253_vm2, %v2140_v35 }
 0xbe5   :  { %3955 = vmatprep.mubr.msk.bf16.mxu1 %vm253_vm2, %v2141_v13 }
 0xbec   :  { %3956 = vmatmul.mubr.msk.bf16.gmra.mxu1 %vm253_vm2, %v2142_v34 }
 0xbed   :  { %3959 = vmatprep.mubr.msk.bf16.mxu1 %vm253_vm2, %v2143_v42 }
 0xbf4   :  { %3960 = vmatmul.mubr.msk.bf16.gmra.mxu1 %vm253_vm2, %v2144_v27 }
 0xbf5   :  { %3963 = vmatprep.mubr.msk.bf16.mxu1 %vm253_vm2, %v2145_v37  ;;  %v4362_v37 = vld [vmem:[%s6026_s28 + $0x60] sm:$0xff] }
 0xbfc   :  { %3964 = vmatmul.mubr.msk.bf16.gmra.mxu1 %vm253_vm2, %v2146_v31  ;;  %v4363_v31 = vld [vmem:[%s6026_s28 + $0x70] sm:$0xff] }
 0xbfd   :  { %4001 = vmatprep.mubr.msk.bf16.mxu1 %vm4397_vm0, %v4396_v1 }
 0xc94   :  { %v3945_v41 = vpop.f32.mrf.mxu1 }
 0xc95   :  { %v5511_v59 = vadd.f32 %v4351_v54, %v3945_v41  ;;  %v4364_v54 = vld [vmem:[%s6026_s28 + $0x68] sm:$0xff] }
 0xc96   :  { %v2229_v63 = vpop.f32.mrf.mxu1 }
 0xc97   :  { %v5506_v22 = vadd.f32 %v4350_v32, %v2229_v63  ;;  %v2330_v47 = vsel %vm828_vm13, %v5511_v59, -inf }
 0xc98   :  { %v3946_v27 = vpop.f32.mrf.mxu1 }
 0xc99   :  { %v2324_v60 = vsel %vm828_vm13, %v5506_v22, -inf  ;;  %v5523_v0 = vadd.f32 %v4353_v45, %v3946_v27 }
 0xc9a   :  { %v2232_v55 = vpop.f32.mrf.mxu1  ;;  %2325 = vmax.xlane.f32.xlu0 %v2324_v60 }
 0xc9b   :  { %v5518_v53 = vadd.f32 %v4352_v23, %v2232_v55  ;;  %v2333_v57 = vsel %vm828_vm13, %v5523_v0, -inf  ;;  %v4365_v23 = vld [vmem:[%s6026_s28 + $0x78] sm:$0xff] }
 0xc9c   :  { %v3949_v19 = vpop.f32.mrf.mxu1 }
 0xc9d   :  { %v2327_v26 = vsel %vm828_vm13, %v5518_v53, -inf  ;;  %v5537_v61 = vadd.f32 %v4355_v7, %v3949_v19  ;;  %v4367_v7 = vld [vmem:[%s6026_s28 + $0x90] sm:$0xff] }
 0xc9e   :  { %2328 = vmax.xlane.f32.xlu1 %v2327_v26  ;;  %2331 = vmax.xlane.f32.xlu0 %v2330_v47  ;;  %v2245_v49 = vpop.f32.mrf.mxu1 }
 0xc9f   :  { %v5532_v43 = vadd.f32 %v4354_v56, %v2245_v49  ;;  %v2342_v20 = vsel %vm828_vm13, %v5537_v61, -inf  ;;  %v4366_v49 = vld [vmem:[%s6026_s28 + $0x80] sm:$0xff] }
 0xca0   :  { %v3950_v40 = vpop.f32.mrf.mxu1 }
 0xca1   :  { %v2336_v10 = vsel %vm828_vm13, %v5532_v43, -inf  ;;  %v5551_v38 = vadd.f32 %v4357_v44, %v3950_v40 }
 0xca2   :  { %2334 = vmax.xlane.f32.xlu1 %v2333_v57  ;;  %v2248_v11 = vpop.f32.mrf.mxu1  ;;  %2337 = vmax.xlane.f32.xlu0 %v2336_v10 }
 0xca3   :  { %v5546_v15 = vadd.f32 %v4356_v9, %v2248_v11  ;;  %v2345_v51 = vsel %vm828_vm13, %v5551_v38, -inf }
 0xca4   :  { %v3953_v2 = vpop.f32.mrf.mxu1 }
 0xca5   :  { %v2339_v48 = vsel %vm828_vm13, %v5546_v15, -inf  ;;  %v5565_v24 = vadd.f32 %v4359_v30, %v3953_v2  ;;  %v4368_v2 = vld [vmem:[%s6026_s28 + $0x88] sm:$0xff] }
 0xca6   :  { %v2261_v62 = vpop.f32.mrf.mxu1  ;;  %2340 = vmax.xlane.f32.xlu1 %v2339_v48  ;;  %2343 = vmax.xlane.f32.xlu0 %v2342_v20  ;;  %v4369_v20 = vld [vmem:[%s6026_s28 + $0x98] sm:$0xff] }
 0xca7   :  { %v5560_v46 = vadd.f32 %v4358_v25, %v2261_v62  ;;  %v2354_v8 = vsel %vm828_vm13, %v5565_v24, -inf }
 0xca8   :  { %v3954_v50 = vpop.f32.mrf.mxu1 }
 0xca9   :  { %v2348_v35 = vsel %vm828_vm13, %v5560_v46, -inf  ;;  %v5579_v34 = vadd.f32 %v4361_v5, %v3954_v50 }
 0xcaa   :  { %v2264_v13 = vpop.f32.mrf.mxu1  ;;  %2346 = vmax.xlane.f32.xlu1 %v2345_v51  ;;  %2349 = vmax.xlane.f32.xlu0 %v2348_v35  ;;  %v4370_v51 = vld [vmem:[%s6026_s28 + $0xa0] sm:$0xff] }
 0xcab   :  { %v5574_v21 = vadd.f32 %v4360_v3, %v2264_v13  ;;  %v2357_v63 = vsel %vm828_vm13, %v5579_v34, -inf  ;;  %v4371_v3 = vld [vmem:[%s6026_s28 + $0xb0] sm:$0xff] }
 0xcac   :  { %v3957_v33 = vpop.f32.mrf.mxu1 }
 0xcad   :  { %v2351_v42 = vsel %vm828_vm13, %v5574_v21, -inf  ;;  %v5593_v41 = vadd.f32 %v4363_v31, %v3957_v33 }
 0xcae   :  { %v2277_v18 = vpop.f32.mrf.mxu1  ;;  %2352 = vmax.xlane.f32.xlu1 %v2351_v42  ;;  %2355 = vmax.xlane.f32.xlu0 %v2354_v8 }
 0xcaf   :  { %v5588_v52 = vadd.f32 %v4362_v37, %v2277_v18  ;;  %v2366_v26 = vsel %vm828_vm13, %v5593_v41, -inf  ;;  %v4372_v18 = vld [vmem:[%s6026_s28 + $0xa8] sm:$0xff] }
 0xcb0   :  { %v3958_v29 = vpop.f32.mrf.mxu1 }
 0xcb1   :  { %v2360_v32 = vsel %vm828_vm13, %v5588_v52, -inf  ;;  %v5607_v19 = vadd.f32 %v4365_v23, %v3958_v29  ;;  %v4373_v29 = vld [vmem:[%s6026_s28 + $0xb8] sm:$0xff] }
 0xcb2   :  { %v2280_v27 = vpop.f32.mrf.mxu1  ;;  %2358 = vmax.xlane.f32.xlu1 %v2357_v63  ;;  %2361 = vmax.xlane.f32.xlu0 %v2360_v32 }
 0xcb3   :  { %v5602_v60 = vadd.f32 %v4364_v54, %v2280_v27  ;;  %v2369_v10 = vsel %vm828_vm13, %v5607_v19, -inf }
 0xcb4   :  { %v3961_v55 = vpop.f32.mrf.mxu1 }
 0xcb5   :  { %v2363_v45 = vsel %vm828_vm13, %v5602_v60, -inf  ;;  %v5621_v57 = vadd.f32 %v4367_v7, %v3961_v55 }
 0xcb6   :  { %v2293_v47 = vpop.f32.mrf.mxu1  ;;  %2364 = vmax.xlane.f32.xlu1 %v2363_v45  ;;  %2367 = vmax.xlane.f32.xlu0 %v2366_v26 }
 0xcb7   :  { %v5616_v56 = vadd.f32 %v4366_v49, %v2293_v47  ;;  %v2378_v50 = vsel %vm828_vm13, %v5621_v57, -inf }
 0xcb8   :  { %v3962_v40 = vpop.f32.mrf.mxu1 }
 0xcb9   :  { %v2372_v11 = vsel %vm828_vm13, %v5616_v56, -inf  ;;  %v5635_v62 = vadd.f32 %v4369_v20, %v3962_v40 }
 0xcba   :  { %v2296_v9 = vpop.f32.mrf.mxu1  ;;  %2370 = vmax.xlane.f32.xlu1 %v2369_v10  ;;  %2373 = vmax.xlane.f32.xlu0 %v2372_v11 }
 0xcbb   :  { %v5630_v44 = vadd.f32 %v4368_v2, %v2296_v9  ;;  %v2381_v5 = vsel %vm828_vm13, %v5635_v62, -inf }
 0xcbc   :  { %v3965_v48 = vpop.f32.mrf.mxu1 }
 0xcbd   :  { %v2375_v25 = vsel %vm828_vm13, %v5630_v44, -inf  ;;  %v5649_v33 = vadd.f32 %v4371_v3, %v3965_v48 }
 0xcbe   :  { %v2309_v30 = vpop.f32.mrf.mxu1  ;;  %2376 = vmax.xlane.f32.xlu1 %v2375_v25  ;;  %2379 = vmax.xlane.f32.xlu0 %v2378_v50 }
 0xcbf   :  { %v5644_v35 = vadd.f32 %v4370_v51, %v2309_v30  ;;  %v2390_v32 = vsel %vm828_vm13, %v5649_v33, -inf }
 0xcc0   :  { %v3966_v13 = vpop.f32.mrf.mxu1 }
 0xcc1   :  { %v2384_v42 = vsel %vm828_vm13, %v5644_v35, -inf  ;;  %v5663_v31 = vadd.f32 %v4373_v29, %v3966_v13 }
 0xcc2   :  { %v2312_v8 = vpop.f32.mrf.mxu1  ;;  %2382 = vmax.xlane.f32.xlu1 %v2381_v5  ;;  %2385 = vmax.xlane.f32.xlu0 %v2384_v42 }
 0xcc3   :  { %v5658_v37 = vadd.f32 %v4372_v18, %v2312_v8  ;;  %v2393_v27 = vsel %vm828_vm13, %v5663_v31, -inf }
 0xcc5   :  { %v2387_v63 = vsel %vm828_vm13, %v5658_v37, -inf }
 0xcc6   :  { %2388 = vmax.xlane.f32.xlu1 %v2387_v63  ;;  %2391 = vmax.xlane.f32.xlu0 %v2390_v32 }
 0xcca   :  { %2394 = vmax.xlane.f32.xlu1 %v2393_v27 }
 0xd23   :  { %v2326_v54 = vpop.xlane.xlu0 %2325 }
 0xd24   :  { %v2396_v55 = vsub.f32 %v5506_v22, %v2326_v54 }
 0xd26   :  { %v2420_v23 = vmul.f32 1.442695, %v2396_v55 }
 0xd27   :  { %v2329_v45 = vpop.xlane.xlu1 %2328  ;;  %v2332_v26 = vpop.xlane.xlu0 %2331 }
 0xd28   :  { %4242 = vpow2.f32 %v2420_v23  ;;  %v2397_v47 = vsub.f32 %v5518_v53, %v2329_v45  ;;  %v2398_v49 = vsub.f32 %v5511_v59, %v2332_v26 }
 0xd2a   :  { %v2422_v40 = vmul.f32 1.442695, %v2397_v47  ;;  %v2424_v7 = vmul.f32 1.442695, %v2398_v49 }
 0xd2b   :  { %v2335_v10 = vpop.xlane.xlu1 %2334  ;;  %v2338_v11 = vpop.xlane.xlu0 %2337 }
 0xd2c   :  { %4244 = vpow2.f32 %v2422_v40  ;;  %v2399_v9 = vsub.f32 %v5523_v0, %v2335_v10  ;;  %v2400_v2 = vsub.f32 %v5532_v43, %v2338_v11 }
 0xd2d   :  { %4246 = vpow2.f32 %v2424_v7 }
 0xd2e   :  { %v2426_v48 = vmul.f32 1.442695, %v2399_v9  ;;  %v2428_v22 = vmul.f32 1.442695, %v2400_v2 }
 0xd2f   :  { %v2341_v20 = vpop.xlane.xlu1 %2340  ;;  %v2344_v25 = vpop.xlane.xlu0 %2343 }
 0xd30   :  { %4248 = vpow2.f32 %v2426_v48  ;;  %v2401_v50 = vsub.f32 %v5546_v15, %v2341_v20  ;;  %v2402_v53 = vsub.f32 %v5537_v61, %v2344_v25 }
 0xd31   :  { %4250 = vpow2.f32 %v2428_v22 }
 0xd32   :  { %v2430_v59 = vmul.f32 1.442695, %v2401_v50  ;;  %v2432_v30 = vmul.f32 1.442695, %v2402_v53 }
 0xd33   :  { %v2347_v51 = vpop.xlane.xlu1 %2346  ;;  %v2350_v13 = vpop.xlane.xlu0 %2349 }
 0xd34   :  { %4252 = vpow2.f32 %v2430_v59  ;;  %v2403_v0 = vsub.f32 %v5551_v38, %v2347_v51  ;;  %v2404_v43 = vsub.f32 %v5560_v46, %v2350_v13 }
 0xd35   :  { %v5680_v3 = vpop.eup %4242  ;;  %4254 = vpow2.f32 %v2432_v30 }
 0xd36   :  { %v2434_v5 = vmul.f32 1.442695, %v2403_v0  ;;  %v2436_v42 = vmul.f32 1.442695, %v2404_v43  ;;  %v2468_v15 = vsel %vm828_vm13, %v5680_v3, 0.0 }
 0xd37   :  { %v2353_v8 = vpop.xlane.xlu1 %2352  ;;  %2469 = vadd.xlane.f32.xlu0 %v2468_v15  ;;  %v2356_v61 = vpop.xlane.xlu0 %2355 }
 0xd38   :  { %4256 = vpow2.f32 %v2434_v5  ;;  %v2405_v18 = vsub.f32 %v5574_v21, %v2353_v8  ;;  %v2406_v29 = vsub.f32 %v5565_v24, %v2356_v61 }
 0xd39   :  { %v5686_v63 = vpop.eup %4244  ;;  %4258 = vpow2.f32 %v2436_v42 }
 0xd3a   :  { %v5688_v38 = vpop.eup %4246  ;;  %v2438_v46 = vmul.f32 1.442695, %v2405_v18  ;;  %v2440_v32 = vmul.f32 1.442695, %v2406_v29  ;;  %v2471_v27 = vsel %vm828_vm13, %v5686_v63, 0.0 }
 0xd3b   :  { %2472 = vadd.xlane.f32.xlu1 %v2471_v27  ;;  %v2359_v54 = vpop.xlane.xlu1 %2358  ;;  %v2474_v55 = vsel %vm828_vm13, %v5688_v38, 0.0  ;;  %v2362_v23 = vpop.xlane.xlu0 %2361 }
 0xd3c   :  { %4260 = vpow2.f32 %v2438_v46  ;;  %v2407_v21 = vsub.f32 %v5579_v34, %v2359_v54  ;;  %2475 = vadd.xlane.f32.xlu0 %v2474_v55  ;;  %v2408_v24 = vsub.f32 %v5588_v52, %v2362_v23 }
 0xd3d   :  { %v5696_v45 = vpop.eup %4248  ;;  %4262 = vpow2.f32 %v2440_v32 }
 0xd3e   :  { %v5698_v26 = vpop.eup %4250  ;;  %v2442_v47 = vmul.f32 1.442695, %v2407_v21  ;;  %v2444_v49 = vmul.f32 1.442695, %v2408_v24  ;;  %v2477_v40 = vsel %vm828_vm13, %v5696_v45, 0.0 }
 0xd3f   :  { %2478 = vadd.xlane.f32.xlu1 %v2477_v40  ;;  %v2365_v7 = vpop.xlane.xlu1 %2364  ;;  %v2480_v10 = vsel %vm828_vm13, %v5698_v26, 0.0  ;;  %v2368_v11 = vpop.xlane.xlu0 %2367 }
 0xd40   :  { %4264 = vpow2.f32 %v2442_v47  ;;  %v2409_v34 = vsub.f32 %v5602_v60, %v2365_v7  ;;  %2481 = vadd.xlane.f32.xlu0 %v2480_v10  ;;  %v2410_v52 = vsub.f32 %v5593_v41, %v2368_v11 }
 0xd41   :  { %v5706_v9 = vpop.eup %4252  ;;  %4266 = vpow2.f32 %v2444_v49 }
 0xd42   :  { %v5708_v2 = vpop.eup %4254  ;;  %v2446_v48 = vmul.f32 1.442695, %v2409_v34  ;;  %v2448_v22 = vmul.f32 1.442695, %v2410_v52  ;;  %v2483_v20 = vsel %vm828_vm13, %v5706_v9, 0.0 }
 0xd43   :  { %2484 = vadd.xlane.f32.xlu1 %v2483_v20  ;;  %v2371_v25 = vpop.xlane.xlu1 %2370  ;;  %v2486_v50 = vsel %vm828_vm13, %v5708_v2, 0.0  ;;  %v2374_v53 = vpop.xlane.xlu0 %2373 }
 0xd44   :  { %4268 = vpow2.f32 %v2446_v48  ;;  %v2411_v60 = vsub.f32 %v5607_v19, %v2371_v25  ;;  %2487 = vadd.xlane.f32.xlu0 %v2486_v50  ;;  %v2412_v41 = vsub.f32 %v5616_v56, %v2374_v53 }
 0xd45   :  { %v5716_v59 = vpop.eup %4256  ;;  %4270 = vpow2.f32 %v2448_v22 }
 0xd46   :  { %v5718_v30 = vpop.eup %4258  ;;  %v2450_v51 = vmul.f32 1.442695, %v2411_v60  ;;  %v2452_v13 = vmul.f32 1.442695, %v2412_v41  ;;  %v2489_v0 = vsel %vm828_vm13, %v5716_v59, 0.0 }
 0xd47   :  { %2490 = vadd.xlane.f32.xlu1 %v2489_v0  ;;  %v2377_v43 = vpop.xlane.xlu1 %2376  ;;  %v2492_v5 = vsel %vm828_vm13, %v5718_v30, 0.0  ;;  %v2380_v42 = vpop.xlane.xlu0 %2379 }
 0xd48   :  { %4272 = vpow2.f32 %v2450_v51  ;;  %v2413_v19 = vsub.f32 %v5630_v44, %v2377_v43  ;;  %2493 = vadd.xlane.f32.xlu0 %v2492_v5  ;;  %v2414_v56 = vsub.f32 %v5621_v57, %v2380_v42 }
 0xd49   :  { %v5726_v15 = vpop.eup %4260  ;;  %4274 = vpow2.f32 %v2452_v13 }
 0xd4a   :  { %v5728_v8 = vpop.eup %4262  ;;  %v2454_v61 = vmul.f32 1.442695, %v2413_v19  ;;  %v2456_v18 = vmul.f32 1.442695, %v2414_v56  ;;  %v2495_v29 = vsel %vm828_vm13, %v5726_v15, 0.0 }
 0xd4b   :  { %2496 = vadd.xlane.f32.xlu1 %v2495_v29  ;;  %v2383_v46 = vpop.xlane.xlu1 %2382  ;;  %v2498_v32 = vsel %vm828_vm13, %v5728_v8, 0.0  ;;  %v2386_v27 = vpop.xlane.xlu0 %2385 }
 0xd4c   :  { %4276 = vpow2.f32 %v2454_v61  ;;  %v2415_v44 = vsub.f32 %v5635_v62, %v2383_v46  ;;  %2499 = vadd.xlane.f32.xlu0 %v2498_v32  ;;  %v2416_v57 = vsub.f32 %v5644_v35, %v2386_v27  ;;  %v4099_v46 = vld [vmem:[%s5987_s12 + $0x18] sm:$0xff]  }
 0xd4d   :  { %v5736_v54 = vpop.eup %4264  ;;  %4278 = vpow2.f32 %v2456_v18  ;;  %3998 = vmatpush3.bf16.msra.mxu1 %v4099_v46 }
 0xd4e   :  { %v5738_v55 = vpop.eup %4266  ;;  %v2458_v23 = vmul.f32 1.442695, %v2415_v44  ;;  %v2460_v21 = vmul.f32 1.442695, %v2416_v57  ;;  %v2501_v24 = vsel %vm828_vm13, %v5736_v54, 0.0  ;;  %3999 = vmatprep.subr.bf16.mxu1 %v4396_v1 }
 0xd4f   :  { %2502 = vadd.xlane.f32.xlu1 %v2501_v24  ;;  %v2389_v47 = vpop.xlane.xlu1 %2388  ;;  %v2504_v49 = vsel %vm828_vm13, %v5738_v55, 0.0  ;;  %v2392_v40 = vpop.xlane.xlu0 %2391 }
 0xd50   :  { %4280 = vpow2.f32 %v2458_v23  ;;  %v2417_v62 = vsub.f32 %v5658_v37, %v2389_v47  ;;  %2505 = vadd.xlane.f32.xlu0 %v2504_v49  ;;  %v2418_v35 = vsub.f32 %v5649_v33, %v2392_v40 }
 0xd51   :  { %v5746_v7 = vpop.eup %4268  ;;  %4282 = vpow2.f32 %v2460_v21 }
 0xd52   :  { %v5748_v10 = vpop.eup %4270  ;;  %v2462_v11 = vmul.f32 1.442695, %v2417_v62  ;;  %v2464_v34 = vmul.f32 1.442695, %v2418_v35  ;;  %v2507_v52 = vsel %vm828_vm13, %v5746_v7, 0.0 }
 0xd53   :  { %2508 = vadd.xlane.f32.xlu1 %v2507_v52  ;;  %v2395_v48 = vpop.xlane.xlu1 %2394  ;;  %v2510_v22 = vsel %vm828_vm13, %v5748_v10, 0.0 }
 0xd54   :  { %4284 = vpow2.f32 %v2462_v11  ;;  %v2419_v37 = vsub.f32 %v5663_v31, %v2395_v48  ;;  %2511 = vadd.xlane.f32.xlu0 %v2510_v22 }
 0xd55   :  { %v5755_v33 = vpop.eup %4272  ;;  %4286 = vpow2.f32 %v2464_v34 }
 0xd56   :  { %v5757_v20 = vpop.eup %4274  ;;  %v2466_v25 = vmul.f32 1.442695, %v2419_v37  ;;  %v2513_v50 = vsel %vm828_vm13, %v5755_v33, 0.0 }
 0xd57   :  { %2514 = vadd.xlane.f32.xlu1 %v2513_v50  ;;  %v2516_v53 = vsel %vm828_vm13, %v5757_v20, 0.0 }
 0xd58   :  { %4288 = vpow2.f32 %v2466_v25  ;;  %2517 = vadd.xlane.f32.xlu0 %v2516_v53 }
 0xd59   :  { %v5763_v60 = vpop.eup %4276 }
 0xd5a   :  { %v5765_v41 = vpop.eup %4278  ;;  %v2519_v31 = vsel %vm828_vm13, %v5763_v60, 0.0 }
 0xd5b   :  { %2520 = vadd.xlane.f32.xlu1 %v2519_v31  ;;  %v2522_v51 = vsel %vm828_vm13, %v5765_v41, 0.0 }
 0xd5c   :  { %2523 = vadd.xlane.f32.xlu0 %v2522_v51 }
 0xd5d   :  { %v5771_v13 = vpop.eup %4280 }
 0xd5e   :  { %v5773_v0 = vpop.eup %4282  ;;  %v2525_v43 = vsel %vm828_vm13, %v5771_v13, 0.0 }
 0xd5f   :  { %2526 = vadd.xlane.f32.xlu1 %v2525_v43  ;;  %v2528_v5 = vsel %vm828_vm13, %v5773_v0, 0.0 }
 0xd60   :  { %2529 = vadd.xlane.f32.xlu0 %v2528_v5 }
 0xd61   :  { %v5779_v42 = vpop.eup %4284 }
 0xd62   :  { %v5781_v19 = vpop.eup %4286  ;;  %v2531_v56 = vsel %vm828_vm13, %v5779_v42, 0.0 }
 0xd63   :  { %2532 = vadd.xlane.f32.xlu1 %v2531_v56  ;;  %v2534_v61 = vsel %vm828_vm13, %v5781_v19, 0.0 }
 0xd64   :  { %2535 = vadd.xlane.f32.xlu0 %v2534_v61 }
 0xd65   :  { %v5787_v18 = vpop.eup %4288 }
 0xd66   :  { %v2537_v29 = vsel %vm828_vm13, %v5787_v18, 0.0 }
 0xd67   :  { %2538 = vadd.xlane.f32.xlu1 %v2537_v29 }
 0xdc0   :  { %v2470_v32 = vpop.xlane.xlu0 %2469 }
 0xdc1   :  { %4290 = vrcp.f32 %v2470_v32 }
 0xdc4   :  { %v2473_v27 = vpop.xlane.xlu1 %2472 }
 0xdc5   :  { %4292 = vrcp.f32 %v2473_v27  ;;  %v2476_v44 = vpop.xlane.xlu0 %2475 }
 0xdc6   :  { %4294 = vrcp.f32 %v2476_v44 }
 0xdc8   :  { %v2479_v57 = vpop.xlane.xlu1 %2478 }
 0xdc9   :  { %4296 = vrcp.f32 %v2479_v57  ;;  %v2482_v23 = vpop.xlane.xlu0 %2481 }
 0xdca   :  { %4298 = vrcp.f32 %v2482_v23 }
 0xdcc   :  { %v2485_v21 = vpop.xlane.xlu1 %2484 }
 0xdcd   :  { %4300 = vrcp.f32 %v2485_v21  ;;  %v2488_v24 = vpop.xlane.xlu0 %2487 }
 0xdce   :  { %4302 = vrcp.f32 %v2488_v24  ;;  %v4291_v47 = vpop.eup %4290 }
 0xdcf   :  { %v2564_v35 = vmul.f32 %v4291_v47, %v5680_v3 }
 0xdd0   :  { %v2491_v49 = vpop.xlane.xlu1 %2490 }
 0xdd1   :  { %4304 = vrcp.f32 %v2491_v49  ;;  %v2494_v40 = vpop.xlane.xlu0 %2493 }
 0xdd2   :  { %v4293_v62 = vpop.eup %4292  ;;  %4306 = vrcp.f32 %v2494_v40 }
 0xdd3   :  { %v2565_v11 = vmul.f32 %v4293_v62, %v5686_v63  ;;  %v4295_v34 = vpop.eup %4294 }
 0xdd4   :  { %v2497_v52 = vpop.xlane.xlu1 %2496  ;;  %v2566_v25 = vmul.f32 %v4295_v34, %v5688_v38 }
 0xdd5   :  { %4308 = vrcp.f32 %v2497_v52  ;;  %v2500_v48 = vpop.xlane.xlu0 %2499  ;;  %v2588_v22 = vpack.c.bf16 %v2565_v11, %v2564_v35 }
 0xdd6   :  { %v4297_v37 = vpop.eup %4296  ;;  %4310 = vrcp.f32 %v2500_v48 }
 0xdd7   :  { %v2567_v50 = vmul.f32 %v4297_v37, %v5696_v45  ;;  %3973 = vmatprep.mubr.msk.bf16.mxu0 %vm828_vm13, %v2588_v22  ;;  %v4299_v53 = vpop.eup %4298 }
 0xdd8   :  { %v2503_v31 = vpop.xlane.xlu1 %2502  ;;  %v2568_v63 = vmul.f32 %v4299_v53, %v5698_v26 }
 0xdd9   :  { %v2589_v51 = vpack.c.bf16 %v2567_v50, %v2566_v25  ;;  %4312 = vrcp.f32 %v2503_v31  ;;  %v2506_v3 = vpop.xlane.xlu0 %2505 }
 0xdda   :  { %v4301_v43 = vpop.eup %4300  ;;  %4314 = vrcp.f32 %v2506_v3 }
 0xddb   :  { %3974 = vmatmul.mubr.msk.bf16.vlgmr.msra.gmra.mxu0 %vm828_vm13, %v2589_v51  ;;  %v2569_v5 = vmul.f32 %v4301_v43, %v5706_v9  ;;  %v4303_v56 = vpop.eup %4302 }
 0xddc   :  { %v2509_v38 = vpop.xlane.xlu1 %2508  ;;  %v2570_v46 = vmul.f32 %v4303_v56, %v5708_v2 }
 0xddd   :  { %4316 = vrcp.f32 %v2509_v38  ;;  %v2512_v45 = vpop.xlane.xlu0 %2511  ;;  %v2590_v61 = vpack.c.bf16 %v2569_v5, %v2568_v63 }
 0xdde   :  { %v4305_v29 = vpop.eup %4304  ;;  %4318 = vrcp.f32 %v2512_v45 }
 0xddf   :  { %3977 = vmatprep.mubr.msk.bf16.mxu0 %vm828_vm13, %v2590_v61  ;;  %v2571_v32 = vmul.f32 %v4305_v29, %v5716_v59  ;;  %v4307_v27 = vpop.eup %4306 }
 0xde0   :  { %v2515_v44 = vpop.xlane.xlu1 %2514  ;;  %v2572_v9 = vmul.f32 %v4307_v27, %v5718_v30 }
 0xde1   :  { %4320 = vrcp.f32 %v2515_v44  ;;  %v2518_v57 = vpop.xlane.xlu0 %2517  ;;  %v2591_v26 = vpack.c.bf16 %v2571_v32, %v2570_v46 }
 0xde2   :  { %v4309_v23 = vpop.eup %4308  ;;  %4322 = vrcp.f32 %v2518_v57 }
 0xde3   :  { %3978 = vmatmul.mubr.msk.bf16.gmra.mxu0 %vm828_vm13, %v2591_v26  ;;  %v2573_v21 = vmul.f32 %v4309_v23, %v5726_v15  ;;  %v4311_v24 = vpop.eup %4310 }
 0xde4   :  { %v2521_v47 = vpop.xlane.xlu1 %2520  ;;  %v2574_v59 = vmul.f32 %v4311_v24, %v5728_v8 }
 0xde5   :  { %4324 = vrcp.f32 %v2521_v47  ;;  %v2524_v49 = vpop.xlane.xlu0 %2523  ;;  %v2592_v2 = vpack.c.bf16 %v2573_v21, %v2572_v9 }
 0xde6   :  { %v4313_v40 = vpop.eup %4312  ;;  %4326 = vrcp.f32 %v2524_v49 }
 0xde7   :  { %3981 = vmatprep.mubr.msk.bf16.mxu0 %vm828_vm13, %v2592_v2  ;;  %v2575_v62 = vmul.f32 %v4313_v40, %v5736_v54  ;;  %v4315_v35 = vpop.eup %4314 }
 0xde8   :  { %v2527_v11 = vpop.xlane.xlu1 %2526  ;;  %v2576_v15 = vmul.f32 %v4315_v35, %v5738_v55 }
 0xde9   :  { %4328 = vrcp.f32 %v2527_v11  ;;  %v2530_v34 = vpop.xlane.xlu0 %2529  ;;  %v2593_v30 = vpack.c.bf16 %v2575_v62, %v2574_v59 }
 0xdea   :  { %v4317_v52 = vpop.eup %4316  ;;  %4330 = vrcp.f32 %v2530_v34 }
 0xdeb   :  { %3982 = vmatmul.mubr.msk.bf16.gmra.mxu0 %vm828_vm13, %v2593_v30  ;;  %v2577_v48 = vmul.f32 %v4317_v52, %v5746_v7  ;;  %v4319_v22 = vpop.eup %4318 }
 0xdec   :  { %v2533_v37 = vpop.xlane.xlu1 %2532  ;;  %v2578_v54 = vmul.f32 %v4319_v22, %v5748_v10 }
 0xded   :  { %4332 = vrcp.f32 %v2533_v37  ;;  %v2536_v25 = vpop.xlane.xlu0 %2535  ;;  %v2594_v8 = vpack.c.bf16 %v2577_v48, %v2576_v15 }
 0xdee   :  { %v4321_v50 = vpop.eup %4320  ;;  %4334 = vrcp.f32 %v2536_v25 }
 0xdef   :  { %3985 = vmatprep.mubr.msk.bf16.mxu0 %vm828_vm13, %v2594_v8  ;;  %v2579_v53 = vmul.f32 %v4321_v50, %v5755_v33  ;;  %v4323_v31 = vpop.eup %4322 }
 0xdf0   :  { %v2539_v51 = vpop.xlane.xlu1 %2538  ;;  %v2580_v7 = vmul.f32 %v4323_v31, %v5757_v20 }
 0xdf1   :  { %4336 = vrcp.f32 %v2539_v51  ;;  %v2595_v3 = vpack.c.bf16 %v2579_v53, %v2578_v54 }
 0xdf2   :  { %v4325_v55 = vpop.eup %4324 }
 0xdf3   :  { %3986 = vmatmul.mubr.msk.bf16.gmra.mxu0 %vm828_vm13, %v2595_v3  ;;  %v2581_v43 = vmul.f32 %v4325_v55, %v5763_v60  ;;  %v4327_v63 = vpop.eup %4326 }
 0xdf4   :  { %v2582_v10 = vmul.f32 %v4327_v63, %v5765_v41 }
 0xdf5   :  { %v2596_v5 = vpack.c.bf16 %v2581_v43, %v2580_v7 }
 0xdf6   :  { %v4329_v56 = vpop.eup %4328 }
 0xdf7   :  { %3989 = vmatprep.mubr.msk.bf16.mxu0 %vm828_vm13, %v2596_v5  ;;  %v2583_v33 = vmul.f32 %v4329_v56, %v5771_v13  ;;  %v4331_v38 = vpop.eup %4330  ;;  %v4100_v13 = vld [vmem:[%s5987_s12 + $0x10] sm:$0xff]  }
 0xdf8   :  { %v2584_v29 = vmul.f32 %v4331_v38, %v5773_v0  ;;  %4000 = vmatpush3.bf16.msra.mxu1 %v4100_v13 }
 0xdf9   :  { %v2597_v45 = vpack.c.bf16 %v2583_v33, %v2582_v10  ;;  %4029 = vmatprep.subr.bf16.mxu1 %v4396_v1 }
 0xdfa   :  { %v4333_v61 = vpop.eup %4332 }
 0xdfb   :  { %3990 = vmatmul.mubr.msk.bf16.gmra.mxu0 %vm828_vm13, %v2597_v45  ;;  %v2585_v20 = vmul.f32 %v4333_v61, %v5779_v42  ;;  %v4335_v46 = vpop.eup %4334 }
 0xdfc   :  { %v2586_v27 = vmul.f32 %v4335_v46, %v5781_v19 }
 0xdfd   :  { %v2598_v60 = vpack.c.bf16 %v2585_v20, %v2584_v29 }
 0xdfe   :  { %v4337_v32 = vpop.eup %4336 }
 0xdff   :  { %3993 = vmatprep.mubr.msk.bf16.mxu0 %vm828_vm13, %v2598_v60  ;;  %v2587_v41 = vmul.f32 %v4337_v32, %v5787_v18 }
 0xe01   :  { %v2599_v44 = vpack.c.bf16 %v2587_v41, %v2586_v27 }
 0xe03   :  { %3994 = vmatmul.mubr.msk.bf16.gmra.mxu0 %vm828_vm13, %v2599_v44 }
 0xe04   :  { %4017 = vmatprep.mubr.msk.bf16.mxu0 %vm4397_vm0, %v4396_v1 }
 0xe9b   :  { %v3975_v0 = vpop.f32.mrf.mxu0 }
 0xe9c   :  { %v2770_v10 = vmul.f32 %v3975_v0, %v4706_v12 }
 0xe9d   :  { %v2673_v42 = vpop.f32.mrf.mxu0 }
 0xe9e   :  { %v2768_v30 = vmul.f32 %v4706_v12, %v2673_v42 }
 0xe9f   :  { %v3976_v57 = vpop.f32.mrf.mxu0 }
 0xea0   :  { %v2771_v33 = vmul.f32 %v3976_v57, %v4706_v12 }
 0xea1   :  { %v2676_v26 = vpop.f32.mrf.mxu0 }
 0xea2   :  { %v2769_v52 = vmul.f32 %v4706_v12, %v2676_v26 }
 0xea3   :  { %v3979_v19 = vpop.f32.mrf.mxu0 }
 0xea4   :  { %v2774_v35 = vmul.f32 %v3979_v19, %v4709_v14 }
 0xea5   :  { %v2689_v23 = vpop.f32.mrf.mxu0 }
 0xea6   :  { %v2780_v37 = vadd.f32 %v2774_v35, %v2768_v30  ;;  %v2772_v19 = vmul.f32 %v4706_v12, %v2689_v23 }
 0xea7   :  { %v3980_v18 = vpop.f32.mrf.mxu0 }
 0xea8   :  { %v2775_v11 = vmul.f32 %v3980_v18, %v4709_v14 }
 0xea9   :  { %v2692_v9 = vpop.f32.mrf.mxu0 }
 0xeaa   :  { %v2781_v25 = vadd.f32 %v2775_v11, %v2769_v52  ;;  %v2773_v13 = vmul.f32 %v4706_v12, %v2692_v9 }
 0xeab   :  { %v3983_v21 = vpop.f32.mrf.mxu0 }
 0xeac   :  { %v2778_v0 = vmul.f32 %v3983_v21, %v4709_v14 }
 0xead   :  { %v2705_v24 = vpop.f32.mrf.mxu0 }
 0xeae   :  { %v2776_v43 = vmul.f32 %v4709_v14, %v2705_v24 }
 0xeaf   :  { %v3984_v47 = vpop.f32.mrf.mxu0 }
 0xeb0   :  { %v2782_v29 = vadd.f32 %v2776_v43, %v2770_v10  ;;  %v2779_v32 = vmul.f32 %v3984_v47, %v4709_v14 }
 0xeb1   :  { %v2708_v49 = vpop.f32.mrf.mxu0 }
 0xeb2   :  { %v2777_v63 = vmul.f32 %v4709_v14, %v2708_v49  ;;  %v2785_v18 = vadd.f32 %v2779_v32, %v2773_v13 }
 0xeb3   :  { %v3987_v2 = vpop.f32.mrf.mxu0 }
 0xeb4   :  { %v2788_v38 = vmul.f32 %v3987_v2, %v4712_v16  ;;  %v2783_v20 = vadd.f32 %v2777_v63, %v2771_v33  ;;  %v2784_v2 = vadd.f32 %v2778_v0, %v2772_v19 }
 0xeb5   :  { %v2721_v40 = vpop.f32.mrf.mxu0 }
 0xeb6   :  { %v2786_v15 = vmul.f32 %v4712_v16, %v2721_v40  ;;  %v2794_v27 = vadd.f32 %v2788_v38, %v2782_v29 }
 0xeb7   :  { %v3988_v59 = vpop.f32.mrf.mxu0 }
 0xeb8   :  { %v2792_v54 = vadd.f32 %v2786_v15, %v2780_v37  ;;  %v2789_v45 = vmul.f32 %v3988_v59, %v4712_v16 }
 0xeb9   :  { %v2724_v62 = vpop.f32.mrf.mxu0 }
 0xeba   :  { %v2787_v48 = vmul.f32 %v4712_v16, %v2724_v62  ;;  %v2795_v41 = vadd.f32 %v2789_v45, %v2783_v20 }
 0xebb   :  { %v3991_v34 = vpop.f32.mrf.mxu0 }
 0xebc   :  { %v2798_v8 = vmul.f32 %v3991_v34, %v4715_v17  ;;  %v2793_v53 = vadd.f32 %v2787_v48, %v2781_v25 }
 0xebd   :  { %v2737_v22 = vpop.f32.mrf.mxu0 }
 0xebe   :  { %v2804_v3 = vadd.f32 %v2798_v8, %v2792_v54  ;;  %v2790_v24 = vmul.f32 %v4712_v16, %v2737_v22 }
 0xebf   :  { %v3992_v50 = vpop.f32.mrf.mxu0 }
 0xec0   :  { %v2799_v31 = vmul.f32 %v3992_v50, %v4715_v17  ;;  %v2796_v14 = vadd.f32 %v2790_v24, %v2784_v2 }
 0xec1   :  { %v2740_v51 = vpop.f32.mrf.mxu0 }
 0xec2   :  { %v2805_v55 = vadd.f32 %v2799_v31, %v2793_v53  ;;  %v2791_v42 = vmul.f32 %v4712_v16, %v2740_v51  ;;  %v3533_v16 = vld [vmem:[%s5988_s13 + $0x1] ss:$0 sm:$0xff] }
 0xec3   :  { %v3995_v7 = vpop.f32.mrf.mxu0 }
 0xec4   :  { %v2815_v5 = vpack.c.bf16 %v2805_v55, %v2804_v3  ;;  %v2797_v40 = vadd.f32 %v2791_v42, %v2785_v18  ;;  %v2802_v59 = vmul.f32 %v3995_v7, %v4715_v17  ;;  %v4102_v18 = vld [vmem:[%s5991_s16 + $0x10] sm:$0xff]  }
 0xec5   :  { %v2753_v56 = vpop.f32.mrf.mxu0 }
 0xec6   :  { %4002 = vmatmul.mubr.msk.bf16.vlgmr.msra.gmra.mxu1 %vm253_vm2, %v2815_v5  ;;  %v2800_v46 = vmul.f32 %v4715_v17, %v2753_v56  ;;  %v2808_v21 = vadd.f32 %v2802_v59, %v2796_v14  ;;  %v4101_v5 = vld [vmem:[%s5991_s16 + $0x18] sm:$0xff]  }
 0xec7   :  { %v3996_v61 = vpop.f32.mrf.mxu0  ;;  %4005 = vmatprep.mubr.msk.bf16.mxu1 %vm4397_vm0, %v4396_v1  ;;  %4014 = vmatpush3.bf16.msra.mxu0 %v4101_v5 }
 0xec8   :  { %v2806_v57 = vadd.f32 %v2800_v46, %v2794_v27  ;;  %v2803_v49 = vmul.f32 %v3996_v61, %v4715_v17  ;;  %4015 = vmatprep.subr.bf16.mxu0 %v4396_v1 }
 0xec9   :  { %v2756_v60 = vpop.f32.mrf.mxu0 }
 0xeca   :  { %v2801_v44 = vmul.f32 %v4715_v17, %v2756_v60  ;;  %v2809_v9 = vadd.f32 %v2803_v49, %v2797_v40 }
 0xecb   :  { %4016 = vmatpush3.bf16.msra.mxu0 %v4102_v18 }
 0xecc   :  { %v2807_v26 = vadd.f32 %v2801_v44, %v2795_v41  ;;  %v2817_v62 = vpack.c.bf16 %v2809_v9, %v2808_v21  ;;  %4049 = vmatprep.subr.bf16.mxu0 %v4396_v1 }
 0xece   :  { %v2816_v47 = vpack.c.bf16 %v2807_v26, %v2806_v57 }
 0xed0   :  { %4006 = vmatmul.mubr.msk.bf16.gmra.mxu1 %vm253_vm2, %v2816_v47 }
 0xed1   :  { %4009 = vmatprep.mubr.msk.bf16.mxu1 %vm4397_vm0, %v4396_v1 }
 0xed8   :  { %4010 = vmatmul.mubr.msk.bf16.gmra.mxu1 %vm253_vm2, %v2817_v62 }
 0xed9   :  { %4037 = vmatprep.mubr.msk.bf16.mxu1 %vm4397_vm0, %v4396_v1 }
 0xf86   :  { %v2873_v12 = vpop.f32.mrf.mxu1 }
 0xf87   :  { %v2896_v17 = vadd.f32 %v2873_v12, %v5296_v58 }
 0xf88   :  { %v4003_v23 = vpop.f32.mrf.mxu1 }
 0xf89   :  { %v5874_v35 = vadd.f32 %v3533_v16, %v2896_v17 }
 0xf8a   :  { %v2876_v11 = vpop.f32.mrf.mxu1 }
 0xf8b   :  { %v2897_v34 = vadd.f32 %v2876_v11, %v5301_v36  ;;  %v2920_v30 = vsel %vm253_vm2, %v5874_v35, 0.0 }
 0xf8c   :  { %2921 = vadd.xlane.f32.xlu0 %v2920_v30  ;;  %v4004_v52 = vpop.f32.mrf.mxu1 }
 0xf8d   :  { %v2911_v15 = vadd.f32 %v3533_v16, %v2897_v34 }
 0xf8f   :  { %v2923_v48 = vsel %vm253_vm2, %v2911_v15, 0.0 }
 0xf90   :  { %2924 = vadd.xlane.f32.xlu1 %v2923_v48  ;;  %v2881_v22 = vpop.f32.mrf.mxu1 }
 0xf91   :  { %v2898_v37 = vadd.f32 %v2881_v22, %v5306_v39  ;;  %v3536_v22 = vld [vmem:[%s5989_s14 + $0x1] ss:$0 sm:$0xff] }
 0xf92   :  { %v4007_v25 = vpop.f32.mrf.mxu1 }
 0xf93   :  { %v2912_v58 = vadd.f32 %v3533_v16, %v2898_v37 }
 0xf94   :  { %v2884_v8 = vpop.f32.mrf.mxu1 }
 0xf95   :  { %v2899_v50 = vadd.f32 %v2884_v8, %v5311_v4  ;;  %v2926_v54 = vsel %vm253_vm2, %v2912_v58, 0.0 }
 0xf96   :  { %2927 = vadd.xlane.f32.xlu0 %v2926_v54  ;;  %v4008_v36 = vpop.f32.mrf.mxu1 }
 0xf97   :  { %v5883_v53 = vadd.f32 %v3533_v16, %v2899_v50  ;;  %v3537_v36 = vld [vmem:[%s5990_s15 + $0x1] ss:$0 sm:$0xff] }
 0xf98   :  { %v2889_v31 = vpop.f32.mrf.mxu1 }
 0xf99   :  { %v2900_v51 = vadd.f32 %v2889_v31, %v5316_v28  ;;  %v2929_v3 = vsel %vm253_vm2, %v5883_v53, 0.0 }
 0xf9a   :  { %2930 = vadd.xlane.f32.xlu1 %v2929_v3  ;;  %v4011_v55 = vpop.f32.mrf.mxu1 }
 0xf9b   :  { %v2914_v39 = vadd.f32 %v3533_v16, %v2900_v51 }
 0xf9c   :  { %v2892_v7 = vpop.f32.mrf.mxu1 }
 0xf9d   :  { %v2901_v43 = vadd.f32 %v2892_v7, %v5321_v6  ;;  %v2932_v26 = vsel %vm253_vm2, %v2914_v39, 0.0 }
 0xf9e   :  { %v4012_v63 = vpop.f32.mrf.mxu1 }
 0xf9f   :  { %v2915_v4 = vadd.f32 %v3533_v16, %v2901_v43 }
 0xfa1   :  { %v2935_v19 = vsel %vm253_vm2, %v2915_v4, 0.0 }
0x1015   :  { %v2922_v56 = vpop.xlane.xlu0 %2921 }
0x1016   :  { %v2938_v28 = vmul.f32 0.03125, %v2922_v56 }
0x1018   :  { %v2944_v10 = vsub.f32 %v5874_v35, %v2938_v28 }
0x1019   :  { %v2925_v33 = vpop.xlane.xlu1 %2924 }
0x101a   :  { %v2939_v38 = vmul.f32 0.03125, %v2925_v33  ;;  %v2950_v45 = vmul.f32 %v2944_v10, %v2944_v10 }
0x101c   :  { %v2945_v61 = vsub.f32 %v2911_v15, %v2939_v38  ;;  %v2956_v29 = vsel %vm253_vm2, %v2950_v45, 0.0  ;;  %v4103_v38 = vld [vmem:[%s5993_s18 + $0x38] sm:$0xff]   ;;  %v4104_v45 = vld [vmem:[%s5993_s18 + $0x30] sm:$0xff]  }
0x101d   :  { %2957 = vadd.xlane.f32.xlu0 %v2956_v29  ;;  %4030 = vmatpush3.bf16.msra.mxu1 %v4103_v38  ;;  %v4106_v29 = vld [vmem:[%s5993_s18 + $0x20] sm:$0xff]  }
0x101e   :  { %v2951_v6 = vmul.f32 %v2945_v61, %v2945_v61  ;;  %4031 = vmatprep.subr.bf16.mxu1 %v4396_v1 }
0x101f   :  { %v2928_v20 = vpop.xlane.xlu0 %2927 }
0x1020   :  { %v2940_v46 = vmul.f32 0.03125, %v2928_v20  ;;  %v2959_v60 = vsel %vm253_vm2, %v2951_v6, 0.0 }
0x1021   :  { %2960 = vadd.xlane.f32.xlu1 %v2959_v60  ;;  %4032 = vmatpush3.bf16.msra.mxu1 %v4104_v45 }
0x1022   :  { %v2946_v32 = vsub.f32 %v2912_v58, %v2940_v46  ;;  %4033 = vmatprep.subr.bf16.mxu1 %v4396_v1 }
0x1023   :  { %v2931_v27 = vpop.xlane.xlu1 %2930 }
0x1024   :  { %v2941_v41 = vmul.f32 0.03125, %v2931_v27  ;;  %v2952_v44 = vmul.f32 %v2946_v32, %v2946_v32 }
0x1026   :  { %v2947_v13 = vsub.f32 %v5883_v53, %v2941_v41  ;;  %v2962_v0 = vsel %vm253_vm2, %v2952_v44, 0.0 }
0x1027   :  { %2963 = vadd.xlane.f32.xlu0 %v2962_v0 }
0x1028   :  { %v2953_v42 = vmul.f32 %v2947_v13, %v2947_v13 }
0x102a   :  { %v2965_v57 = vsel %vm253_vm2, %v2953_v42, 0.0 }
0x102b   :  { %2966 = vadd.xlane.f32.xlu1 %v2965_v57  ;;  %2933 = vadd.xlane.f32.xlu0 %v2932_v26 }
0x102f   :  { %2936 = vadd.xlane.f32.xlu1 %v2935_v19 }
0x10a6   :  { %v2958_v24 = vpop.xlane.xlu0 %2957 }
0x10a7   :  { %v2974_v49 = vmul.f32 0.03125, %v2958_v24  ;;  %v3543_v24 = vld [vmem:[%s5992_s17 + $0x1] ss:$0 sm:$0xff] }
0x10a9   :  { %v2980_v47 = vadd.f32 1e-05, %v2974_v49 }
0x10aa   :  { %v2961_v2 = vpop.xlane.xlu1 %2960 }
0x10ab   :  { %4338 = vrsqrt.f32 %v2980_v47  ;;  %v2975_v40 = vmul.f32 0.03125, %v2961_v2 }
0x10ad   :  { %v2981_v59 = vadd.f32 1e-05, %v2975_v40 }
0x10af   :  { %4340 = vrsqrt.f32 %v2981_v59 }
0x10b0   :  { %v2964_v14 = vpop.xlane.xlu0 %2963 }
0x10b1   :  { %v2976_v9 = vmul.f32 0.03125, %v2964_v14 }
0x10b3   :  { %v2982_v21 = vadd.f32 1e-05, %v2976_v9 }
0x10b4   :  { %v2967_v62 = vpop.xlane.xlu1 %2966  ;;  %v2934_v12 = vpop.xlane.xlu0 %2933 }
0x10b5   :  { %4342 = vrsqrt.f32 %v2982_v21  ;;  %v2977_v16 = vmul.f32 0.03125, %v2967_v62  ;;  %v2942_v17 = vmul.f32 0.03125, %v2934_v12 }
0x10b7   :  { %v2983_v23 = vadd.f32 1e-05, %v2977_v16  ;;  %v2948_v11 = vsub.f32 %v2914_v39, %v2942_v17 }
0x10b8   :  { %v4339_v34 = vpop.eup %4338  ;;  %v2937_v30 = vpop.xlane.xlu1 %2936 }
0x10b9   :  { %v2992_v52 = vmul.f32 %v4339_v34, %v2944_v10  ;;  %4344 = vrsqrt.f32 %v2983_v23  ;;  %v2943_v15 = vmul.f32 0.03125, %v2937_v30  ;;  %v2954_v48 = vmul.f32 %v2948_v11, %v2948_v11 }
0x10bb   :  { %v2949_v37 = vsub.f32 %v2915_v4, %v2943_v15  ;;  %v2968_v25 = vsel %vm253_vm2, %v2954_v48, 0.0  ;;  %v3004_v8 = vmul.f32 %v3536_v22, %v2992_v52  ;;  %v4107_v48 = vld [vmem:[%s5995_s20 + $0x8] sm:$0xff]  }
0x10bc   :  { %v4341_v58 = vpop.eup %4340  ;;  %2969 = vadd.xlane.f32.xlu0 %v2968_v25 }
0x10bd   :  { %v2993_v50 = vmul.f32 %v4341_v58, %v2945_v61  ;;  %v2955_v54 = vmul.f32 %v2949_v37, %v2949_v37  ;;  %v3016_v3 = vadd.f32 %v3537_v36, %v3004_v8  ;;  %v4105_v61 = vld [vmem:[%s5993_s18 + $0x28] sm:$0xff]  }
0x10be   :  { %4034 = vmatpush3.bf16.msra.mxu1 %v4105_v61 }
0x10bf   :  { %v3005_v31 = vmul.f32 %v3536_v22, %v2993_v50  ;;  %v2971_v51 = vsel %vm253_vm2, %v2955_v54, 0.0  ;;  %4035 = vmatprep.subr.bf16.mxu1 %v4396_v1 }
0x10c0   :  { %2972 = vadd.xlane.f32.xlu1 %v2971_v51 }
0x10c1   :  { %v3017_v55 = vadd.f32 %v3537_v36, %v3005_v31 }
0x10c2   :  { %v4343_v39 = vpop.eup %4342  ;;  %4036 = vmatpush3.bf16.msra.mxu1 %v4106_v29 }
0x10c3   :  { %v2994_v7 = vmul.f32 %v4343_v39, %v2946_v32  ;;  %v3027_v43 = vpack.c.bf16 %v3017_v55, %v3016_v3 }
0x10c5   :  { %4018 = vmatmul.mubr.msk.bf16.vlgmr.msra.gmra.mxu0 %vm253_vm2, %v3027_v43  ;;  %v3006_v5 = vmul.f32 %v3536_v22, %v2994_v7 }
0x10c6   :  { %v4345_v63 = vpop.eup %4344  ;;  %4021 = vmatprep.mubr.msk.bf16.mxu0 %vm4397_vm0, %v4396_v1  ;;  %4050 = vmatpush3.bf16.msra.mxu0 %v4107_v48 }
0x10c7   :  { %v2995_v4 = vmul.f32 %v4345_v63, %v2947_v13  ;;  %v3018_v28 = vadd.f32 %v3537_v36, %v3006_v5  ;;  %4051 = vmatprep.subr.bf16.mxu0 %v4396_v1 }
0x10c9   :  { %v3007_v56 = vmul.f32 %v3536_v22, %v2995_v4 }
0x10cb   :  { %v3019_v10 = vadd.f32 %v3537_v36, %v3007_v56 }
0x10cd   :  { %v3028_v33 = vpack.c.bf16 %v3019_v10, %v3018_v28  ;;  %v3565_v28 = vld [vmem:[%s5994_s19 + $0x1] ss:$0 sm:$0xff] }
0x10cf   :  { %4022 = vmatmul.mubr.msk.bf16.gmra.mxu0 %vm253_vm2, %v3028_v33 }
0x10d0   :  { %4025 = vmatprep.mubr.msk.bf16.mxu0 %vm4397_vm0, %v4396_v1 }
0x1145   :  { %v2970_v6 = vpop.xlane.xlu0 %2969 }
0x1146   :  { %v2978_v20 = vmul.f32 0.03125, %v2970_v6 }
0x1148   :  { %v2984_v46 = vadd.f32 1e-05, %v2978_v20 }
0x1149   :  { %v2973_v60 = vpop.xlane.xlu1 %2972 }
0x114a   :  { %4346 = vrsqrt.f32 %v2984_v46  ;;  %v2979_v32 = vmul.f32 0.03125, %v2973_v60  ;;  %v3566_v60 = vld [vmem:[%s5996_s21] ss:$0 sm:$0xff]  ;;  %s4374_s21 = scalar_lea.vmem %s3375_s26, 32 }
0x114b   :  { %p4375_p0 = scmp.ne.s32.totalorder %s3375_s26, %s4374_s21  ;;  %p4380_p2 = scmp.lt.s32.totalorder %s4374_s21, %s4374_s21 }
0x114c   :  { %v2985_v27 = vadd.f32 1e-05, %v2979_v32 }
0x114d   :  { %p4381_p3 = por %p4380_p2, %p4379_p1 }
0x114e   :  { %4348 = vrsqrt.f32 %v2985_v27 }
0x114f   :  { %p4382_p4 = pnand %p4381_p3, %p4375_p0 }
0x1157   :  { %v4347_v41 = vpop.eup %4346 }
0x1158   :  { %v2996_v44 = vmul.f32 %v4347_v41, %v2948_v11 }
0x115a   :  { %v3008_v42 = vmul.f32 %v3536_v22, %v2996_v44 }
0x115b   :  { %v4349_v13 = vpop.eup %4348 }
0x115c   :  { %v2997_v0 = vmul.f32 %v4349_v13, %v2949_v37  ;;  %v3020_v26 = vadd.f32 %v3537_v36, %v3008_v42  ;;  %v3570_v42 = vld [vmem:[%s5998_s23] ss:$0 sm:$0xff] }
0x115e   :  { %v3009_v57 = vmul.f32 %v3536_v22, %v2997_v0  ;;  %v4108_v22 = vld [vmem:[%s5995_s20] sm:$0xff]  }
0x115f   :  { %4052 = vmatpush3.bf16.msra.mxu0 %v4108_v22 }
0x1160   :  { %v3021_v19 = vadd.f32 %v3537_v36, %v3009_v57  ;;  %4057 = vmatprep.subr.bf16.mxu0 %v4396_v1 }
0x1162   :  { %v3029_v18 = vpack.c.bf16 %v3021_v19, %v3020_v26 }
0x1164   :  { %4026 = vmatmul.mubr.msk.bf16.gmra.mxu0 %vm253_vm2, %v3029_v18 }
0x1165   :  { %4053 = vmatprep.mubr.msk.bf16.mxu0 %vm4397_vm0, %v4396_v1 }
0x1185   :  { %v3093_v49 = vpop.f32.mrf.mxu0 }
0x1186   :  { %v3094_v2 = vadd.f32 %v3543_v24, %v3093_v49 }
0x1187   :  { %v4019_v47 = vpop.f32.mrf.mxu0 }
0x1188   :  { %v3116_v9 = vmax.f32 %v3094_v2, 0.0 }
0x1189   :  { %v3096_v40 = vpop.f32.mrf.mxu0 }
0x118a   :  { %v3097_v59 = vadd.f32 %v3543_v24, %v3096_v40 }
0x118b   :  { %v4020_v14 = vpop.f32.mrf.mxu0 }
0x118c   :  { %v3117_v21 = vmax.f32 %v3097_v59, 0.0 }
0x118e   :  { %v3131_v62 = vpack.c.bf16 %v3117_v21, %v3116_v9 }
0x118f   :  { %v3101_v12 = vpop.f32.mrf.mxu0 }
0x1190   :  { %4038 = vmatmul.mubr.msk.bf16.vlgmr.msra.gmra.mxu1 %vm184_vm1, %v3131_v62  ;;  %v3102_v17 = vadd.f32 %v3543_v24, %v3101_v12 }
0x1191   :  { %v4023_v16 = vpop.f32.mrf.mxu0  ;;  %4041 = vmatprep.mubr.msk.bf16.mxu1 %vm4397_vm0, %v4396_v1 }
0x1192   :  { %v3118_v30 = vmax.f32 %v3102_v17, 0.0 }
0x1193   :  { %v3104_v23 = vpop.f32.mrf.mxu0 }
0x1194   :  { %v3105_v11 = vadd.f32 %v3543_v24, %v3104_v23 }
0x1195   :  { %v4024_v34 = vpop.f32.mrf.mxu0 }
0x1196   :  { %v3119_v52 = vmax.f32 %v3105_v11, 0.0 }
0x1198   :  { %v3132_v15 = vpack.c.bf16 %v3119_v52, %v3118_v30 }
0x119a   :  { %4042 = vmatmul.mubr.msk.bf16.gmra.mxu1 %vm184_vm1, %v3132_v15 }
0x119b   :  { %4045 = vmatprep.mubr.msk.bf16.mxu1 %vm4397_vm0, %v4396_v1 }
0x1224   :  { %v3109_v37 = vpop.f32.mrf.mxu0 }
0x1225   :  { %v3110_v58 = vadd.f32 %v3543_v24, %v3109_v37 }
0x1226   :  { %v4027_v25 = vpop.f32.mrf.mxu0 }
0x1227   :  { %v3120_v36 = vmax.f32 %v3110_v58, 0.0 }
0x1228   :  { %v3112_v8 = vpop.f32.mrf.mxu0 }
0x1229   :  { %v3113_v50 = vadd.f32 %v3543_v24, %v3112_v8 }
0x122a   :  { %v4028_v54 = vpop.f32.mrf.mxu0 }
0x122b   :  { %v3121_v31 = vmax.f32 %v3113_v50, 0.0 }
0x122d   :  { %v3133_v51 = vpack.c.bf16 %v3121_v31, %v3120_v36 }
0x122f   :  { %4046 = vmatmul.mubr.msk.bf16.gmra.mxu1 %vm184_vm1, %v3133_v51 }
0x1250   :  { %v3201_v3 = vpop.f32.mrf.mxu1 }
0x1251   :  { %v3220_v5 = vadd.f32 %v3201_v3, %v5874_v35  ;;  %v4109_v35 = vld [vmem:[%s5997_s22] sm:$0xff]  }
0x1252   :  { %v4039_v55 = vpop.f32.mrf.mxu1 }
0x1253   :  { %v3230_v38 = vadd.f32 %v3565_v28, %v3220_v5 }
0x1254   :  { %v3204_v39 = vpop.f32.mrf.mxu1 }
0x1256   :  { %v4040_v7 = vpop.f32.mrf.mxu1 }
0x125a   :  { %v3208_v43 = vpop.f32.mrf.mxu1 }
0x125c   :  { %v4043_v63 = vpop.f32.mrf.mxu1 }
0x125e   :  { %v3210_v4 = vpop.f32.mrf.mxu1 }
0x125f   :  { %v3221_v56 = vadd.f32 %v3210_v4, %v5883_v53 }
0x1260   :  { %v4044_v10 = vpop.f32.mrf.mxu1 }
0x1261   :  { %v3231_v33 = vadd.f32 %v3565_v28, %v3221_v56 }
0x1263   :  { %v3233_v45 = vrot.slane %v3231_v33, 7 }
0x1265   :  { %v3236_v61 = vsel %vm3235_vm14, %v3230_v38, %v3233_v45 }
0x1266   :  { %v3241_v29 = vpack.c.bf16 %v3236_v61, %v3236_v61 }
0x1268   :  { %4054 = vmatmul.mubr.msk.bf16.vlgmr.msra.gmra.mxu0 %vm253_vm2, %v3241_v29 }
0x1269   :  { %4059 = vmatprep.mubr.msk.bf16.mxu0 %vm4397_vm0, %v4396_v1  ;;  %4058 = vmatpush3.bf16.msra.mxu0 %v4109_v35  ;;  %vm3366_vm0 = vcmask 74752  }
0x12ef   :  { %v3215_v53 = vpop.f32.mrf.mxu1 }
0x12f1   :  { %v4047_v6 = vpop.f32.mrf.mxu1 }
0x12f3   :  { %v3217_v20 = vpop.f32.mrf.mxu1 }
0x12f5   :  { %v4048_v46 = vpop.f32.mrf.mxu1 }
0x1328   :  { %v3298_v32 = vpop.f32.mrf.mxu0 }
0x1329   :  { %v3299_v27 = vadd.f32 %v3566_v60, %v3298_v32 }
0x132a   :  { %v4055_v41 = vpop.f32.mrf.mxu0 }
0x132b   :  { %v3304_v44 = vmax.f32 %v3299_v27, 0.0 }
0x132c   :  { %v3301_v13 = vpop.f32.mrf.mxu0 }
0x132d   :  { %v3307_v1 = vpack.c.bf16 %v3304_v44, %v3304_v44 }
0x132e   :  { %v4056_v0 = vpop.f32.mrf.mxu0 }
0x132f   :  { %4060 = vmatmul.mubr.msk.bf16.vlgmr.msra.gmra.mxu0 %vm3321_vm15, %v3307_v1 }
0x13ef   :  { %v3359_v57 = vpop.f32.mrf.mxu0 }
0x13f0   :  { %v3360_v26 = vadd.f32 %v3570_v42, %v3359_v57 }
0x13f1   :  { %v4061_v19 = vpop.f32.mrf.mxu0 }
0x13f2   :  { %v3365_v18 = vmax.f32 %v3360_v26, 0.0 }
0x13f3   :  { %v3362_v24 = vpop.f32.mrf.mxu0 }
0x13f4   :  { %3367 = vst.msk [vmem:[#allocation2] sm:$0x3] %vm3366_vm0, %v3365_v18 }
0x13f5   :  { %v4062_v49 = vpop.f32.mrf.mxu0 }
0x13f6   :  { %4385 = shalt.err (!%p4382_p4)
}
0x13f7   :  { %3377 = dma.vmem_to_hbm [thread:$0]  %s3375_s26, 32, %s5999_s24, [#allocation3]  }
0x13f8   :  { %4394 = dma.done.wait [#allocation3], 32  }
0x13f9   :  { %4395 = vsyncadd [#allocation3], 4294967264 }
0x13fa   :  { %3381 = vsyncpa [#allocation3], 1 }

</bundles_post_ra>
